<compile_context>
chip_gen: v6e
topology: v6e:2x2x1
jax: 0.10.0
libtpu: 0.0.40
codegen_flags: <defaults>
</compile_context>

<pallas_src>
import functools

import jax
import jax.numpy as jnp
from jax.experimental import pallas as pl
from jax.experimental.pallas import tpu as pltpu


def _leaky_relu(x, negative_slope=0.01):
    return jnp.where(x > 0, x, negative_slope * x)


def decoder_kernel(x_ref,
                   w1_ref, b1_ref,
                   w2_ref, b2_ref,
                   w3_ref, b3_ref,
                   w4_ref, b4_ref,
                   out_ref):
    """Fused 4-layer MLP: 3x (matmul + bias + leaky_relu) + final matmul + bias.

    MXU inputs are bf16, accumulation is f32; bias-add + leaky_relu stay a
    single add + select per layer on the VPU (hidden under the MXU).
    """
    cdt = w1_ref.dtype  # bf16 compute dtype for MXU operands

    h = jnp.dot(x_ref[...], w1_ref[...],
                preferred_element_type=jnp.float32) + b1_ref[...]
    h = _leaky_relu(h)

    h = jnp.dot(h.astype(cdt), w2_ref[...],
                preferred_element_type=jnp.float32) + b2_ref[...]
    h = _leaky_relu(h)

    h = jnp.dot(h.astype(cdt), w3_ref[...],
                preferred_element_type=jnp.float32) + b3_ref[...]
    h = _leaky_relu(h)

    h = jnp.dot(h.astype(cdt), w4_ref[...],
                preferred_element_type=jnp.float32) + b4_ref[...]

    out_ref[...] = h.astype(out_ref.dtype)


def _round_up(x, m):
    return ((x + m - 1) // m) * m


def _vmem_limit_bytes(block_b, dims):
    """VMEM budget from actual buffer sizes, clamped so it is valid on
    v5e / v6e (128 MiB physical) and v7x (64 MiB per-core physical)."""
    w_bytes = 2  # bf16 weights
    weights = 2 * w_bytes * sum(a * b for a, b in zip(dims[:-1], dims[1:]))  # 2-buf
    biases = 2 * 4 * sum(dims[1:])
    io = 2 * (block_b * dims[0] * w_bytes + block_b * dims[-1] * 4)          # 2-buf
    acts = 4 * block_b * max(dims) * 4          # live f32 intermediates (generous)
    need = weights + biases + io + acts + (8 << 20)   # + compiler scratch slack
    return int(max(32 << 20, min(need, 48 << 20)))


@functools.partial(jax.jit, static_argnames=("p_dim", "block_b"))
def decoder_forward(x, params, *, p_dim, block_b=256):
    """x: (B, ef_dim*8) float32. Returns (B, 4, p_dim) float32 like PyTorch."""
    w1, b1, w2, b2, w3, b3, w4, b4 = params
    B, d_in = x.shape
    d_out = w4.shape[1]
    dims = (d_in, w1.shape[1], w2.shape[1], w3.shape[1], d_out)

    # Batch tile: big enough to feed the MXU M dimension, never bigger than the
    # (rounded) batch; multiple of 16 keeps bf16 sublane tiling happy.
    block = _round_up(min(block_b, _round_up(B, 16)), 16)
    padded_b = _round_up(B, block)
    grid = padded_b // block

    x_c = x.astype(jnp.bfloat16)
    if padded_b != B:
        x_c = jnp.pad(x_c, ((0, padded_b - B), (0, 0)))

    full = lambda a: pl.BlockSpec(a.shape, lambda i: (0, 0))

    out = pl.pallas_call(
        decoder_kernel,
        out_shape=jax.ShapeDtypeStruct((padded_b, d_out), jnp.float32),
        grid_spec=pltpu.PrefetchScalarGridSpec(
            num_scalar_prefetch=0,
            grid=(grid,),
            in_specs=[
                pl.BlockSpec((block, d_in), lambda i: (i, 0)),
                full(w1), full(b1),
                full(w2), full(b2),
                full(w3), full(b3),
                full(w4), full(b4),
            ],
            out_specs=pl.BlockSpec((block, d_out), lambda i: (i, 0)),
        ),
        compiler_params=pltpu.CompilerParams(
            dimension_semantics=("parallel",),
            vmem_limit_bytes=_vmem_limit_bytes(block, dims),
        ),
    )(x_c, w1, b1, w2, b2, w3, b3, w4, b4)

    if padded_b != B:
        out = out[:B]
    return out.reshape(-1, 4, p_dim)


def init_decoder_params(key, ef_dim, p_dim, weight_dtype=jnp.bfloat16):
    """Mirrors the PyTorch init: xavier_uniform_ weights, zero biases.
    Weights are returned pre-transposed to (in_features, out_features) and cast
    to `weight_dtype` (bf16 by default for MXU throughput); biases (1, out) f32."""
    dims = [ef_dim * 8, ef_dim * 16, ef_dim * 32, ef_dim * 64, p_dim * 4]
    params = []
    keys = jax.random.split(key, 4)
    for k, fan_in, fan_out in zip(keys, dims[:-1], dims[1:]):
        bound = (6.0 / (fan_in + fan_out)) ** 0.5
        w_t = jax.random.uniform(k, (fan_in, fan_out), jnp.float32,
                                 minval=-bound, maxval=bound)
        params += [w_t.astype(weight_dtype), jnp.zeros((1, fan_out), jnp.float32)]
    return tuple(params)


if __name__ == "__main__":
    ef_dim = 16   # ef*8=128, ef*16=256, ef*32=512, ef*64=1024
    p_dim = 32    # p_dim*4 = 128 (lane-aligned output)
    batch = 300   # intentionally NOT a tile multiple -> exercises cdiv + padding

    key = jax.random.PRNGKey(0)
    k_x, k_p = jax.random.split(key)
    x = jax.random.normal(k_x, (batch, ef_dim * 8), dtype=jnp.float32)
    params = init_decoder_params(k_p, ef_dim, p_dim)

    out = decoder_forward(x, params, p_dim=p_dim, block_b=128)
    out = jax.block_until_ready(out)

    # Pure-JAX reference using the identical bf16-in / f32-accumulate recipe.
    ref = x.astype(jnp.bfloat16)
    for i in range(4):
        w, b = params[2 * i], params[2 * i + 1]
        ref = jnp.dot(ref, w, preferred_element_type=jnp.float32) + b
        if i < 3:
            ref = jnp.where(ref > 0, ref, 0.01 * ref).astype(jnp.bfloat16)
    ref = ref.reshape(-1, 4, p_dim)

    assert out.shape == (batch, 4, p_dim)
    assert jnp.allclose(out, ref, atol=1e-2, rtol=1e-2), (
        float(jnp.max(jnp.abs(out - ref))))
    print("KERNEL_OK")
</pallas_src>

<mosaic_0001>
module attributes {stable_mosaic.version = 11 : i64} {
  func.func @decoder_kernel(%arg0: i32, %arg1: memref<128x128xbf16, #tpu.memory_space<vmem>>, %arg2: memref<128x256xbf16, #tpu.memory_space<vmem>>, %arg3: memref<1x256xf32, #tpu.memory_space<vmem>>, %arg4: memref<256x512xbf16, #tpu.memory_space<vmem>>, %arg5: memref<1x512xf32, #tpu.memory_space<vmem>>, %arg6: memref<512x1024xbf16, #tpu.memory_space<vmem>>, %arg7: memref<1x1024xf32, #tpu.memory_space<vmem>>, %arg8: memref<1024x128xbf16, #tpu.memory_space<vmem>>, %arg9: memref<1x128xf32, #tpu.memory_space<vmem>>, %arg10: memref<128x128xf32, #tpu.memory_space<vmem>>) attributes {dimension_semantics = [#tpu.dimension_semantics<parallel>], iteration_bounds = array<i64: 3>, scalar_prefetch = 0 : i64, scratch_operands = 0 : i64, tpu.core_type = #tpu.core_type<tc>, window_params = [{transform_indices = @transform_0, window_bounds = array<i64: 128, 128>}, {pipeline_mode = #tpu.pipeline_mode<synchronous>, transform_indices = @transform_1, window_bounds = array<i64: 128, 256>}, {pipeline_mode = #tpu.pipeline_mode<synchronous>, transform_indices = @transform_2, window_bounds = array<i64: 1, 256>}, {pipeline_mode = #tpu.pipeline_mode<synchronous>, transform_indices = @transform_3, window_bounds = array<i64: 256, 512>}, {pipeline_mode = #tpu.pipeline_mode<synchronous>, transform_indices = @transform_4, window_bounds = array<i64: 1, 512>}, {pipeline_mode = #tpu.pipeline_mode<synchronous>, transform_indices = @transform_5, window_bounds = array<i64: 512, 1024>}, {pipeline_mode = #tpu.pipeline_mode<synchronous>, transform_indices = @transform_6, window_bounds = array<i64: 1, 1024>}, {pipeline_mode = #tpu.pipeline_mode<synchronous>, transform_indices = @transform_7, window_bounds = array<i64: 1024, 128>}, {pipeline_mode = #tpu.pipeline_mode<synchronous>, transform_indices = @transform_8, window_bounds = array<i64: 1, 128>}, {transform_indices = @transform_9, window_bounds = array<i64: 128, 128>}]} {
    %c0 = arith.constant 0 : index
    %c0_0 = arith.constant 0 : index
    %0 = vector.load %arg1[%c0, %c0_0] : memref<128x128xbf16, #tpu.memory_space<vmem>>, vector<128x128xbf16>
    %c0_1 = arith.constant 0 : index
    %c0_2 = arith.constant 0 : index
    %1 = vector.load %arg2[%c0_1, %c0_2] : memref<128x256xbf16, #tpu.memory_space<vmem>>, vector<128x256xbf16>
    %cst = arith.constant dense<0.000000e+00> : vector<128x256xf32>
    %2 = tpu.matmul %0, %1, %cst {dimension_numbers = #tpu.dot_dimension_numbers<[1], [0], [0], [1], [0, 0, 1, 1], [], []>} : vector<128x128xbf16>, vector<128x256xbf16>, vector<128x256xf32> -> vector<128x256xf32>
    %c0_3 = arith.constant 0 : index
    %c0_4 = arith.constant 0 : index
    %3 = vector.load %arg3[%c0_3, %c0_4] : memref<1x256xf32, #tpu.memory_space<vmem>>, vector<1x256xf32>
    %4 = vector.broadcast %3 : vector<1x256xf32> to vector<128x256xf32>
    %5 = arith.addf %2, %4 : vector<128x256xf32>
    %cst_5 = arith.constant 0.000000e+00 : f32
    %6 = vector.broadcast %cst_5 : f32 to vector<128x256xf32>
    %7 = arith.cmpf ogt, %5, %6 : vector<128x256xf32>
    %cst_6 = arith.constant 0.00999999977 : f32
    %8 = vector.broadcast %cst_6 : f32 to vector<128x256xf32>
    %9 = arith.mulf %8, %5 : vector<128x256xf32>
    %10 = arith.select %7, %5, %9 : vector<128x256xi1>, vector<128x256xf32>
    %11 = arith.truncf %10 : vector<128x256xf32> to vector<128x256xbf16>
    %c0_7 = arith.constant 0 : index
    %c0_8 = arith.constant 0 : index
    %12 = vector.load %arg4[%c0_7, %c0_8] : memref<256x512xbf16, #tpu.memory_space<vmem>>, vector<256x512xbf16>
    %cst_9 = arith.constant dense<0.000000e+00> : vector<128x512xf32>
    %13 = tpu.matmul %11, %12, %cst_9 {dimension_numbers = #tpu.dot_dimension_numbers<[1], [0], [0], [1], [0, 0, 1, 1], [], []>} : vector<128x256xbf16>, vector<256x512xbf16>, vector<128x512xf32> -> vector<128x512xf32>
    %c0_10 = arith.constant 0 : index
    %c0_11 = arith.constant 0 : index
    %14 = vector.load %arg5[%c0_10, %c0_11] : memref<1x512xf32, #tpu.memory_space<vmem>>, vector<1x512xf32>
    %15 = vector.broadcast %14 : vector<1x512xf32> to vector<128x512xf32>
    %16 = arith.addf %13, %15 : vector<128x512xf32>
    %cst_12 = arith.constant 0.000000e+00 : f32
    %17 = vector.broadcast %cst_12 : f32 to vector<128x512xf32>
    %18 = arith.cmpf ogt, %16, %17 : vector<128x512xf32>
    %cst_13 = arith.constant 0.00999999977 : f32
    %19 = vector.broadcast %cst_13 : f32 to vector<128x512xf32>
    %20 = arith.mulf %19, %16 : vector<128x512xf32>
    %21 = arith.select %18, %16, %20 : vector<128x512xi1>, vector<128x512xf32>
    %22 = arith.truncf %21 : vector<128x512xf32> to vector<128x512xbf16>
    %c0_14 = arith.constant 0 : index
    %c0_15 = arith.constant 0 : index
    %23 = vector.load %arg6[%c0_14, %c0_15] : memref<512x1024xbf16, #tpu.memory_space<vmem>>, vector<512x1024xbf16>
    %cst_16 = arith.constant dense<0.000000e+00> : vector<128x1024xf32>
    %24 = tpu.matmul %22, %23, %cst_16 {dimension_numbers = #tpu.dot_dimension_numbers<[1], [0], [0], [1], [0, 0, 1, 1], [], []>} : vector<128x512xbf16>, vector<512x1024xbf16>, vector<128x1024xf32> -> vector<128x1024xf32>
    %c0_17 = arith.constant 0 : index
    %c0_18 = arith.constant 0 : index
    %25 = vector.load %arg7[%c0_17, %c0_18] : memref<1x1024xf32, #tpu.memory_space<vmem>>, vector<1x1024xf32>
    %26 = vector.broadcast %25 : vector<1x1024xf32> to vector<128x1024xf32>
    %27 = arith.addf %24, %26 : vector<128x1024xf32>
    %cst_19 = arith.constant 0.000000e+00 : f32
    %28 = vector.broadcast %cst_19 : f32 to vector<128x1024xf32>
    %29 = arith.cmpf ogt, %27, %28 : vector<128x1024xf32>
    %cst_20 = arith.constant 0.00999999977 : f32
    %30 = vector.broadcast %cst_20 : f32 to vector<128x1024xf32>
    %31 = arith.mulf %30, %27 : vector<128x1024xf32>
    %32 = arith.select %29, %27, %31 : vector<128x1024xi1>, vector<128x1024xf32>
    %33 = arith.truncf %32 : vector<128x1024xf32> to vector<128x1024xbf16>
    %c0_21 = arith.constant 0 : index
    %c0_22 = arith.constant 0 : index
    %34 = vector.load %arg8[%c0_21, %c0_22] : memref<1024x128xbf16, #tpu.memory_space<vmem>>, vector<1024x128xbf16>
    %cst_23 = arith.constant dense<0.000000e+00> : vector<128x128xf32>
    %35 = tpu.matmul %33, %34, %cst_23 {dimension_numbers = #tpu.dot_dimension_numbers<[1], [0], [0], [1], [0, 0, 1, 1], [], []>} : vector<128x1024xbf16>, vector<1024x128xbf16>, vector<128x128xf32> -> vector<128x128xf32>
    %c0_24 = arith.constant 0 : index
    %c0_25 = arith.constant 0 : index
    %36 = vector.load %arg9[%c0_24, %c0_25] : memref<1x128xf32, #tpu.memory_space<vmem>>, vector<1x128xf32>
    %37 = vector.broadcast %36 : vector<1x128xf32> to vector<128x128xf32>
    %38 = arith.addf %35, %37 : vector<128x128xf32>
    %c0_26 = arith.constant 0 : index
    %c0_27 = arith.constant 0 : index
    %39 = vector.load %arg10[%c0_26, %c0_27] : memref<128x128xf32, #tpu.memory_space<vmem>>, vector<128x128xf32>
    tpu.vector_store %arg10[%c0_26, %c0_27], %38 {strides = array<i32>} : memref<128x128xf32, #tpu.memory_space<vmem>>, vector<128x128xf32>,
    return
  }
  func.func @transform_0(%arg0: i32) -> (i32, i32) {
    %c0_i32 = arith.constant 0 : i32
    %c0_i32_0 = arith.constant 0 : i32
    return %arg0, %c0_i32 : i32, i32
  }
  func.func @transform_1(%arg0: i32) -> (i32, i32) {
    %c0_i32 = arith.constant 0 : i32
    %c0_i32_0 = arith.constant 0 : i32
    %c0_i32_1 = arith.constant 0 : i32
    return %c0_i32, %c0_i32_0 : i32, i32
  }
  func.func @transform_2(%arg0: i32) -> (i32, i32) {
    %c0_i32 = arith.constant 0 : i32
    %c0_i32_0 = arith.constant 0 : i32
    %c0_i32_1 = arith.constant 0 : i32
    return %c0_i32, %c0_i32_0 : i32, i32
  }
  func.func @transform_3(%arg0: i32) -> (i32, i32) {
    %c0_i32 = arith.constant 0 : i32
    %c0_i32_0 = arith.constant 0 : i32
    %c0_i32_1 = arith.constant 0 : i32
    return %c0_i32, %c0_i32_0 : i32, i32
  }
  func.func @transform_4(%arg0: i32) -> (i32, i32) {
    %c0_i32 = arith.constant 0 : i32
    %c0_i32_0 = arith.constant 0 : i32
    %c0_i32_1 = arith.constant 0 : i32
    return %c0_i32, %c0_i32_0 : i32, i32
  }
  func.func @transform_5(%arg0: i32) -> (i32, i32) {
    %c0_i32 = arith.constant 0 : i32
    %c0_i32_0 = arith.constant 0 : i32
    %c0_i32_1 = arith.constant 0 : i32
    return %c0_i32, %c0_i32_0 : i32, i32
  }
  func.func @transform_6(%arg0: i32) -> (i32, i32) {
    %c0_i32 = arith.constant 0 : i32
    %c0_i32_0 = arith.constant 0 : i32
    %c0_i32_1 = arith.constant 0 : i32
    return %c0_i32, %c0_i32_0 : i32, i32
  }
  func.func @transform_7(%arg0: i32) -> (i32, i32) {
    %c0_i32 = arith.constant 0 : i32
    %c0_i32_0 = arith.constant 0 : i32
    %c0_i32_1 = arith.constant 0 : i32
    return %c0_i32, %c0_i32_0 : i32, i32
  }
  func.func @transform_8(%arg0: i32) -> (i32, i32) {
    %c0_i32 = arith.constant 0 : i32
    %c0_i32_0 = arith.constant 0 : i32
    %c0_i32_1 = arith.constant 0 : i32
    return %c0_i32, %c0_i32_0 : i32, i32
  }
  func.func @transform_9(%arg0: i32) -> (i32, i32) {
    %c0_i32 = arith.constant 0 : i32
    %c0_i32_0 = arith.constant 0 : i32
    return %arg0, %c0_i32 : i32, i32
  }
}

</mosaic_0001>

<bundles_post_ra>
// kernel: decoder_forward.1
= control target key start
LH: loop header
LB: loop body
LE: loop exit
PB: predicated region body
PF: predicated region fallthrough
CT: control target
= control target key end

     0   :  { %14 = vsyncpa [#allocation3], 0  ;;  %s8684_s0 = inlined_call_operand.vmem [shape: bf16[384,128], index: 0, kind: input, shape index: {}]   ;;  %s8685_s1 = inlined_call_operand.vmem [shape: bf16[128,256], index: 1, kind: input, shape index: {}]   ;;  %s8686_s2 = inlined_call_operand.vmem [shape: f32[1,256], index: 2, kind: input, shape index: {}]   ;;  %s8687_s3 = inlined_call_operand.vmem [shape: bf16[256,512], index: 3, kind: input, shape index: {}]   ;;  %s8688_s4 = inlined_call_operand.vmem [shape: f32[1,512], index: 4, kind: input, shape index: {}]   ;;  %s8689_s5 = inlined_call_operand.hbm [shape: bf16[512,1024], index: 5, kind: input, shape index: {}]   ;;  %s8690_s6 = inlined_call_operand.vmem [shape: f32[1,1024], index: 6, kind: input, shape index: {}]   ;;  %s8691_s7 = inlined_call_operand.hbm [shape: bf16[1024,128], index: 7, kind: input, shape index: {}]   ;;  %s8692_s8 = inlined_call_operand.vmem [shape: f32[1,128], index: 8, kind: input, shape index: {}]   ;;  %s8693_s9 = inlined_call_operand.vmem [shape: f32[384,128], index: 9, kind: output, shape index: {}]  }
   0x1   :  { %15 = vsyncpa [#allocation5], 0  ;;  %s6599_s30 = smov 0  }
   0x2 LB: > { %s6542_s10 = smov [#allocation2]   ;;  %s5551_s12 = sadd.s32 4294967295, %s6540_s30   ;;  %s6540_s30 = sphi %s6599_s30, %s21_s30  }
   0x3   : > { %s270_s11 = sshll.u32 %s6542_s10, 4  ;;  %p5553_p0 = scmp.ge.s32.totalorder %s6540_s30, 1  ;;  %s271_s11 = int_to_ptr.vmem [resolvable:$true] %s270_s11 }
   0x4   : > { %p246_p1 = scmp.lt.s32.totalorder %s6540_s30, 4  ;;  %p6613_p3 = scmp.eq.s32.totalorder %s5551_s12, 0 }
   0x5   : > { %s6543_s15 = smov [#allocation4]   ;;  %s6485_s18 = scalar_lea.vmem %s271_s11, 32768 }
   0x6   : > { %p6607_p2 = pnand %p5553_p0, %p246_p1  ;;  %s286_s16 = sshll.u32 %s6543_s15, 4  ;;  %s287_s16 = int_to_ptr.vmem [resolvable:$true] %s286_s16 }
   0x7   : > { %p6486_p7 = scmp.ne.s32.totalorder %s271_s11, %s6485_s18  ;;  %p6493_p10 = scmp.lt.s32.totalorder %s271_s11, %s271_s11 }
   0x8   : > { %p6255_p4 = pneg %p6607_p2  ;;  %p6494_p11 = scmp.lt.s32.totalorder %s6485_s18, %s6485_s18 }
   0xa   : > { %p6621_p5 = pnand %p6613_p3, %p6255_p4  ;;  %p6495_p12 = por %p6494_p11, %p6493_p10 }
   0xc   : > { %p6476_p6 = pneg %p6621_p5 }
   0xe   : > { %p6488_p8 = pnand %p6486_p7, %p6476_p6 }
  0x10   : > { %p6489_p9 = pneg %p6488_p8 }
  0x12   : > { %p6496_p13 = pnand %p6495_p12, %p6489_p9 }
  0x14   : > { %6499 = shalt.err (!%p6496_p13)
}
  0x15   : > { %s6544_s19 = smov 512   ;;  %s6545_s20 = smov 32  }
  0x16   : > { %6258 = dma.hbm_to_vmem [thread:$0]  (!%p6621_p5), %s8689_s5, 32768, %s271_s11, [#allocation3], %s6544_s19, %s6544_s19, %s6545_s20  }
  0x17   : > { %s6511_s23 = scalar_lea.vmem %s287_s16, 8192  ;;  %p6519_p7 = scmp.lt.s32.totalorder %s287_s16, %s287_s16 }
  0x18   : > { %p6512_p0 = scmp.ne.s32.totalorder %s287_s16, %s6511_s23  ;;  %p6520_p8 = scmp.lt.s32.totalorder %s6511_s23, %s6511_s23 }
  0x1a   : > { %p6514_p1 = pnand %p6512_p0, %p6476_p6  ;;  %p6521_p10 = por %p6520_p8, %p6519_p7 }
  0x1c   : > { %p6515_p4 = pneg %p6514_p1 }
  0x1e   : > { %p6522_p9 = pnand %p6521_p10, %p6515_p4 }
  0x20   : > { %6525 = shalt.err (!%p6522_p9)
}
  0x21   : > { %s6546_s24 = smov 64   ;;  %s6547_s25 = smov 4  }
  0x22   : > { %6261 = dma.hbm_to_vmem [thread:$0]  (!%p6621_p5), %s8691_s7, 8192, %s287_s16, [#allocation5], %s6546_s24, %s6546_s24, %s6547_s25  }
  0x23   : > { %314 = sbr.rel (%p6607_p2) target bundleno = 1172 (0x494), region = 56 }
  0x28   : > { %6531 = dma.done.wait (%p6613_p3), [#allocation3], 32768  }
  0x29   : > { %6533 = vsyncadd (%p6613_p3), [#allocation3], 4294934528 }
  0x2a   : > { %6535 = dma.done.wait (%p6613_p3), [#allocation5], 8192  }
  0x2b   : > { %6537 = vsyncadd (%p6613_p3), [#allocation5], 4294959104  ;;  %v6548_v0 = vmov 0   ;;  %s5560_s28 = sshll.u32 %s5551_s12, 4  ;;  %v6281_v1 = vld [vmem:[%s8685_s1 + $0x74] ss:$8 sps:$4 sm:$0xff]  }
  0x2c   : > { %571 = vmatprep.mubr.bf16.mxu0 %v6548_v0  ;;  %p355_p5 = scmp.lt.s32.totalorder %s5560_s28, 47  ;;  %v6283_v2 = vld [vmem:[%s8685_s1 + $0x70] ss:$8 sps:$4 sm:$0xff]   ;;  %539 = vmatprep.subr.bf16.mxu0 %v6281_v1  ;;  %v6284_v3 = vld [vmem:[%s8685_s1 + $0x64] ss:$8 sps:$4 sm:$0xff]  }
  0x2d   : > { %540 = vmatpush1.bf16.msra.mxu0 %v6283_v2  ;;  %v6286_v4 = vld [vmem:[%s8685_s1 + $0x60] ss:$8 sps:$4 sm:$0xff]   ;;  %v6287_v5 = vld [vmem:[%s8685_s1 + $0x54] ss:$8 sps:$4 sm:$0xff]   ;;  %v6289_v6 = vld [vmem:[%s8685_s1 + $0x50] ss:$8 sps:$4 sm:$0xff]  }
  0x2e   : > { %s8922_s28 = smov (!%p355_p5, %s5560_s28), 47  ;;  %541 = vmatprep.subr.bf16.mxu0 %v6284_v3  ;;  %v6290_v7 = vld [vmem:[%s8685_s1 + $0x44] ss:$8 sps:$4 sm:$0xff]   ;;  %v6292_v8 = vld [vmem:[%s8685_s1 + $0x40] ss:$8 sps:$4 sm:$0xff]  }
  0x2f   : > { %s5561_s19 = sshll.u32 %s8922_s28, 2  ;;  %v6293_v9 = vld [vmem:[%s8685_s1 + $0x34] ss:$8 sps:$4 sm:$0xff]   ;;  %v6295_v10 = vld [vmem:[%s8685_s1 + $0x30] ss:$8 sps:$4 sm:$0xff]   ;;  %s5563_s18 = sshll.u32 %s8922_s28, 3 }
  0x30   : > { %s6683_s26 = scalar_lea.vmem %s8684_s0, %s5561_s19  ;;  %v6296_v11 = vld [vmem:[%s8685_s1 + $0x24] ss:$8 sps:$4 sm:$0xff]   ;;  %v6298_v12 = vld [vmem:[%s8685_s1 + $0x20] ss:$8 sps:$4 sm:$0xff]   ;;  %v6299_v14 = vld [vmem:[%s8685_s1 + $0x14] ss:$8 sps:$4 sm:$0xff]   ;;  %s8576_s21 = scalar_lea.vmem %s8693_s9, %s5563_s18 }
  0x31   : > { %542 = vmatpush1.bf16.msra.mxu0 %v6286_v4  ;;  %v6313_v13 = vld [vmem:[%s8687_s3 + $0xe4] ss:$16 sps:$4 sm:$0xff]   ;;  %v6318_v15 = vld [vmem:[%s8687_s3 + $0xe0] ss:$16 sps:$4 sm:$0xff]   ;;  %v6317_v23 = vld [vmem:[%s8687_s3 + $0xec] ss:$16 sps:$4 sm:$0xff]  }
  0x32   : > { %543 = vmatprep.subr.bf16.mxu0 %v6287_v5  ;;  %1170 = vmatprep.subr.bf16.mxu1 %v6313_v13  ;;  %v6319_v16 = vld [vmem:[%s8687_s3 + $0xc4] ss:$16 sps:$4 sm:$0xff]   ;;  %v6301_v17 = vld [vmem:[%s8685_s1 + $0x10] ss:$8 sps:$4 sm:$0xff]   ;;  %v6304_v21 = vld [vmem:[%s8685_s1] ss:$8 sps:$4 sm:$0xff]  }
  0x33   : > { %v6302_v18 = vld [vmem:[%s8685_s1 + $0x4] ss:$8 sps:$4 sm:$0xff]   ;;  %1171 = vmatpush1.bf16.msra.mxu1 %v6318_v15  ;;  %v6324_v19 = vld [vmem:[%s8687_s3 + $0xc0] ss:$16 sps:$4 sm:$0xff]   ;;  %v6315_v26 = vld [vmem:[%s8687_s3 + $0xe8] ss:$16 sps:$4 sm:$0xff]  }
  0x34   : > { %1172 = vmatprep.subr.bf16.mxu1 %v6319_v16  ;;  %v6325_v20 = vld [vmem:[%s8687_s3 + $0xa4] ss:$16 sps:$4 sm:$0xff]   ;;  %v6330_v22 = vld [vmem:[%s8687_s3 + $0xa0] ss:$16 sps:$4 sm:$0xff]   ;;  %v6323_v27 = vld [vmem:[%s8687_s3 + $0xcc] ss:$16 sps:$4 sm:$0xff]  }
  0x35   : > { %544 = vmatpush1.bf16.msra.mxu0 %v6289_v6  ;;  %v6331_v24 = vld [vmem:[%s8687_s3 + $0x84] ss:$16 sps:$4 sm:$0xff]   ;;  %v6336_v28 = vld [vmem:[%s8687_s3 + $0x80] ss:$16 sps:$4 sm:$0xff]   ;;  %v6321_v30 = vld [vmem:[%s8687_s3 + $0xc8] ss:$16 sps:$4 sm:$0xff]  }
  0x36   : > { %545 = vmatprep.subr.bf16.mxu0 %v6290_v7  ;;  %v6305_v25 = vld [vmem:[%s6683_s26] sm:$0xff]   ;;  %v6329_v31 = vld [vmem:[%s8687_s3 + $0xac] ss:$16 sps:$4 sm:$0xff]   ;;  %v6327_v35 = vld [vmem:[%s8687_s3 + $0xa8] ss:$16 sps:$4 sm:$0xff]  }
  0x37   : > { %1173 = vmatpush1.bf16.msra.mxu1 %v6324_v19  ;;  %v6337_v29 = vld [vmem:[%s8687_s3 + $0x64] ss:$16 sps:$4 sm:$0xff]   ;;  %v6342_v32 = vld [vmem:[%s8687_s3 + $0x60] ss:$16 sps:$4 sm:$0xff]   ;;  %v6306_v34 = vld [vmem:[%s6683_s26 + $0x8] sm:$0xff]  }
  0x38   : > { %1174 = vmatprep.subr.bf16.mxu1 %v6325_v20  ;;  %v6343_v33 = vld [vmem:[%s8687_s3 + $0x44] ss:$16 sps:$4 sm:$0xff]   ;;  %v6335_v36 = vld [vmem:[%s8687_s3 + $0x8c] ss:$16 sps:$4 sm:$0xff]   ;;  %v6348_v37 = vld [vmem:[%s8687_s3 + $0x40] ss:$16 sps:$4 sm:$0xff]  }
  0x39   : > { %546 = vmatpush1.bf16.msra.mxu0 %v6292_v8  ;;  %v6349_v38 = vld [vmem:[%s8687_s3 + $0x24] ss:$16 sps:$4 sm:$0xff]   ;;  %v6333_v39 = vld [vmem:[%s8687_s3 + $0x88] ss:$16 sps:$4 sm:$0xff]   ;;  %v6341_v40 = vld [vmem:[%s8687_s3 + $0x6c] ss:$16 sps:$4 sm:$0xff]  }
  0x3a   : > { %547 = vmatprep.subr.bf16.mxu0 %v6293_v9  ;;  %v6354_v41 = vld [vmem:[%s8687_s3 + $0x20] ss:$16 sps:$4 sm:$0xff]   ;;  %v6355_v42 = vld [vmem:[%s8687_s3 + $0x4] ss:$16 sps:$4 sm:$0xff]   ;;  %v6339_v44 = vld [vmem:[%s8687_s3 + $0x68] ss:$16 sps:$4 sm:$0xff]  }
  0x3b   : > { %1175 = vmatpush1.bf16.msra.mxu1 %v6330_v22  ;;  %v6307_v43 = vld [vmem:[%s6683_s26 + $0x10] sm:$0xff]   ;;  %v6347_v45 = vld [vmem:[%s8687_s3 + $0x4c] ss:$16 sps:$4 sm:$0xff]   ;;  %v6345_v48 = vld [vmem:[%s8687_s3 + $0x48] ss:$16 sps:$4 sm:$0xff]  }
  0x3c   : > { %1176 = vmatprep.subr.bf16.mxu1 %v6331_v24  ;;  %v6360_v46 = vld [vmem:[%s8687_s3] ss:$16 sps:$4 sm:$0xff]   ;;  %v6361_v47 = vld [vmem:[%s8687_s3 + $0x1e4] ss:$16 sps:$4 sm:$0xff]   ;;  %v6308_v49 = vld [vmem:[%s6683_s26 + $0x18] sm:$0xff]  }
  0x3d   : > { %548 = vmatpush1.bf16.msra.mxu0 %v6295_v10  ;;  %v6353_v50 = vld [vmem:[%s8687_s3 + $0x2c] ss:$16 sps:$4 sm:$0xff]   ;;  %v6366_v51 = vld [vmem:[%s8687_s3 + $0x1e0] ss:$16 sps:$4 sm:$0xff]   ;;  %v6351_v52 = vld [vmem:[%s8687_s3 + $0x28] ss:$16 sps:$4 sm:$0xff]  }
  0x3e   : > { %549 = vmatprep.subr.bf16.mxu0 %v6296_v11  ;;  %v6367_v53 = vld [vmem:[%s8687_s3 + $0x1c4] ss:$16 sps:$4 sm:$0xff]   ;;  %v6359_v54 = vld [vmem:[%s8687_s3 + $0xc] ss:$16 sps:$4 sm:$0xff]   ;;  %v6372_v55 = vld [vmem:[%s8687_s3 + $0x1c0] ss:$16 sps:$4 sm:$0xff]  }
  0x3f   : > { %1177 = vmatpush1.bf16.msra.mxu1 %v6336_v28  ;;  %v6373_v56 = vld [vmem:[%s8687_s3 + $0x1a4] ss:$16 sps:$4 sm:$0xff]   ;;  %v6357_v57 = vld [vmem:[%s8687_s3 + $0x8] ss:$16 sps:$4 sm:$0xff]   ;;  %v6365_v58 = vld [vmem:[%s8687_s3 + $0x1ec] ss:$16 sps:$4 sm:$0xff]  }
  0x40   : > { %1178 = vmatprep.subr.bf16.mxu1 %v6337_v29  ;;  %v6378_v59 = vld [vmem:[%s8687_s3 + $0x1a0] ss:$16 sps:$4 sm:$0xff]   ;;  %v6379_v60 = vld [vmem:[%s8687_s3 + $0x184] ss:$16 sps:$4 sm:$0xff]   ;;  %v6363_v62 = vld [vmem:[%s8687_s3 + $0x1e8] ss:$16 sps:$4 sm:$0xff]  }
  0x41   : > { %550 = vmatpush1.bf16.msra.mxu0 %v6298_v12  ;;  %v6309_v61 = vld [vmem:[%s6683_s26 + $0x20] sm:$0xff]   ;;  %v6371_v63 = vld [vmem:[%s8687_s3 + $0x1cc] ss:$16 sps:$4 sm:$0xff]   ;;  %v6369_v3 = vld [vmem:[%s8687_s3 + $0x1c8] ss:$16 sps:$4 sm:$0xff]  }
  0x42   : > { %551 = vmatprep.subr.bf16.mxu0 %v6299_v14  ;;  %v6384_v1 = vld [vmem:[%s8687_s3 + $0x180] ss:$16 sps:$4 sm:$0xff]   ;;  %v6385_v2 = vld [vmem:[%s8687_s3 + $0x164] ss:$16 sps:$4 sm:$0xff]   ;;  %v6377_v4 = vld [vmem:[%s8687_s3 + $0x1ac] ss:$16 sps:$4 sm:$0xff]  }
  0x43   : > { %1179 = vmatpush1.bf16.msra.mxu1 %v6342_v32  ;;  %v6310_v5 = vld [vmem:[%s6683_s26 + $0x28] sm:$0xff]   ;;  %v6311_v10 = vld [vmem:[%s6683_s26 + $0x30] sm:$0xff]   ;;  %v6312_v12 = vld [vmem:[%s6683_s26 + $0x38] sm:$0xff]  }
  0x44   : > { %1180 = vmatprep.subr.bf16.mxu1 %v6343_v33  ;;  %v6375_v6 = vld [vmem:[%s8687_s3 + $0x1a8] ss:$16 sps:$4 sm:$0xff]   ;;  %v6383_v7 = vld [vmem:[%s8687_s3 + $0x18c] ss:$16 sps:$4 sm:$0xff]   ;;  %v6390_v13 = vld [vmem:[%s8687_s3 + $0x160] ss:$16 sps:$4 sm:$0xff]   ;;  %v401_v33 = vlaneseq }
  0x45   : > { %552 = vmatpush1.bf16.msra.mxu0 %v6301_v17  ;;  %v6381_v8 = vld [vmem:[%s8687_s3 + $0x188] ss:$16 sps:$4 sm:$0xff]   ;;  %v6389_v9 = vld [vmem:[%s8687_s3 + $0x16c] ss:$16 sps:$4 sm:$0xff]   ;;  %v6391_v14 = vld [vmem:[%s8687_s3 + $0x144] ss:$16 sps:$4 sm:$0xff]  }
  0x46   : > { %553 = vmatprep.subr.bf16.mxu0 %v6302_v18  ;;  %v6387_v11 = vld [vmem:[%s8687_s3 + $0x168] ss:$16 sps:$4 sm:$0xff]   ;;  %v6395_v15 = vld [vmem:[%s8687_s3 + $0x14c] ss:$16 sps:$4 sm:$0xff]   ;;  %v6396_v16 = vld [vmem:[%s8687_s3 + $0x140] ss:$16 sps:$4 sm:$0xff]  }
  0x47   : > { %1181 = vmatpush1.bf16.msra.mxu1 %v6348_v37  ;;  %v6397_v17 = vld [vmem:[%s8687_s3 + $0x124] ss:$16 sps:$4 sm:$0xff]   ;;  %v6401_v18 = vld [vmem:[%s8687_s3 + $0x12c] ss:$16 sps:$4 sm:$0xff]   ;;  %v6399_v19 = vld [vmem:[%s8687_s3 + $0x128] ss:$16 sps:$4 sm:$0xff]  }
  0x48   : > { %1182 = vmatprep.subr.bf16.mxu1 %v6349_v38  ;;  %v6402_v20 = vld [vmem:[%s8687_s3 + $0x120] ss:$16 sps:$4 sm:$0xff]   ;;  %v6407_v22 = vld [vmem:[%s8687_s3 + $0x10c] ss:$16 sps:$4 sm:$0xff]  }
  0x49   : > { %554 = vmatpush1.bf16.msra.mxu0 %v6304_v21  ;;  %v6403_v21 = vld [vmem:[%s8687_s3 + $0x104] ss:$16 sps:$4 sm:$0xff]   ;;  %v6408_v24 = vld [vmem:[%s8687_s3 + $0x100] ss:$16 sps:$4 sm:$0xff]  }
  0x4a   : > { %1283 = vmatprep.subr.bf16.mxu0 %v6317_v23  ;;  %v6405_v23 = vld [vmem:[%s8687_s3 + $0x108] ss:$16 sps:$4 sm:$0xff]   ;;  %v399_v37 = vld [vmem:[%s8686_s2] sm:$0x3] }
  0x4b   : > { %1183 = vmatpush1.bf16.msra.mxu1 %v6354_v41 }
  0x4c   : > { %572 = vmatmul.mubr.bf16.vlgmr.msra.gmra.mxu0 %v6305_v25  ;;  %1184 = vmatprep.subr.bf16.mxu1 %v6355_v42  ;;  %v6919_v25 = vld [vmem:[#allocation2 + $0x1c0] sm:$0xff] }
  0x4d   : > { %581 = vmatprep.mubr.bf16.mxu0 %v6548_v0  ;;  %1284 = vmatpush1.bf16.msra.mxu0 %v6315_v26  ;;  %v6921_v26 = vld [vmem:[#allocation2 + $0x1e0] sm:$0xff] }
  0x4e   : > { %1285 = vmatprep.subr.bf16.mxu0 %v6323_v27  ;;  %v6923_v27 = vld [vmem:[#allocation2 + $0x5c0] sm:$0xff]  ;;  %v5708_v28 = vcombine.low %v6919_v25, %v6921_v26  ;;  %v5709_v29 = vcombine.high %v6919_v25, %v6921_v26 }
  0x4f   : > { %1185 = vmatpush1.bf16.msra.mxu1 %v6360_v46 }
  0x50   : > { %1186 = vmatprep.subr.bf16.mxu1 %v6361_v47 }
  0x51   : > { %1286 = vmatpush1.bf16.msra.mxu0 %v6321_v30  ;;  %v6929_v30 = vld [vmem:[#allocation2 + $0x5e0] sm:$0xff] }
  0x52   : > { %1287 = vmatprep.subr.bf16.mxu0 %v6329_v31  ;;  %v5836_v31 = vcombine.low %v6923_v27, %v6929_v30  ;;  %v5837_v32 = vcombine.high %v6923_v27, %v6929_v30  ;;  %v1780_v27 = vld [vmem:[#allocation2 + $0x500] sm:$0xff] }
  0x53   : > { %1187 = vmatpush2.bf16.msra.mxu1 %v6366_v51 }
  0x54   : > { %582 = vmatmul.mubr.bf16.gmra.mxu0 %v6306_v34  ;;  %1188 = vmatprep.subr.bf16.mxu1 %v6367_v53  ;;  %v6935_v34 = vshrl.u32 %v401_v33, 7  ;;  %v1668_v53 = vld [vmem:[#allocation2 + $0x180] sm:$0xff] }
  0x55   : > { %591 = vmatprep.mubr.bf16.mxu0 %v6548_v0  ;;  %1288 = vmatpush1.bf16.msra.mxu0 %v6327_v35 }
  0x56   : > { %1289 = vmatprep.subr.bf16.mxu0 %v6335_v36  ;;  %8760 = vst [vmem:[#allocation8_spill] sm:$0xff] %v6935_v34  ;;  %v6938_v35 = vsub.s32 1, %v6935_v34  ;;  %v6941_v36 = vsub.s32 0, %v6935_v34 }
  0x57   : > { %1189 = vmatpush2.bf16.msra.mxu1 %v6372_v55 }
  0x58   : > { %1190 = vmatprep.subr.bf16.mxu1 %v6373_v56  ;;  %8761 = vst [vmem:[#allocation9_spill] sm:$0xff] %v6938_v35  ;;  %8762 = vst [vmem:[#allocation10_spill] sm:$0xff] %v6941_v36  ;;  %v6947_v38 = vrot.slane %v399_v37, %v6938_v35  ;;  %v1672_v56 = vld [vmem:[#allocation2 + $0x1a0] sm:$0xff] }
  0x59   : > { %1290 = vmatpush1.bf16.msra.mxu0 %v6333_v39  ;;  %v6950_v39 = vrot.slane %v399_v37, %v6941_v36 }
  0x5a   : > { %1291 = vmatprep.subr.bf16.mxu0 %v6341_v40 }
  0x5b   : > { %1191 = vmatpush2.bf16.msra.mxu1 %v6378_v59 }
  0x5c   : > { %592 = vmatmul.mubr.bf16.gmra.mxu0 %v6307_v43  ;;  %1192 = vmatprep.subr.bf16.mxu1 %v6379_v60 }
  0x5d   : > { %601 = vmatprep.mubr.bf16.mxu0 %v6548_v0  ;;  %1292 = vmatpush1.bf16.msra.mxu0 %v6339_v44 }
  0x5e   : > { %1293 = vmatprep.subr.bf16.mxu0 %v6347_v45 }
  0x5f   : > { %1193 = vmatpush2.bf16.msra.mxu1 %v6384_v1 }
  0x60   : > { %1194 = vmatprep.subr.bf16.mxu1 %v6385_v2 }
  0x61   : > { %1294 = vmatpush1.bf16.msra.mxu0 %v6345_v48 }
  0x62   : > { %1295 = vmatprep.subr.bf16.mxu0 %v6353_v50 }
  0x63   : > { %1195 = vmatpush2.bf16.msra.mxu1 %v6390_v13 }
  0x64   : > { %602 = vmatmul.mubr.bf16.gmra.mxu0 %v6308_v49  ;;  %1196 = vmatprep.subr.bf16.mxu1 %v6391_v14 }
  0x65   : > { %611 = vmatprep.mubr.bf16.mxu0 %v6548_v0  ;;  %1296 = vmatpush1.bf16.msra.mxu0 %v6351_v52 }
  0x66   : > { %1297 = vmatprep.subr.bf16.mxu0 %v6359_v54 }
  0x67   : > { %1197 = vmatpush2.bf16.msra.mxu1 %v6396_v16 }
  0x68   : > { %1198 = vmatprep.subr.bf16.mxu1 %v6397_v17 }
  0x69   : > { %1298 = vmatpush1.bf16.msra.mxu0 %v6357_v57  ;;  %v1796_v57 = vld [vmem:[#allocation2 + $0x580] sm:$0xff] }
  0x6a   : > { %1299 = vmatprep.subr.bf16.mxu0 %v6365_v58  ;;  %v1800_v58 = vld [vmem:[#allocation2 + $0x5a0] sm:$0xff] }
  0x6b   : > { %1199 = vmatpush2.bf16.msra.mxu1 %v6402_v20  ;;  %v5828_v17 = vcombine.low %v1796_v57, %v1800_v58  ;;  %v6971_v20 = vld [vmem:[#allocation2 + $0x120] sm:$0xff] }
  0x6c   : > { %612 = vmatmul.mubr.bf16.gmra.mxu0 %v6309_v61  ;;  %1200 = vmatprep.subr.bf16.mxu1 %v6403_v21 }
  0x6d   : > { %621 = vmatprep.mubr.bf16.mxu0 %v6548_v0  ;;  %1300 = vmatpush2.bf16.msra.mxu0 %v6363_v62 }
  0x6e   : > { %1301 = vmatprep.subr.bf16.mxu0 %v6371_v63 }
  0x6f   : > { %1201 = vmatpush2.bf16.msra.mxu1 %v6408_v24 }
  0x70   : > { %3198 = vmatprep.subr.bf16.mxu1 %v5709_v29 }
  0x71   : > { %1302 = vmatpush2.bf16.msra.mxu0 %v6369_v3 }
  0x72   : > { %1303 = vmatprep.subr.bf16.mxu0 %v6377_v4 }
  0x74   : > { %622 = vmatmul.mubr.bf16.gmra.mxu0 %v6310_v5  ;;  %v5701_v5 = vcombine.high %v1668_v53, %v1672_v56 }
  0x75   : > { %631 = vmatprep.mubr.bf16.mxu0 %v6548_v0  ;;  %1304 = vmatpush2.bf16.msra.mxu0 %v6375_v6  ;;  %v5829_v6 = vcombine.high %v1796_v57, %v1800_v58  ;;  %v6992_v58 = vld [vmem:[#allocation2 + $0x80] sm:$0xff] }
  0x76   : > { %1305 = vmatprep.subr.bf16.mxu0 %v6383_v7  ;;  %v6959_v7 = vld [vmem:[#allocation2 + $0x140] sm:$0xff] }
  0x79   : > { %1306 = vmatpush2.bf16.msra.mxu0 %v6381_v8  ;;  %v6961_v8 = vld [vmem:[#allocation2 + $0x160] sm:$0xff] }
  0x7a   : > { %1307 = vmatprep.subr.bf16.mxu0 %v6389_v9  ;;  %v5692_v25 = vcombine.low %v6959_v7, %v6961_v8 }
  0x7c   : > { %632 = vmatmul.mubr.bf16.gmra.mxu0 %v6311_v10  ;;  %v5700_v10 = vcombine.low %v1668_v53, %v1672_v56 }
  0x7d   : > { %641 = vmatprep.mubr.bf16.mxu0 %v6548_v0  ;;  %1308 = vmatpush2.bf16.msra.mxu0 %v6387_v11  ;;  %v6393_v0 = vld [vmem:[%s8687_s3 + $0x148] ss:$16 sps:$4 sm:$0xff]   ;;  %v1788_v11 = vld [vmem:[#allocation2 + $0x540] sm:$0xff] }
  0x7e   : > { %1309 = vmatprep.subr.bf16.mxu0 %v6395_v15 }
  0x81   : > { %1310 = vmatpush2.bf16.msra.mxu0 %v6393_v0 }
  0x82   : > { %1311 = vmatprep.subr.bf16.mxu0 %v6401_v18  ;;  %v5693_v18 = vcombine.high %v6959_v7, %v6961_v8 }
  0x84   : > { %642 = vmatmul.mubr.bf16.gmra.mxu0 %v6312_v12  ;;  %v1792_v12 = vld [vmem:[#allocation2 + $0x560] sm:$0xff] }
  0x85   : > { %1312 = vmatpush2.bf16.msra.mxu0 %v6399_v19  ;;  %v6969_v19 = vld [vmem:[#allocation2 + $0x100] sm:$0xff]  ;;  %v5820_v26 = vcombine.low %v1788_v11, %v1792_v12 }
  0x86   : > { %1313 = vmatprep.subr.bf16.mxu0 %v6407_v22  ;;  %v5821_v22 = vcombine.high %v1788_v11, %v1792_v12 }
  0x89   : > { %1314 = vmatpush2.bf16.msra.mxu0 %v6405_v23 }
  0x8a   : > { %3311 = vmatprep.subr.bf16.mxu0 %v5837_v32  ;;  %v5685_v32 = vcombine.high %v6969_v19, %v6971_v20 }
 0x10c   : > { %v573_v40 = vpop.f32.mrf.mxu0 }
 0x10d   : > { %v574_v43 = vadd.f32 %v573_v40, %v6950_v39 }
 0x10e   : > { %v575_v41 = vpop.f32.mrf.mxu0 }
 0x10f   : > { %v576_v42 = vadd.f32 %v575_v41, %v6947_v38  ;;  %v684_v50 = vmul.f32 0.01, %v574_v43  ;;  %vm652_vm2 = vcmp.gt.f32.partialorder %v574_v43, 0.0 }
 0x110   : > { %v577_v44 = vpop.f32.mrf.mxu0 }
 0x111   : > { %v578_v45 = vadd.f32 %v577_v44, %v6950_v39  ;;  %v685_v47 = vmul.f32 0.01, %v576_v42  ;;  %vm653_vm1 = vcmp.gt.f32.partialorder %v576_v42, 0.0  ;;  %v716_v2 = vsel %vm652_vm2, %v574_v43, %v684_v50  ;;  %v1776_v50 = vld [vmem:[#allocation2 + $0x4e0] sm:$0xff] }
 0x112   : > { %v579_v46 = vpop.f32.mrf.mxu0 }
 0x113   : > { %vm654_vm0 = vcmp.gt.f32.partialorder %v578_v45, 0.0  ;;  %v686_v48 = vmul.f32 0.01, %v578_v45  ;;  %v580_v49 = vadd.f32 %v579_v46, %v6947_v38  ;;  %v717_v60 = vsel %vm653_vm1, %v576_v42, %v685_v47  ;;  %v6985_v46 = vld [vmem:[#allocation2 + $0xe0] sm:$0xff] }
 0x114   : > { %v583_v51 = vpop.f32.mrf.mxu0 }
 0x115   : > { %v687_v52 = vmul.f32 0.01, %v580_v49  ;;  %vm655_vm3 = vcmp.gt.f32.partialorder %v580_v49, 0.0  ;;  %v718_v55 = vsel %vm654_vm0, %v578_v45, %v686_v48  ;;  %v584_v62 = vadd.f32 %v583_v51, %v6950_v39  ;;  %v6983_v45 = vld [vmem:[#allocation2 + $0xc0] sm:$0xff] }
 0x116   : > { %v585_v54 = vpop.f32.mrf.mxu0  ;;  %v748_v4 = vpack.c.bf16 %v718_v55, %v716_v2  ;;  %v5684_v48 = vcombine.low %v6969_v19, %v6971_v20  ;;  %v5677_v57 = vcombine.high %v6983_v45, %v6985_v46  ;;  %v1756_v19 = vld [vmem:[#allocation2 + $0x440] sm:$0xff] }
 0x117   : > { %v586_v59 = vadd.f32 %v585_v54, %v6947_v38  ;;  %v719_v61 = vsel %vm655_vm3, %v580_v49, %v687_v52  ;;  %v688_v0 = vmul.f32 0.01, %v584_v62  ;;  %vm656_vm6 = vcmp.gt.f32.partialorder %v584_v62, 0.0  ;;  %v1772_v49 = vld [vmem:[#allocation2 + $0x4c0] sm:$0xff] }
 0x118   : > { %v587_v63 = vpop.f32.mrf.mxu0  ;;  %v749_v1 = vpack.c.bf16 %v719_v61, %v717_v60  ;;  %v5805_v61 = vcombine.high %v1772_v49, %v1776_v50  ;;  %v5804_v2 = vcombine.low %v1772_v49, %v1776_v50  ;;  %v1760_v20 = vld [vmem:[#allocation2 + $0x460] sm:$0xff] }
 0x119   : > { %v588_v3 = vadd.f32 %v587_v63, %v6950_v39  ;;  %v689_v13 = vmul.f32 0.01, %v586_v59  ;;  %vm657_vm5 = vcmp.gt.f32.partialorder %v586_v59, 0.0  ;;  %v720_v41 = vsel %vm656_vm6, %v584_v62, %v688_v0  ;;  %v7006_v0 = vld [vmem:[#allocation2 + $0x40] sm:$0xff] }
 0x11a   : > { %v589_v9 = vpop.f32.mrf.mxu0  ;;  %1202 = vmatprep.mubr.bf16.mxu1 %v749_v1  ;;  %1315 = vmatprep.mubr.bf16.mxu0 %v749_v1  ;;  %v5676_v1 = vcombine.low %v6983_v45, %v6985_v46 }
 0x11b   : > { %vm658_vm4 = vcmp.gt.f32.partialorder %v588_v3, 0.0  ;;  %v690_v14 = vmul.f32 0.01, %v588_v3  ;;  %v590_v15 = vadd.f32 %v589_v9, %v6947_v38  ;;  %1203 = vmatmul.mubr.bf16.vlgmr.msra.gmra.mxu1 %v748_v4  ;;  %1316 = vmatmul.mubr.bf16.vlgmr.msra.gmra.mxu0 %v748_v4  ;;  %v721_v30 = vsel %vm657_vm5, %v586_v59, %v689_v13  ;;  %v6994_v59 = vld [vmem:[#allocation2 + $0xa0] sm:$0xff] }
 0x11c   : > { %v593_v16 = vpop.f32.mrf.mxu0  ;;  %3199 = vmatpush1.bf16.msra.mxu1 %v5708_v28  ;;  %3312 = vmatpush1.bf16.msra.mxu0 %v5836_v31  ;;  %v1784_v28 = vld [vmem:[#allocation2 + $0x520] sm:$0xff]  ;;  %v5669_v8 = vcombine.high %v6992_v58, %v6994_v59 }
 0x11d   : > { %vm659_vm7 = vcmp.gt.f32.partialorder %v590_v15, 0.0  ;;  %v691_v21 = vmul.f32 0.01, %v590_v15  ;;  %3200 = vmatprep.subr.bf16.mxu1 %v5701_v5  ;;  %3313 = vmatprep.subr.bf16.mxu0 %v5829_v6  ;;  %v722_v24 = vsel %vm658_vm4, %v588_v3, %v690_v14  ;;  %v594_v33 = vadd.f32 %v593_v16, %v6950_v39  ;;  %v1764_v3 = vld [vmem:[#allocation2 + $0x480] sm:$0xff] }
 0x11e   : > { %v595_v23 = vpop.f32.mrf.mxu0  ;;  %v750_v43 = vpack.c.bf16 %v722_v24, %v720_v41  ;;  %v5813_v44 = vcombine.high %v1780_v27, %v1784_v28  ;;  %v5812_v56 = vcombine.low %v1780_v27, %v1784_v28  ;;  %v1768_v4 = vld [vmem:[#allocation2 + $0x4a0] sm:$0xff] }
 0x11f   : > { %v596_v29 = vadd.f32 %v595_v23, %v6947_v38  ;;  %v723_v31 = vsel %vm659_vm7, %v590_v15, %v691_v21  ;;  %v692_v54 = vmul.f32 0.01, %v594_v33  ;;  %vm660_vm10 = vcmp.gt.f32.partialorder %v594_v33, 0.0  ;;  %v7008_v16 = vld [vmem:[#allocation2 + $0x60] sm:$0xff] }
 0x120   : > { %v597_v37 = vpop.f32.mrf.mxu0  ;;  %v751_v40 = vpack.c.bf16 %v723_v31, %v721_v30  ;;  %3201 = vmatpush1.bf16.msra.mxu1 %v5700_v10  ;;  %3314 = vmatpush1.bf16.msra.mxu0 %v5828_v17  ;;  %v5797_v15 = vcombine.high %v1764_v3, %v1768_v4  ;;  %v5661_v27 = vcombine.high %v7006_v0, %v7008_v16  ;;  %v7015_v28 = vld [vmem:[#allocation2] sm:$0xff] }
 0x121   : > { %v598_v42 = vadd.f32 %v597_v37, %v6950_v39  ;;  %3202 = vmatprep.subr.bf16.mxu1 %v5693_v18  ;;  %3315 = vmatprep.subr.bf16.mxu0 %v5821_v22  ;;  %v693_v51 = vmul.f32 0.01, %v596_v29  ;;  %vm661_vm9 = vcmp.gt.f32.partialorder %v596_v29, 0.0  ;;  %v724_v12 = vsel %vm660_vm10, %v594_v33, %v692_v54  ;;  %v1748_v41 = vld [vmem:[#allocation2 + $0x400] sm:$0xff] }
 0x122   : > { %v599_v47 = vpop.f32.mrf.mxu0  ;;  %1212 = vmatprep.mubr.bf16.mxu1 %v751_v40  ;;  %1325 = vmatprep.mubr.bf16.mxu0 %v751_v40  ;;  %v5668_v18 = vcombine.low %v6992_v58, %v6994_v59  ;;  %v5789_v31 = vcombine.high %v1756_v19, %v1760_v20  ;;  %v5660_v37 = vcombine.low %v7006_v0, %v7008_v16  ;;  %v7029_v54 = vld [vmem:[#allocation2 + $0x3c0] sm:$0xff] }
 0x123   : > { %vm662_vm8 = vcmp.gt.f32.partialorder %v598_v42, 0.0  ;;  %v694_v52 = vmul.f32 0.01, %v598_v42  ;;  %v600_v53 = vadd.f32 %v599_v47, %v6947_v38  ;;  %1213 = vmatmul.mubr.bf16.gmra.mxu1 %v750_v43  ;;  %1326 = vmatmul.mubr.bf16.gmra.mxu0 %v750_v43  ;;  %v725_v6 = vsel %vm661_vm9, %v596_v29, %v693_v51  ;;  %v7017_v29 = vld [vmem:[#allocation2 + $0x20] sm:$0xff] }
 0x124   : > { %v603_v55 = vpop.f32.mrf.mxu0  ;;  %3203 = vmatpush1.bf16.msra.mxu1 %v5692_v25  ;;  %3316 = vmatpush1.bf16.msra.mxu0 %v5820_v26  ;;  %v5796_v26 = vcombine.low %v1764_v3, %v1768_v4  ;;  %v5788_v40 = vcombine.low %v1756_v19, %v1760_v20  ;;  %v5653_v46 = vcombine.high %v7015_v28, %v7017_v29  ;;  %v1868_v58 = vld [vmem:[#allocation2 + $0x7c0] sm:$0xff] }
 0x125   : > { %vm663_vm11 = vcmp.gt.f32.partialorder %v600_v53, 0.0  ;;  %v695_v60 = vmul.f32 0.01, %v600_v53  ;;  %3204 = vmatprep.subr.bf16.mxu1 %v5685_v32  ;;  %3317 = vmatprep.subr.bf16.mxu0 %v5813_v44  ;;  %v726_v63 = vsel %vm662_vm8, %v598_v42, %v694_v52  ;;  %v604_v9 = vadd.f32 %v603_v55, %v6950_v39  ;;  %v1752_v42 = vld [vmem:[#allocation2 + $0x420] sm:$0xff] }
 0x126   : > { %v605_v62 = vpop.f32.mrf.mxu0  ;;  %v752_v14 = vpack.c.bf16 %v726_v63, %v724_v12  ;;  %v7031_v55 = vld [vmem:[#allocation2 + $0x3e0] sm:$0xff] }
 0x127   : > { %v606_v5 = vadd.f32 %v605_v62, %v6947_v38  ;;  %v727_v7 = vsel %vm663_vm11, %v600_v53, %v695_v60  ;;  %v696_v24 = vmul.f32 0.01, %v604_v9  ;;  %vm664_vm14 = vcmp.gt.f32.partialorder %v604_v9, 0.0  ;;  %v1872_v59 = vld [vmem:[#allocation2 + $0x7e0] sm:$0xff] }
 0x128   : > { %v607_v10 = vpop.f32.mrf.mxu0  ;;  %v753_v11 = vpack.c.bf16 %v727_v7, %v725_v6  ;;  %3205 = vmatpush1.bf16.msra.mxu1 %v5684_v48  ;;  %3318 = vmatpush1.bf16.msra.mxu0 %v5812_v56  ;;  %v5781_v53 = vcombine.high %v1748_v41, %v1752_v42  ;;  %v5773_v3 = vcombine.high %v7029_v54, %v7031_v55  ;;  %v7038_v4 = vld [vmem:[#allocation2 + $0x380] sm:$0xff] }
 0x129   : > { %v608_v13 = vadd.f32 %v607_v10, %v6950_v39  ;;  %3206 = vmatprep.subr.bf16.mxu1 %v5677_v57  ;;  %3319 = vmatprep.subr.bf16.mxu0 %v5805_v61  ;;  %v697_v21 = vmul.f32 0.01, %v606_v5  ;;  %vm665_vm13 = vcmp.gt.f32.partialorder %v606_v5, 0.0  ;;  %v728_v50 = vsel %vm664_vm14, %v604_v9, %v696_v24  ;;  %v1860_v12 = vld [vmem:[#allocation2 + $0x780] sm:$0xff] }
 0x12a   : > { %v609_v17 = vpop.f32.mrf.mxu0  ;;  %1222 = vmatprep.mubr.bf16.mxu1 %v753_v11  ;;  %1335 = vmatprep.mubr.bf16.mxu0 %v753_v11  ;;  %v5652_v57 = vcombine.low %v7015_v28, %v7017_v29  ;;  %v5901_v7 = vcombine.high %v1868_v58, %v1872_v59  ;;  %v5772_v10 = vcombine.low %v7029_v54, %v7031_v55  ;;  %v7052_v24 = vld [vmem:[#allocation2 + $0x340] sm:$0xff] }
 0x12b   : > { %vm666_vm12 = vcmp.gt.f32.partialorder %v608_v13, 0.0  ;;  %v698_v22 = vmul.f32 0.01, %v608_v13  ;;  %v610_v23 = vadd.f32 %v609_v17, %v6947_v38  ;;  %1223 = vmatmul.mubr.bf16.gmra.mxu1 %v752_v14  ;;  %1336 = vmatmul.mubr.bf16.gmra.mxu0 %v752_v14  ;;  %v729_v44 = vsel %vm665_vm13, %v606_v5, %v697_v21  ;;  %v7040_v5 = vld [vmem:[#allocation2 + $0x3a0] sm:$0xff] }
 0x12c   : > { %v613_v25 = vpop.f32.mrf.mxu0  ;;  %3207 = vmatpush1.bf16.msra.mxu1 %v5676_v1  ;;  %3320 = vmatpush1.bf16.msra.mxu0 %v5804_v2  ;;  %v5780_v2 = vcombine.low %v1748_v41, %v1752_v42  ;;  %v5900_v11 = vcombine.low %v1868_v58, %v1872_v59  ;;  %v5765_v16 = vcombine.high %v7038_v4, %v7040_v5  ;;  %v1852_v28 = vld [vmem:[#allocation2 + $0x740] sm:$0xff] }
 0x12d   : > { %vm667_vm15 = vcmp.gt.f32.partialorder %v610_v23, 0.0  ;;  %v699_v30 = vmul.f32 0.01, %v610_v23  ;;  %3208 = vmatprep.subr.bf16.mxu1 %v5669_v8  ;;  %3321 = vmatprep.subr.bf16.mxu0 %v5797_v15  ;;  %v730_v33 = vsel %vm666_vm12, %v608_v13, %v698_v22  ;;  %v614_v47 = vadd.f32 %v613_v25, %v6950_v39  ;;  %v1864_v13 = vld [vmem:[#allocation2 + $0x7a0] sm:$0xff] }
 0x12e   : > { %v615_v32 = vpop.f32.mrf.mxu0  ;;  %v754_v52 = vpack.c.bf16 %v730_v33, %v728_v50  ;;  %v7054_v25 = vld [vmem:[#allocation2 + $0x360] sm:$0xff] }
 0x12f   : > { %v616_v43 = vadd.f32 %v615_v32, %v6947_v38  ;;  %v731_v45 = vsel %vm667_vm15, %v610_v23, %v699_v30  ;;  %v700_v63 = vmul.f32 0.01, %v614_v47  ;;  %vm668_vm2 = vcmp.gt.f32.partialorder %v614_v47, 0.0  ;;  %v1856_v29 = vld [vmem:[#allocation2 + $0x760] sm:$0xff] }
 0x130   : > { %v617_v48 = vpop.f32.mrf.mxu0  ;;  %v755_v49 = vpack.c.bf16 %v731_v45, %v729_v44  ;;  %3209 = vmatpush1.bf16.msra.mxu1 %v5668_v18  ;;  %3322 = vmatpush1.bf16.msra.mxu0 %v5796_v26  ;;  %v5893_v23 = vcombine.high %v1860_v12, %v1864_v13  ;;  %v5757_v41 = vcombine.high %v7052_v24, %v7054_v25  ;;  %v7061_v42 = vld [vmem:[#allocation2 + $0x300] sm:$0xff] }
 0x131   : > { %v618_v51 = vadd.f32 %v617_v48, %v6950_v39  ;;  %3210 = vmatprep.subr.bf16.mxu1 %v5661_v27  ;;  %3323 = vmatprep.subr.bf16.mxu0 %v5789_v31  ;;  %v701_v60 = vmul.f32 0.01, %v616_v43  ;;  %vm669_vm1 = vcmp.gt.f32.partialorder %v616_v43, 0.0  ;;  %v732_v20 = vsel %vm668_vm2, %v614_v47, %v700_v63  ;;  %v1844_v50 = vld [vmem:[#allocation2 + $0x700] sm:$0xff] }
 0x132   : > { %v619_v56 = vpop.f32.mrf.mxu0  ;;  %1232 = vmatprep.mubr.bf16.mxu1 %v755_v49  ;;  %1345 = vmatprep.mubr.bf16.mxu0 %v755_v49  ;;  %v5764_v27 = vcombine.low %v7038_v4, %v7040_v5  ;;  %v5885_v45 = vcombine.high %v1852_v28, %v1856_v29  ;;  %v5756_v48 = vcombine.low %v7052_v24, %v7054_v25  ;;  %v1708_v63 = vld [vmem:[#allocation2 + $0x2c0] sm:$0xff] }
 0x133   : > { %vm670_vm0 = vcmp.gt.f32.partialorder %v618_v51, 0.0  ;;  %v702_v61 = vmul.f32 0.01, %v618_v51  ;;  %v620_v62 = vadd.f32 %v619_v56, %v6947_v38  ;;  %1233 = vmatmul.mubr.bf16.gmra.mxu1 %v754_v52  ;;  %1346 = vmatmul.mubr.bf16.gmra.mxu0 %v754_v52  ;;  %v733_v15 = vsel %vm669_vm1, %v616_v43, %v701_v60  ;;  %v7063_v43 = vld [vmem:[#allocation2 + $0x320] sm:$0xff] }
 0x134   : > { %v623_v1 = vpop.f32.mrf.mxu0  ;;  %3211 = vmatpush1.bf16.msra.mxu1 %v5660_v37  ;;  %3324 = vmatpush1.bf16.msra.mxu0 %v5788_v40  ;;  %v5892_v40 = vcombine.low %v1860_v12, %v1864_v13  ;;  %v5884_v49 = vcombine.low %v1852_v28, %v1856_v29  ;;  %v5749_v55 = vcombine.high %v7061_v42, %v7063_v43  ;;  %v1836_v4 = vld [vmem:[#allocation2 + $0x6c0] sm:$0xff] }
 0x135   : > { %vm671_vm3 = vcmp.gt.f32.partialorder %v620_v62, 0.0  ;;  %v703_v6 = vmul.f32 0.01, %v620_v62  ;;  %3212 = vmatprep.subr.bf16.mxu1 %v5653_v46  ;;  %3325 = vmatprep.subr.bf16.mxu0 %v5781_v53  ;;  %v734_v9 = vsel %vm670_vm0, %v618_v51, %v702_v61  ;;  %v624_v17 = vadd.f32 %v623_v1, %v6950_v39  ;;  %v1848_v51 = vld [vmem:[#allocation2 + $0x720] sm:$0xff] }
 0x136   : > { %v625_v8 = vpop.f32.mrf.mxu0  ;;  %v756_v22 = vpack.c.bf16 %v734_v9, %v732_v20  ;;  %v1712_v1 = vld [vmem:[#allocation2 + $0x2e0] sm:$0xff] }
 0x137   : > { %v626_v14 = vadd.f32 %v625_v8, %v6947_v38  ;;  %v735_v0 = vsel %vm671_vm3, %v620_v62, %v703_v6  ;;  %v704_v33 = vmul.f32 0.01, %v624_v17  ;;  %vm672_vm6 = vcmp.gt.f32.partialorder %v624_v17, 0.0  ;;  %v1840_v5 = vld [vmem:[#allocation2 + $0x6e0] sm:$0xff] }
 0x138   : > { %v627_v18 = vpop.f32.mrf.mxu0  ;;  %v757_v19 = vpack.c.bf16 %v735_v0, %v733_v15  ;;  %3213 = vmatpush1.bf16.msra.mxu1 %v5652_v57  ;;  %3326 = vmatpush1.bf16.msra.mxu0 %v5780_v2  ;;  %v5877_v62 = vcombine.high %v1844_v50, %v1848_v51  ;;  %v5741_v12 = vcombine.high %v1708_v63, %v1712_v1 }
 0x139   : > { %v628_v21 = vadd.f32 %v627_v18, %v6950_v39  ;;  %3214 = vmatprep.subr.bf16.mxu1 %v5773_v3  ;;  %3327 = vmatprep.subr.bf16.mxu0 %v5901_v7  ;;  %v705_v30 = vmul.f32 0.01, %v626_v14  ;;  %vm673_vm5 = vcmp.gt.f32.partialorder %v626_v14, 0.0  ;;  %v736_v59 = vsel %vm672_vm6, %v624_v17, %v704_v33 }
 0x13a   : > { %v629_v26 = vpop.f32.mrf.mxu0  ;;  %1242 = vmatprep.mubr.bf16.mxu1 %v757_v19  ;;  %1355 = vmatprep.mubr.bf16.mxu0 %v757_v19  ;;  %v5748_v3 = vcombine.low %v7061_v42, %v7063_v43  ;;  %v5868_v20 = vcombine.low %v1836_v4, %v1840_v5  ;;  %v1704_v43 = vld [vmem:[#allocation2 + $0x2a0] sm:$0xff] }
 0x13b   : > { %vm674_vm4 = vcmp.gt.f32.partialorder %v628_v21, 0.0  ;;  %v706_v31 = vmul.f32 0.01, %v628_v21  ;;  %v630_v32 = vadd.f32 %v629_v26, %v6947_v38  ;;  %1243 = vmatmul.mubr.bf16.gmra.mxu1 %v756_v22  ;;  %1356 = vmatmul.mubr.bf16.gmra.mxu0 %v756_v22  ;;  %v737_v53 = vsel %vm673_vm5, %v626_v14, %v705_v30 }
 0x13c   : > { %v633_v37 = vpop.f32.mrf.mxu0  ;;  %3215 = vmatpush2.bf16.msra.mxu1 %v5772_v10  ;;  %3328 = vmatpush2.bf16.msra.mxu0 %v5900_v11  ;;  %v5876_v11 = vcombine.low %v1844_v50, %v1848_v51  ;;  %v5869_v14 = vcombine.high %v1836_v4, %v1840_v5  ;;  %v1692_v50 = vld [vmem:[#allocation2 + $0x240] sm:$0xff]  ;;  %v7087_v4 = vld [vmem:[#allocation2 + $0x1e8] sm:$0xff] }
 0x13d   : > { %vm675_vm7 = vcmp.gt.f32.partialorder %v630_v32, 0.0  ;;  %v707_v44 = vmul.f32 0.01, %v630_v32  ;;  %3216 = vmatprep.subr.bf16.mxu1 %v5765_v16  ;;  %3329 = vmatprep.subr.bf16.mxu0 %v5893_v23  ;;  %v738_v47 = vsel %vm674_vm4, %v628_v21, %v706_v31  ;;  %v634_v56 = vadd.f32 %v633_v37, %v6950_v39  ;;  %v1696_v51 = vld [vmem:[#allocation2 + $0x260] sm:$0xff]  ;;  %v7089_v5 = vld [vmem:[#allocation2 + $0x5c8] sm:$0xff] }
 0x13e   : > { %v635_v46 = vpop.f32.mrf.mxu0  ;;  %v758_v61 = vpack.c.bf16 %v738_v47, %v736_v59  ;;  %v5740_v16 = vcombine.low %v1708_v63, %v1712_v1  ;;  %v1688_v59 = vld [vmem:[#allocation2 + $0x220] sm:$0xff] }
 0x13f   : > { %v636_v52 = vadd.f32 %v635_v46, %v6947_v38  ;;  %v739_v54 = vsel %vm675_vm7, %v630_v32, %v707_v44  ;;  %v708_v9 = vmul.f32 0.01, %v634_v56  ;;  %vm676_vm10 = vcmp.gt.f32.partialorder %v634_v56, 0.0  ;;  %v1828_v44 = vld [vmem:[#allocation2 + $0x680] sm:$0xff] }
 0x140   : > { %v637_v57 = vpop.f32.mrf.mxu0  ;;  %v759_v58 = vpack.c.bf16 %v739_v54, %v737_v53  ;;  %3217 = vmatpush2.bf16.msra.mxu1 %v5764_v27  ;;  %3330 = vmatpush2.bf16.msra.mxu0 %v5892_v40  ;;  %v1832_v46 = vld [vmem:[#allocation2 + $0x6a0] sm:$0xff]  ;;  %v5725_v53 = vcombine.high %v1692_v50, %v1696_v51 }
 0x141   : > { %v638_v60 = vadd.f32 %v637_v57, %v6950_v39  ;;  %3218 = vmatprep.subr.bf16.mxu1 %v5757_v41  ;;  %3331 = vmatprep.subr.bf16.mxu0 %v5885_v45  ;;  %v709_v6 = vmul.f32 0.01, %v636_v52  ;;  %vm677_vm9 = vcmp.gt.f32.partialorder %v636_v52, 0.0  ;;  %v740_v24 = vsel %vm676_vm10, %v634_v56, %v708_v9  ;;  %v1824_v54 = vld [vmem:[#allocation2 + $0x660] sm:$0xff]  ;;  %v7288_v9 = vld [vmem:[#allocation2 + $0x6c8] sm:$0xff] }
 0x142   : > { %v639_v2 = vpop.f32.mrf.mxu0  ;;  %1252 = vmatprep.mubr.bf16.mxu1 %v759_v58  ;;  %1365 = vmatprep.mubr.bf16.mxu0 %v759_v58  ;;  %v1684_v58 = vld [vmem:[#allocation2 + $0x200] sm:$0xff]  ;;  %8781 = vst [vmem:[#allocation29_spill] sm:$0xff] %v7288_v9 }
 0x143   : > { %vm678_vm8 = vcmp.gt.f32.partialorder %v638_v60, 0.0  ;;  %v710_v7 = vmul.f32 0.01, %v638_v60  ;;  %v640_v8 = vadd.f32 %v639_v2, %v6947_v38  ;;  %1253 = vmatmul.mubr.bf16.gmra.mxu1 %v758_v61  ;;  %1366 = vmatmul.mubr.bf16.gmra.mxu0 %v758_v61  ;;  %v741_v18 = vsel %vm677_vm9, %v636_v52, %v709_v6  ;;  %v1820_v52 = vld [vmem:[#allocation2 + $0x640] sm:$0xff] }
 0x144   : > { %v643_v10 = vpop.f32.mrf.mxu0  ;;  %3219 = vmatpush2.bf16.msra.mxu1 %v5756_v48  ;;  %3332 = vmatpush2.bf16.msra.mxu0 %v5884_v49  ;;  %v5860_v48 = vcombine.low %v1828_v44, %v1832_v46  ;;  %v5861_v49 = vcombine.high %v1828_v44, %v1832_v46  ;;  %v5852_v56 = vcombine.low %v1820_v52, %v1824_v54 }
 0x145   : > { %vm679_vm11 = vcmp.gt.f32.partialorder %v640_v8, 0.0  ;;  %v711_v13 = vmul.f32 0.01, %v640_v8  ;;  %3220 = vmatprep.subr.bf16.mxu1 %v5749_v55  ;;  %3333 = vmatprep.subr.bf16.mxu0 %v5877_v62  ;;  %v742_v0 = vsel %vm678_vm8, %v638_v60, %v710_v7  ;;  %v644_v21 = vadd.f32 %v643_v10, %v6950_v39  ;;  %v1812_v60 = vld [vmem:[#allocation2 + $0x600] sm:$0xff]  ;;  %v7093_v7 = vld [vmem:[#allocation2 + $0x5e8] sm:$0xff] }
 0x146   : > { %v645_v15 = vpop.f32.mrf.mxu0  ;;  %v760_v26 = vpack.c.bf16 %v742_v0, %v740_v24  ;;  %v5724_v55 = vcombine.low %v1692_v50, %v1696_v51  ;;  %v5853_v57 = vcombine.high %v1820_v52, %v1824_v54  ;;  %v5717_v61 = vcombine.high %v1684_v58, %v1688_v59  ;;  %v1816_v62 = vld [vmem:[#allocation2 + $0x620] sm:$0xff]  ;;  %v7110_v0 = vld [vmem:[#allocation2 + $0x588] sm:$0xff] }
 0x147   : > { %v646_v17 = vadd.f32 %v645_v15, %v6947_v38  ;;  %v743_v19 = vsel %vm679_vm11, %v640_v8, %v711_v13  ;;  %v712_v31 = vmul.f32 0.01, %v644_v21  ;;  %vm680_vm14 = vcmp.gt.f32.partialorder %v644_v21, 0.0  ;;  %v7105_v13 = vld [vmem:[#allocation2 + $0x188] sm:$0xff] }
 0x148   : > { %v647_v22 = vpop.f32.mrf.mxu0  ;;  %v761_v23 = vpack.c.bf16 %v743_v19, %v741_v18  ;;  %3221 = vmatpush2.bf16.msra.mxu1 %v5748_v3  ;;  %3334 = vmatpush2.bf16.msra.mxu0 %v5876_v11  ;;  %v5716_v63 = vcombine.low %v1684_v58, %v1688_v59  ;;  %v5844_v1 = vcombine.low %v1812_v60, %v1816_v62  ;;  %v7085_v3 = vld [vmem:[#allocation2 + $0x1c8] sm:$0xff]  ;;  %v828_v11 = vld [vmem:[%s8688_s4] sm:$0xf]  ;;  %v8694_v15 = vsub.s32 3, %v6935_v34 }
 0x149   : > { %v648_v25 = vadd.f32 %v647_v22, %v6950_v39  ;;  %3222 = vmatprep.subr.bf16.mxu1 %v5741_v12  ;;  %3335 = vmatprep.subr.bf16.mxu0 %v5869_v14  ;;  %v713_v28 = vmul.f32 0.01, %v646_v17  ;;  %vm681_vm13 = vcmp.gt.f32.partialorder %v646_v17, 0.0  ;;  %v744_v41 = vsel %vm680_vm14, %v644_v21, %v712_v31  ;;  %v7107_v14 = vld [vmem:[#allocation2 + $0x1a8] sm:$0xff] }
 0x14a   : > { %v649_v27 = vpop.f32.mrf.mxu0  ;;  %1262 = vmatprep.mubr.bf16.mxu1 %v761_v23  ;;  %1375 = vmatprep.mubr.bf16.mxu0 %v761_v23  ;;  %v5845_v2 = vcombine.high %v1812_v60, %v1816_v62  ;;  %v5711_v6 = vcombine.high %v7085_v3, %v7087_v4  ;;  %v5839_v10 = vcombine.high %v7089_v5, %v7093_v7  ;;  %v8695_v12 = vsub.s32 2, %v6935_v34  ;;  %v7116_v18 = vld [vmem:[#allocation2 + $0x168] sm:$0xff] }
 0x14b   : > { %vm682_vm12 = vcmp.gt.f32.partialorder %v648_v25, 0.0  ;;  %v714_v29 = vmul.f32 0.01, %v648_v25  ;;  %v650_v30 = vadd.f32 %v649_v27, %v6947_v38  ;;  %1263 = vmatmul.mubr.bf16.gmra.mxu1 %v760_v26  ;;  %1376 = vmatmul.mubr.bf16.gmra.mxu0 %v760_v26  ;;  %v745_v33 = vsel %vm681_vm13, %v646_v17, %v713_v28  ;;  %v1700_v38 = vld [vmem:[#allocation2 + $0x280] sm:$0xff]  ;;  %v7114_v17 = vld [vmem:[#allocation2 + $0x148] sm:$0xff] }
 0x14c   : > { %3223 = vmatpush2.bf16.msra.mxu1 %v5740_v16  ;;  %3336 = vmatpush2.bf16.msra.mxu0 %v5868_v20  ;;  %v5733_v45 = vcombine.high %v1700_v38, %v1704_v43  ;;  %v5732_v47 = vcombine.low %v1700_v38, %v1704_v43  ;;  %v7112_v16 = vld [vmem:[#allocation2 + $0x5a8] sm:$0xff]  ;;  %v7135_v27 = vrot.slane %v828_v11, %v6941_v36 }
 0x14d   : > { %vm683_vm15 = vcmp.gt.f32.partialorder %v650_v30, 0.0  ;;  %v715_v39 = vmul.f32 0.01, %v650_v30  ;;  %v746_v32 = vsel %vm682_vm12, %v648_v25, %v714_v29  ;;  %3337 = vmatprep.subr.bf16.mxu0 %v5861_v49  ;;  %v7118_v19 = vld [vmem:[#allocation2 + $0x548] sm:$0xff]  ;;  %v7139_v28 = vrot.slane %v828_v11, %v8695_v12 }
 0x14e   : > { %v762_v42 = vpack.c.bf16 %v746_v32, %v744_v41  ;;  %3224 = vmatprep.subr.bf16.mxu1 %v5733_v45  ;;  %v7120_v20 = vld [vmem:[#allocation2 + $0x568] sm:$0xff]  ;;  %v7150_v32 = vrot.slane %v828_v11, %v6938_v35 }
 0x14f   : > { %v747_v37 = vsel %vm683_vm15, %v650_v30, %v715_v39  ;;  %v7122_v21 = vld [vmem:[#allocation2 + $0x108] sm:$0xff] }
 0x150   : > { %v763_v40 = vpack.c.bf16 %v747_v37, %v745_v33  ;;  %3225 = vmatpush2.bf16.msra.mxu1 %v5732_v47  ;;  %3338 = vmatpush2.bf16.msra.mxu0 %v5860_v48  ;;  %v7124_v22 = vld [vmem:[#allocation2 + $0x128] sm:$0xff]  ;;  %v7154_v33 = vrot.slane %v828_v11, %v8694_v15 }
 0x151   : > { %3226 = vmatprep.subr.bf16.mxu1 %v5725_v53  ;;  %3339 = vmatprep.subr.bf16.mxu0 %v5853_v57  ;;  %v7126_v23 = vld [vmem:[#allocation2 + $0x508] sm:$0xff] }
 0x152   : > { %1272 = vmatprep.mubr.bf16.mxu1 %v763_v40  ;;  %1385 = vmatprep.mubr.bf16.mxu0 %v763_v40  ;;  %v7128_v24 = vld [vmem:[#allocation2 + $0x528] sm:$0xff] }
 0x153   : > { %1273 = vmatmul.mubr.bf16.gmra.mxu1 %v762_v42  ;;  %1386 = vmatmul.mubr.bf16.gmra.mxu0 %v762_v42  ;;  %v7130_v25 = vld [vmem:[#allocation2 + $0xc8] sm:$0xff] }
 0x154   : > { %3227 = vmatpush2.bf16.msra.mxu1 %v5724_v55  ;;  %3340 = vmatpush2.bf16.msra.mxu0 %v5852_v56  ;;  %v7132_v26 = vld [vmem:[#allocation2 + $0xe8] sm:$0xff] }
 0x155   : > { %3228 = vmatprep.subr.bf16.mxu1 %v5717_v61  ;;  %3341 = vmatprep.subr.bf16.mxu0 %v5845_v2  ;;  %v7141_v29 = vld [vmem:[#allocation2 + $0x4c8] sm:$0xff] }
 0x156   : > { %v7143_v30 = vld [vmem:[#allocation2 + $0x4e8] sm:$0xff] }
 0x157   : > { %v7145_v31 = vld [vmem:[#allocation2 + $0x88] sm:$0xff] }
 0x158   : > { %3229 = vmatpush2.bf16.msra.mxu1 %v5716_v63  ;;  %3342 = vmatpush2.bf16.msra.mxu0 %v5844_v1  ;;  %v7147_v39 = vld [vmem:[#allocation2 + $0xa8] sm:$0xff] }
 0x159   : > { %3424 = vmatprep.subr.bf16.mxu1 %v5711_v6  ;;  %3537 = vmatprep.subr.bf16.mxu0 %v5839_v10  ;;  %v7160_v41 = vld [vmem:[#allocation2 + $0x488] sm:$0xff] }
 0x15a   : > { %v7162_v42 = vld [vmem:[#allocation2 + $0x4a8] sm:$0xff] }
 0x15b   : > { %v7164_v38 = vld [vmem:[#allocation2 + $0x48] sm:$0xff] }
 0x15c   : > { %v7166_v43 = vld [vmem:[#allocation2 + $0x68] sm:$0xff] }
 0x15d   : > { %v7176_v48 = vld [vmem:[#allocation2 + $0x448] sm:$0xff] }
 0x15e   : > { %v7178_v49 = vld [vmem:[#allocation2 + $0x468] sm:$0xff] }
 0x15f   : > { %v7180_v50 = vld [vmem:[#allocation2 + $0x8] sm:$0xff] }
 0x160   : > { %v7190_v55 = vld [vmem:[#allocation2 + $0x28] sm:$0xff] }
 0x161   : > { %v7192_v56 = vld [vmem:[#allocation2 + $0x408] sm:$0xff] }
 0x162   : > { %v7194_v57 = vld [vmem:[#allocation2 + $0x428] sm:$0xff] }
 0x163   : > { %v7204_v62 = vld [vmem:[#allocation2 + $0x3c8] sm:$0xff] }
 0x164   : > { %8763 = vst [vmem:[#allocation11_spill] sm:$0xff] %v7204_v62  ;;  %v7206_v63 = vld [vmem:[#allocation2 + $0x3e8] sm:$0xff] }
 0x165   : > { %8764 = vst [vmem:[#allocation12_spill] sm:$0xff] %v7206_v63  ;;  %v7208_v1 = vld [vmem:[#allocation2 + $0x7c8] sm:$0xff] }
 0x166   : > { %8765 = vst [vmem:[#allocation13_spill] sm:$0xff] %v7208_v1  ;;  %v7218_v15 = vld [vmem:[#allocation2 + $0x7e8] sm:$0xff] }
 0x167   : > { %8766 = vst [vmem:[#allocation14_spill] sm:$0xff] %v7218_v15  ;;  %v7220_v12 = vld [vmem:[#allocation2 + $0x388] sm:$0xff] }
 0x168   : > { %8767 = vst [vmem:[#allocation15_spill] sm:$0xff] %v7220_v12  ;;  %v7222_v60 = vld [vmem:[#allocation2 + $0x3a8] sm:$0xff] }
 0x169   : > { %8768 = vst [vmem:[#allocation16_spill] sm:$0xff] %v7222_v60  ;;  %v7232_v58 = vld [vmem:[#allocation2 + $0x788] sm:$0xff] }
 0x16a   : > { %8769 = vst [vmem:[#allocation17_spill] sm:$0xff] %v7232_v58  ;;  %v7234_v11 = vld [vmem:[#allocation2 + $0x7a8] sm:$0xff] }
 0x16b   : > { %8770 = vst [vmem:[#allocation18_spill] sm:$0xff] %v7234_v11  ;;  %v7236_v53 = vld [vmem:[#allocation2 + $0x348] sm:$0xff] }
 0x16c   : > { %8771 = vst [vmem:[#allocation19_spill] sm:$0xff] %v7236_v53  ;;  %v7246_v54 = vld [vmem:[#allocation2 + $0x368] sm:$0xff] }
 0x16d   : > { %8772 = vst [vmem:[#allocation20_spill] sm:$0xff] %v7246_v54  ;;  %v7248_v10 = vld [vmem:[#allocation2 + $0x748] sm:$0xff] }
 0x16e   : > { %8773 = vst [vmem:[#allocation21_spill] sm:$0xff] %v7248_v10  ;;  %v7250_v51 = vld [vmem:[#allocation2 + $0x768] sm:$0xff] }
 0x16f   : > { %8774 = vst [vmem:[#allocation22_spill] sm:$0xff] %v7250_v51  ;;  %v7260_v52 = vld [vmem:[#allocation2 + $0x308] sm:$0xff] }
 0x170   : > { %8775 = vst [vmem:[#allocation23_spill] sm:$0xff] %v7260_v52  ;;  %v7262_v6 = vld [vmem:[#allocation2 + $0x328] sm:$0xff] }
 0x171   : > { %8776 = vst [vmem:[#allocation24_spill] sm:$0xff] %v7262_v6  ;;  %v7264_v47 = vld [vmem:[#allocation2 + $0x708] sm:$0xff] }
 0x172   : > { %8777 = vst [vmem:[#allocation25_spill] sm:$0xff] %v7264_v47  ;;  %v7274_v37 = vld [vmem:[#allocation2 + $0x728] sm:$0xff] }
 0x173   : > { %8778 = vst [vmem:[#allocation26_spill] sm:$0xff] %v7274_v37  ;;  %v7276_v2 = vld [vmem:[#allocation2 + $0x2c8] sm:$0xff] }
 0x174   : > { %8779 = vst [vmem:[#allocation27_spill] sm:$0xff] %v7276_v2  ;;  %v7278_v45 = vld [vmem:[#allocation2 + $0x2e8] sm:$0xff] }
 0x175   : > { %8780 = vst [vmem:[#allocation28_spill] sm:$0xff] %v7278_v45  ;;  %v7290_v61 = vld [vmem:[#allocation2 + $0x6e8] sm:$0xff] }
 0x176   : > { %8782 = vst [vmem:[#allocation30_spill] sm:$0xff] %v7290_v61  ;;  %v7292_v8 = vld [vmem:[#allocation2 + $0x288] sm:$0xff] }
 0x177   : > { %8783 = vst [vmem:[#allocation31_spill] sm:$0xff] %v7292_v8  ;;  %v7302_v36 = vld [vmem:[#allocation2 + $0x2a8] sm:$0xff] }
 0x178   : > { %8784 = vst [vmem:[#allocation32_spill] sm:$0xff] %v7302_v36  ;;  %v7304_v54 = vld [vmem:[#allocation2 + $0x688] sm:$0xff] }
 0x179   : > { %8785 = vst [vmem:[#allocation33_spill] sm:$0xff] %v7304_v54  ;;  %v7306_v53 = vld [vmem:[#allocation2 + $0x6a8] sm:$0xff] }
 0x17a   : > { %8786 = vst [vmem:[#allocation34_spill] sm:$0xff] %v7306_v53  ;;  %v7324_v40 = vld [vmem:[#allocation2 + $0x268] sm:$0xff] }
 0x17b   : > { %8788 = vst [vmem:[#allocation36_spill] sm:$0xff] %v7324_v40 }
 0x1db   : > { %v1204_v34 = vpop.f32.mrf.mxu1  ;;  %v1317_v35 = vpop.f32.mrf.mxu0 }
 0x1dc   : > { %v1205_v11 = vadd.f32 %v1204_v34, %v7135_v27  ;;  %v1318_v58 = vadd.f32 %v1317_v35, %v7139_v28  ;;  %v7322_v35 = vld [vmem:[#allocation2 + $0x248] sm:$0xff] }
 0x1dd   : > { %v1206_v46 = vpop.f32.mrf.mxu1  ;;  %v1319_v51 = vpop.f32.mrf.mxu0  ;;  %8787 = vst [vmem:[#allocation35_spill] sm:$0xff] %v7322_v35 }
 0x1de   : > { %v1460_v10 = vmul.f32 0.01, %v1205_v11  ;;  %vm1396_vm0 = vcmp.gt.f32.partialorder %v1205_v11, 0.0  ;;  %v1207_v52 = vadd.f32 %v1206_v46, %v7150_v32  ;;  %v1320_v45 = vadd.f32 %v1319_v51, %v7154_v33 }
 0x1df   : > { %v1208_v34 = vpop.f32.mrf.mxu1  ;;  %v1321_v61 = vpop.f32.mrf.mxu0  ;;  %v1462_v2 = vmul.f32 0.01, %v1318_v58  ;;  %vm1398_vm1 = vcmp.gt.f32.partialorder %v1318_v58, 0.0 }
 0x1e0   : > { %v1209_v37 = vadd.f32 %v1208_v34, %v7135_v27  ;;  %v1322_v44 = vadd.f32 %v1321_v61, %v7139_v28  ;;  %vm1397_vm2 = vcmp.gt.f32.partialorder %v1207_v52, 0.0  ;;  %v1461_v6 = vmul.f32 0.01, %v1207_v52 }
 0x1e1   : > { %v1210_v36 = vpop.f32.mrf.mxu1  ;;  %v1323_v46 = vpop.f32.mrf.mxu0  ;;  %v1524_v8 = vsel %vm1396_vm0, %v1205_v11, %v1460_v10  ;;  %v1463_v54 = vmul.f32 0.01, %v1320_v45  ;;  %v1526_v60 = vsel %vm1398_vm1, %v1318_v58, %v1462_v2  ;;  %vm1399_vm5 = vcmp.gt.f32.partialorder %v1320_v45, 0.0 }
 0x1e2   : > { %vm1400_vm3 = vcmp.gt.f32.partialorder %v1209_v37, 0.0  ;;  %v1464_v9 = vmul.f32 0.01, %v1209_v37  ;;  %v1466_v53 = vmul.f32 0.01, %v1322_v44  ;;  %vm1402_vm4 = vcmp.gt.f32.partialorder %v1322_v44, 0.0 }
 0x1e3   : > { %v1211_v61 = vadd.f32 %v1210_v36, %v7150_v32  ;;  %v1324_v34 = vadd.f32 %v1323_v46, %v7154_v33  ;;  %v1214_v59 = vpop.f32.mrf.mxu1  ;;  %v1327_v47 = vpop.f32.mrf.mxu0  ;;  %v1525_v12 = vsel %vm1397_vm2, %v1207_v52, %v1461_v6  ;;  %v1527_v63 = vsel %vm1399_vm5, %v1320_v45, %v1463_v54 }
 0x1e4   : > { %v1215_v51 = vadd.f32 %v1214_v59, %v7135_v27  ;;  %v1528_v40 = vsel %vm1400_vm3, %v1209_v37, %v1464_v9  ;;  %v1328_v11 = vadd.f32 %v1327_v47, %v7139_v28  ;;  %v1530_v1 = vsel %vm1402_vm4, %v1322_v44, %v1466_v53 }
 0x1e5   : > { %vm1401_vm6 = vcmp.gt.f32.partialorder %v1211_v61, 0.0  ;;  %v1465_v10 = vmul.f32 0.01, %v1211_v61  ;;  %v1216_v35 = vpop.f32.mrf.mxu1  ;;  %v1329_v15 = vpop.f32.mrf.mxu0  ;;  %vm1403_vm7 = vcmp.gt.f32.partialorder %v1324_v34, 0.0  ;;  %v1467_v36 = vmul.f32 0.01, %v1324_v34 }
 0x1e6   : > { %v1468_v46 = vmul.f32 0.01, %v1215_v51  ;;  %vm1404_vm8 = vcmp.gt.f32.partialorder %v1215_v51, 0.0  ;;  %v1217_v58 = vadd.f32 %v1216_v35, %v7150_v32  ;;  %v7350_v6 = vpack.c.bf16 %v1528_v40, %v1524_v8 }
 0x1e7   : > { %v1529_v62 = vsel %vm1401_vm6, %v1211_v61, %v1465_v10  ;;  %v1218_v52 = vpop.f32.mrf.mxu1  ;;  %v1331_v2 = vpop.f32.mrf.mxu0  ;;  %v1531_v37 = vsel %vm1403_vm7, %v1324_v34, %v1467_v36  ;;  %v1330_v47 = vadd.f32 %v1329_v15, %v7154_v33  ;;  %v7355_v59 = vpack.c.bf16 %v1530_v1, %v1526_v60 }
 0x1e8   : > { %8789 = vst [vmem:[#allocation37_spill] sm:$0xff] %v7350_v6  ;;  %v7352_v9 = vpack.c.bf16 %v1529_v62, %v1525_v12  ;;  %v7357_v44 = vpack.c.bf16 %v1531_v37, %v1527_v63  ;;  %vm1406_vm9 = vcmp.gt.f32.partialorder %v1328_v11, 0.0  ;;  %v1470_v53 = vmul.f32 0.01, %v1328_v11 }
 0x1e9   : > { %8790 = vst [vmem:[#allocation38_spill] sm:$0xff] %v7355_v59  ;;  %v1220_v45 = vpop.f32.mrf.mxu1  ;;  %v1333_v54 = vpop.f32.mrf.mxu0  ;;  %v1532_v61 = vsel %vm1404_vm8, %v1215_v51, %v1468_v46  ;;  %vm1405_vm10 = vcmp.gt.f32.partialorder %v1217_v58, 0.0  ;;  %v1219_v35 = vadd.f32 %v1218_v52, %v7135_v27  ;;  %v1332_v8 = vadd.f32 %v1331_v2, %v7139_v28 }
 0x1ea   : > { %3230 = vmatprep.mubr.bf16.mxu1 %v7352_v9  ;;  %v1469_v12 = vmul.f32 0.01, %v1217_v58  ;;  %vm1407_vm11 = vcmp.gt.f32.partialorder %v1330_v47, 0.0  ;;  %v1221_v15 = vadd.f32 %v1220_v45, %v7150_v32  ;;  %v1334_v40 = vadd.f32 %v1333_v54, %v7154_v33  ;;  %3343 = vmatprep.mubr.bf16.mxu0 %v7357_v44 }
 0x1eb   : > { %3231 = vmatmul.mubr.bf16.vlgmr.msra.gmra.mxu1 %v7350_v6  ;;  %v1224_v60 = vpop.f32.mrf.mxu1  ;;  %v1337_v62 = vpop.f32.mrf.mxu0  ;;  %v1471_v63 = vmul.f32 0.01, %v1330_v47  ;;  %vm1408_vm12 = vcmp.gt.f32.partialorder %v1219_v35, 0.0  ;;  %v1472_v1 = vmul.f32 0.01, %v1219_v35  ;;  %vm1410_vm13 = vcmp.gt.f32.partialorder %v1332_v8, 0.0  ;;  %3344 = vmatmul.mubr.bf16.vlgmr.msra.gmra.mxu0 %v7355_v59 }
 0x1ec   : > { %v8791_v51 = vcombine.low %v7085_v3, %v7087_v4  ;;  %v1474_v34 = vmul.f32 0.01, %v1332_v8  ;;  %vm1409_vm14 = vcmp.gt.f32.partialorder %v1221_v15, 0.0  ;;  %v1473_v10 = vmul.f32 0.01, %v1221_v15 }
 0x1ed   : > { %vm1411_vm15 = vcmp.gt.f32.partialorder %v1334_v40, 0.0  ;;  %v8792_v36 = vcombine.low %v7089_v5, %v7093_v7  ;;  %v1226_v46 = vpop.f32.mrf.mxu1  ;;  %v1339_v52 = vpop.f32.mrf.mxu0  ;;  %v8793_v2 = vcombine.high %v7105_v13, %v7107_v14  ;;  %v1534_v37 = vsel %vm1406_vm9, %v1328_v11, %v1470_v53 }
 0x1ee   : > { %3425 = vmatpush1.bf16.msra.mxu1 %v8791_v51  ;;  %v1536_v45 = vsel %vm1408_vm12, %v1219_v35, %v1472_v1  ;;  %v1475_v54 = vmul.f32 0.01, %v1334_v40  ;;  %v1225_v3 = vadd.f32 %v1224_v60, %v7135_v27  ;;  %v8794_v4 = vcombine.high %v7110_v0, %v7112_v16 }
 0x1ef   : > { %3538 = vmatpush1.bf16.msra.mxu0 %v8792_v36  ;;  %3426 = vmatprep.subr.bf16.mxu1 %v8793_v2  ;;  %v1533_v51 = vsel %vm1405_vm10, %v1217_v58, %v1469_v12  ;;  %v1538_v5 = vsel %vm1410_vm13, %v1332_v8, %v1474_v34  ;;  %v1537_v7 = vsel %vm1409_vm14, %v1221_v15, %v1473_v10  ;;  %v1228_v59 = vpop.f32.mrf.mxu1  ;;  %v1341_v6 = vpop.f32.mrf.mxu0 }
 0x1f0   : > { %3539 = vmatprep.subr.bf16.mxu0 %v8794_v4  ;;  %v1338_v36 = vadd.f32 %v1337_v62, %v7139_v28  ;;  %v1535_v2 = vsel %vm1407_vm11, %v1330_v47, %v1471_v63  ;;  %v7385_v11 = vpack.c.bf16 %v1537_v7, %v1533_v51  ;;  %v1539_v53 = vsel %vm1411_vm15, %v1334_v40, %v1475_v54 }
 0x1f1   : > { %v1227_v35 = vadd.f32 %v1226_v46, %v7150_v32  ;;  %v8795_v60 = vcombine.low %v7105_v13, %v7107_v14  ;;  %v7392_v58 = vpack.c.bf16 %v1536_v45, %v1532_v61  ;;  %v7394_v8 = vpack.c.bf16 %v1538_v5, %v1534_v37  ;;  %v1230_v47 = vpop.f32.mrf.mxu1  ;;  %v1343_v62 = vpop.f32.mrf.mxu0 }
 0x1f2   : > { %v7396_v12 = vpack.c.bf16 %v1539_v53, %v1535_v2  ;;  %v8796_v15 = vcombine.low %v7110_v0, %v7112_v16  ;;  %v8797_v40 = vcombine.high %v7114_v17, %v7116_v18  ;;  %vm1412_vm0 = vcmp.gt.f32.partialorder %v1225_v3, 0.0  ;;  %3240 = vmatprep.mubr.bf16.mxu1 %v7385_v11 }
 0x1f3   : > { %3427 = vmatpush1.bf16.msra.mxu1 %v8795_v60  ;;  %v1476_v63 = vmul.f32 0.01, %v1225_v3  ;;  %v1340_v13 = vadd.f32 %v1339_v52, %v7154_v33  ;;  %v1229_v14 = vadd.f32 %v1228_v59, %v7135_v27  ;;  %v8798_v61 = vcombine.high %v7118_v19, %v7120_v20  ;;  %v1234_v34 = vpop.f32.mrf.mxu1  ;;  %v1347_v10 = vpop.f32.mrf.mxu0 }
 0x1f4   : > { %3540 = vmatpush1.bf16.msra.mxu0 %v8796_v15  ;;  %3428 = vmatprep.subr.bf16.mxu1 %v8797_v40  ;;  %vm1414_vm1 = vcmp.gt.f32.partialorder %v1338_v36, 0.0  ;;  %v1478_v0 = vmul.f32 0.01, %v1338_v36  ;;  %v1342_v16 = vadd.f32 %v1341_v6, %v7139_v28  ;;  %v1231_v1 = vadd.f32 %v1230_v47, %v7150_v32 }
 0x1f5   : > { %3541 = vmatprep.subr.bf16.mxu0 %v8798_v61  ;;  %3353 = vmatprep.mubr.bf16.mxu0 %v7396_v12  ;;  %vm1413_vm2 = vcmp.gt.f32.partialorder %v1227_v35, 0.0  ;;  %v1477_v46 = vmul.f32 0.01, %v1227_v35  ;;  %v1479_v52 = vmul.f32 0.01, %v1340_v13  ;;  %vm1416_vm3 = vcmp.gt.f32.partialorder %v1229_v14, 0.0  ;;  %v1236_v54 = vpop.f32.mrf.mxu1  ;;  %v1349_v4 = vpop.f32.mrf.mxu0 }
 0x1f6   : > { %3241 = vmatmul.mubr.bf16.gmra.mxu1 %v7392_v58  ;;  %3354 = vmatmul.mubr.bf16.gmra.mxu0 %v7394_v8  ;;  %v1480_v59 = vmul.f32 0.01, %v1229_v14  ;;  %vm1418_vm4 = vcmp.gt.f32.partialorder %v1342_v16, 0.0  ;;  %v1482_v37 = vmul.f32 0.01, %v1342_v16  ;;  %vm1417_vm5 = vcmp.gt.f32.partialorder %v1231_v1, 0.0 }
 0x1f7   : > { %v8799_v6 = vcombine.low %v7114_v17, %v7116_v18  ;;  %v8800_v45 = vcombine.low %v7118_v19, %v7120_v20  ;;  %vm1415_vm6 = vcmp.gt.f32.partialorder %v1340_v13, 0.0  ;;  %v1481_v51 = vmul.f32 0.01, %v1231_v1  ;;  %v1238_v60 = vpop.f32.mrf.mxu1  ;;  %v1351_v15 = vpop.f32.mrf.mxu0 }
 0x1f8   : > { %v1344_v5 = vadd.f32 %v1343_v62, %v7154_v33  ;;  %v1235_v7 = vadd.f32 %v1234_v34, %v7135_v27  ;;  %v8801_v2 = vcombine.high %v7122_v21, %v7124_v22  ;;  %v8802_v17 = vcombine.high %v7126_v23, %v7128_v24 }
 0x1f9   : > { %3429 = vmatpush1.bf16.msra.mxu1 %v8799_v6  ;;  %3542 = vmatpush1.bf16.msra.mxu0 %v8800_v45  ;;  %v1540_v18 = vsel %vm1412_vm0, %v1225_v3, %v1476_v63  ;;  %v1544_v19 = vsel %vm1416_vm3, %v1229_v14, %v1480_v59  ;;  %v1546_v20 = vsel %vm1418_vm4, %v1342_v16, %v1482_v37  ;;  %v1353_v16 = vpop.f32.mrf.mxu0 }
 0x1fa   : > { %3430 = vmatprep.subr.bf16.mxu1 %v8801_v2  ;;  %3543 = vmatprep.subr.bf16.mxu0 %v8802_v17  ;;  %v1348_v53 = vadd.f32 %v1347_v10, %v7139_v28  ;;  %v1541_v47 = vsel %vm1413_vm2, %v1227_v35, %v1477_v46  ;;  %v1545_v62 = vsel %vm1417_vm5, %v1231_v1, %v1481_v51  ;;  %vm1419_vm7 = vcmp.gt.f32.partialorder %v1344_v5, 0.0  ;;  %v1240_v35 = vpop.f32.mrf.mxu1 }
 0x1fb   : > { %v1237_v40 = vadd.f32 %v1236_v54, %v7150_v32  ;;  %v1542_v61 = vsel %vm1414_vm1, %v1338_v36, %v1478_v0  ;;  %v1543_v34 = vsel %vm1415_vm6, %v1340_v13, %v1479_v52  ;;  %v7437_v6 = vpack.c.bf16 %v1545_v62, %v1541_v47  ;;  %v1357_v46 = vpop.f32.mrf.mxu0 }
 0x1fc   : > { %v1483_v3 = vmul.f32 0.01, %v1344_v5  ;;  %v8803_v63 = vcombine.low %v7122_v21, %v7124_v22  ;;  %v8804_v14 = vcombine.low %v7126_v23, %v7128_v24  ;;  %v7445_v1 = vpack.c.bf16 %v1544_v19, %v1540_v18  ;;  %v1244_v0 = vpop.f32.mrf.mxu1 }
 0x1fd   : > { %v7447_v10 = vpack.c.bf16 %v1546_v20, %v1542_v61  ;;  %vm1420_vm8 = vcmp.gt.f32.partialorder %v1235_v7, 0.0  ;;  %v1484_v36 = vmul.f32 0.01, %v1235_v7  ;;  %v8805_v13 = vcombine.high %v7130_v25, %v7132_v26  ;;  %3250 = vmatprep.mubr.bf16.mxu1 %v7437_v6  ;;  %v1359_v17 = vpop.f32.mrf.mxu0 }
 0x1fe   : > { %3431 = vmatpush1.bf16.msra.mxu1 %v8803_v63  ;;  %3544 = vmatpush1.bf16.msra.mxu0 %v8804_v14  ;;  %v8806_v21 = vcombine.high %v7141_v29, %v7143_v30  ;;  %v1547_v22 = vsel %vm1419_vm7, %v1344_v5, %v1483_v3  ;;  %vm1422_vm9 = vcmp.gt.f32.partialorder %v1348_v53, 0.0  ;;  %v1350_v23 = vadd.f32 %v1349_v4, %v7154_v33  ;;  %v1246_v2 = vpop.f32.mrf.mxu1 }
 0x1ff   : > { %3432 = vmatprep.subr.bf16.mxu1 %v8805_v13  ;;  %v1239_v24 = vadd.f32 %v1238_v60, %v7135_v27  ;;  %v7459_v52 = vpack.c.bf16 %v1547_v22, %v1543_v34  ;;  %v1486_v59 = vmul.f32 0.01, %v1348_v53  ;;  %v1485_v37 = vmul.f32 0.01, %v1237_v40  ;;  %3251 = vmatmul.mubr.bf16.gmra.mxu1 %v7445_v1 }
 0x200   : > { %3545 = vmatprep.subr.bf16.mxu0 %v8806_v21  ;;  %v1352_v45 = vadd.f32 %v1351_v15, %v7139_v28  ;;  %vm1421_vm10 = vcmp.gt.f32.partialorder %v1237_v40, 0.0  ;;  %v1487_v54 = vmul.f32 0.01, %v1350_v23  ;;  %v8807_v4 = vcombine.low %v7130_v25, %v7132_v26  ;;  %v1361_v15 = vpop.f32.mrf.mxu0 }
 0x201   : > { %vm1424_vm11 = vcmp.gt.f32.partialorder %v1239_v24, 0.0  ;;  %v1488_v51 = vmul.f32 0.01, %v1239_v24  ;;  %v8808_v5 = vcombine.low %v7141_v29, %v7143_v30  ;;  %vm1423_vm12 = vcmp.gt.f32.partialorder %v1350_v23, 0.0  ;;  %3363 = vmatprep.mubr.bf16.mxu0 %v7459_v52  ;;  %v1248_v30 = vpop.f32.mrf.mxu1 }
 0x202   : > { %3433 = vmatpush1.bf16.msra.mxu1 %v8807_v4  ;;  %v1490_v18 = vmul.f32 0.01, %v1352_v45  ;;  %v1241_v19 = vadd.f32 %v1240_v35, %v7150_v32  ;;  %v1354_v20 = vadd.f32 %v1353_v16, %v7154_v33  ;;  %v8809_v60 = vcombine.high %v7145_v31, %v7147_v39  ;;  %3364 = vmatmul.mubr.bf16.gmra.mxu0 %v7447_v10  ;;  %v1363_v16 = vpop.f32.mrf.mxu0 }
 0x203   : > { %3546 = vmatpush1.bf16.msra.mxu0 %v8808_v5  ;;  %v1548_v25 = vsel %vm1420_vm8, %v1235_v7, %v1484_v36  ;;  %v1552_v26 = vsel %vm1424_vm11, %v1239_v24, %v1488_v51  ;;  %vm1426_vm13 = vcmp.gt.f32.partialorder %v1352_v45, 0.0  ;;  %v1245_v29 = vadd.f32 %v1244_v0, %v7135_v27  ;;  %v1250_v35 = vpop.f32.mrf.mxu1 }
 0x204   : > { %3434 = vmatprep.subr.bf16.mxu1 %v8809_v60  ;;  %v1550_v47 = vsel %vm1422_vm9, %v1348_v53, %v1486_v59  ;;  %vm1425_vm14 = vcmp.gt.f32.partialorder %v1241_v19, 0.0  ;;  %v1489_v62 = vmul.f32 0.01, %v1241_v19  ;;  %v1358_v61 = vadd.f32 %v1357_v46, %v7139_v28  ;;  %v1367_v0 = vpop.f32.mrf.mxu0 }
 0x205   : > { %v8810_v34 = vcombine.high %v7160_v41, %v7162_v42  ;;  %v1549_v7 = vsel %vm1421_vm10, %v1237_v40, %v1485_v37  ;;  %v1551_v3 = vsel %vm1423_vm12, %v1350_v23, %v1487_v54  ;;  %vm1427_vm15 = vcmp.gt.f32.partialorder %v1354_v20, 0.0  ;;  %v1254_v24 = vpop.f32.mrf.mxu1 }
 0x206   : > { %v1491_v63 = vmul.f32 0.01, %v1354_v20  ;;  %v8811_v14 = vcombine.low %v7145_v31, %v7147_v39  ;;  %v8812_v53 = vcombine.low %v7160_v41, %v7162_v42  ;;  %v7491_v36 = vpack.c.bf16 %v1552_v26, %v1548_v25 }
 0x207   : > { %3547 = vmatprep.subr.bf16.mxu0 %v8810_v34  ;;  %v1554_v13 = vsel %vm1426_vm13, %v1352_v45, %v1490_v18  ;;  %v1553_v21 = vsel %vm1425_vm14, %v1241_v19, %v1489_v62  ;;  %v1492_v40 = vmul.f32 0.01, %v1245_v29  ;;  %v8813_v22 = vcombine.high %v7164_v38, %v7166_v43  ;;  %v1256_v5 = vpop.f32.mrf.mxu1 }
 0x208   : > { %3435 = vmatpush1.bf16.msra.mxu1 %v8811_v14  ;;  %3548 = vmatpush1.bf16.msra.mxu0 %v8812_v53  ;;  %v8814_v31 = vcombine.high %v7176_v48, %v7178_v49  ;;  %v7500_v39 = vpack.c.bf16 %v1553_v21, %v1549_v7  ;;  %v1555_v41 = vsel %vm1427_vm15, %v1354_v20, %v1491_v63  ;;  %vm1428_vm0 = vcmp.gt.f32.partialorder %v1245_v29, 0.0 }
 0x209   : > { %3436 = vmatprep.subr.bf16.mxu1 %v8813_v22  ;;  %v1247_v42 = vadd.f32 %v1246_v2, %v7150_v32  ;;  %v1360_v23 = vadd.f32 %v1359_v17, %v7154_v33  ;;  %v7504_v46 = vpack.c.bf16 %v1555_v41, %v1551_v3  ;;  %vm1430_vm1 = vcmp.gt.f32.partialorder %v1358_v61, 0.0  ;;  %v1369_v2 = vpop.f32.mrf.mxu0 }
 0x20a   : > { %3549 = vmatprep.subr.bf16.mxu0 %v8814_v31  ;;  %v1249_v59 = vadd.f32 %v1248_v30, %v7135_v27  ;;  %v7507_v37 = vpack.c.bf16 %v1554_v13, %v1550_v47  ;;  %v1494_v45 = vmul.f32 0.01, %v1358_v61  ;;  %3260 = vmatprep.mubr.bf16.mxu1 %v7500_v39  ;;  %v8815_v4 = vcombine.low %v7164_v38, %v7166_v43  ;;  %v1258_v38 = vpop.f32.mrf.mxu1 }
 0x20b   : > { %v1493_v54 = vmul.f32 0.01, %v1247_v42  ;;  %v1495_v51 = vmul.f32 0.01, %v1360_v23  ;;  %v1362_v18 = vadd.f32 %v1361_v15, %v7139_v28  ;;  %v1251_v19 = vadd.f32 %v1250_v35, %v7150_v32  ;;  %3373 = vmatprep.mubr.bf16.mxu0 %v7504_v46  ;;  %3261 = vmatmul.mubr.bf16.gmra.mxu1 %v7491_v36  ;;  %v1371_v43 = vpop.f32.mrf.mxu0  ;;  %v8820_v35 = vld [vmem:[#allocation11_spill] sm:$0xff] }
 0x20c   : > { %3437 = vmatpush1.bf16.msra.mxu1 %v8815_v4  ;;  %vm1432_vm2 = vcmp.gt.f32.partialorder %v1249_v59, 0.0  ;;  %v1496_v17 = vmul.f32 0.01, %v1249_v59  ;;  %v1556_v20 = vsel %vm1428_vm0, %v1245_v29, %v1492_v40  ;;  %vm1429_vm3 = vcmp.gt.f32.partialorder %v1247_v42, 0.0  ;;  %3374 = vmatmul.mubr.bf16.gmra.mxu0 %v7507_v37  ;;  %v1260_v3 = vpop.f32.mrf.mxu1  ;;  %v8826_v4 = vld [vmem:[#allocation14_spill] sm:$0xff] }
 0x20d   : > { %vm1431_vm4 = vcmp.gt.f32.partialorder %v1360_v23, 0.0  ;;  %v1364_v60 = vadd.f32 %v1363_v16, %v7154_v33  ;;  %vm1434_vm5 = vcmp.gt.f32.partialorder %v1362_v18, 0.0  ;;  %v1498_v25 = vmul.f32 0.01, %v1362_v18  ;;  %v8821_v16 = vld [vmem:[#allocation12_spill] sm:$0xff] }
 0x20e   : > { %vm1433_vm6 = vcmp.gt.f32.partialorder %v1251_v19, 0.0  ;;  %v7521_v26 = vadd.f32 %v1254_v24, %v7135_v27  ;;  %v8816_v30 = vcombine.low %v7176_v48, %v7178_v49  ;;  %v8817_v29 = vcombine.high %v7180_v50, %v7190_v55  ;;  %v1373_v48 = vpop.f32.mrf.mxu0  ;;  %v1264_v22 = vpop.f32.mrf.mxu1 }
 0x20f   : > { %v1560_v15 = vsel %vm1432_vm2, %v1249_v59, %v1496_v17  ;;  %v1497_v47 = vmul.f32 0.01, %v1251_v19  ;;  %vm1435_vm7 = vcmp.gt.f32.partialorder %v1364_v60, 0.0  ;;  %v1499_v62 = vmul.f32 0.01, %v1364_v60 }
 0x210   : > { %3550 = vmatpush1.bf16.msra.mxu0 %v8816_v30  ;;  %3438 = vmatprep.subr.bf16.mxu1 %v8817_v29  ;;  %v8818_v34 = vcombine.low %v7180_v50, %v7190_v55  ;;  %v8819_v7 = vcombine.high %v7192_v56, %v7194_v57  ;;  %v1558_v49 = vsel %vm1430_vm1, %v1358_v61, %v1494_v45  ;;  %v1377_v31 = vpop.f32.mrf.mxu0  ;;  %vm1436_vm8 = vcmp.gt.f32.partialorder %v7521_v26, 0.0  ;;  %v1266_v17 = vpop.f32.mrf.mxu1  ;;  %v8828_v29 = vld [vmem:[#allocation15_spill] sm:$0xff] }
 0x211   : > { %v1557_v63 = vsel %vm1429_vm3, %v1247_v42, %v1493_v54  ;;  %v1559_v14 = vsel %vm1431_vm4, %v1360_v23, %v1495_v51  ;;  %v1562_v53 = vsel %vm1434_vm5, %v1362_v18, %v1498_v25  ;;  %v8822_v13 = vcombine.high %v8820_v35, %v8821_v16  ;;  %v8825_v51 = vld [vmem:[#allocation13_spill] sm:$0xff] }
 0x212   : > { %3439 = vmatpush1.bf16.msra.mxu1 %v8818_v34  ;;  %3551 = vmatprep.subr.bf16.mxu0 %v8819_v7  ;;  %v1561_v50 = vsel %vm1433_vm6, %v1251_v19, %v1497_v47  ;;  %v1563_v55 = vsel %vm1435_vm7, %v1364_v60, %v1499_v62  ;;  %v1368_v21 = vadd.f32 %v1367_v0, %v7139_v28  ;;  %v1500_v0 = vmul.f32 0.01, %v7521_v26  ;;  %v1379_v18 = vpop.f32.mrf.mxu0  ;;  %v1268_v25 = vpop.f32.mrf.mxu1 }
 0x213   : > { %3440 = vmatprep.subr.bf16.mxu1 %v8822_v13  ;;  %v1257_v40 = vadd.f32 %v1256_v5, %v7150_v32  ;;  %v7546_v61 = vpack.c.bf16 %v1560_v15, %v1556_v20  ;;  %v7548_v41 = vpack.c.bf16 %v1561_v50, %v1557_v63  ;;  %v7550_v42 = vpack.c.bf16 %v1563_v55, %v1559_v14  ;;  %v8829_v15 = vld [vmem:[#allocation16_spill] sm:$0xff]  ;;  %v8836_v50 = vld [vmem:[#allocation19_spill] sm:$0xff] }
 0x214   : > { %v8823_v23 = vcombine.low %v7192_v56, %v7194_v57  ;;  %v7556_v24 = vpack.c.bf16 %v1562_v53, %v1558_v49  ;;  %v1370_v45 = vadd.f32 %v1369_v2, %v7154_v33  ;;  %v8824_v54 = vcombine.low %v8820_v35, %v8821_v16  ;;  %v1381_v30 = vpop.f32.mrf.mxu0  ;;  %v8833_v35 = vld [vmem:[#allocation17_spill] sm:$0xff]  ;;  %v8834_v16 = vld [vmem:[#allocation18_spill] sm:$0xff]  ;;  %v8837_v55 = vld [vmem:[#allocation20_spill] sm:$0xff] }
 0x215   : > { %v1501_v59 = vmul.f32 0.01, %v1257_v40  ;;  %v8827_v5 = vcombine.high %v8825_v51, %v8826_v4  ;;  %v1259_v56 = vadd.f32 %v1258_v38, %v7135_v27  ;;  %v1372_v57 = vadd.f32 %v1371_v43, %v7139_v28  ;;  %3270 = vmatprep.mubr.bf16.mxu1 %v7548_v41  ;;  %3383 = vmatprep.mubr.bf16.mxu0 %v7550_v42 }
 0x216   : > { %3552 = vmatpush1.bf16.msra.mxu0 %v8823_v23  ;;  %3441 = vmatpush2.bf16.msra.mxu1 %v8824_v54  ;;  %v1261_v19 = vadd.f32 %v1260_v3, %v7150_v32  ;;  %v1374_v20 = vadd.f32 %v1373_v48, %v7154_v33  ;;  %vm1438_vm9 = vcmp.gt.f32.partialorder %v1368_v21, 0.0  ;;  %v1502_v2 = vmul.f32 0.01, %v1368_v21  ;;  %v1270_v3 = vpop.f32.mrf.mxu1  ;;  %v1383_v48 = vpop.f32.mrf.mxu0 }
 0x217   : > { %3553 = vmatprep.subr.bf16.mxu0 %v8827_v5  ;;  %vm1437_vm10 = vcmp.gt.f32.partialorder %v1257_v40, 0.0  ;;  %v1503_v60 = vmul.f32 0.01, %v1370_v45  ;;  %3271 = vmatmul.mubr.bf16.gmra.mxu1 %v7546_v61  ;;  %vm1440_vm11 = vcmp.gt.f32.partialorder %v1259_v56, 0.0  ;;  %v1504_v38 = vmul.f32 0.01, %v1259_v56 }
 0x218   : > { %vm1442_vm12 = vcmp.gt.f32.partialorder %v1372_v57, 0.0  ;;  %v1506_v43 = vmul.f32 0.01, %v1372_v57  ;;  %3384 = vmatmul.mubr.bf16.gmra.mxu0 %v7556_v24  ;;  %v8830_v47 = vcombine.high %v8828_v29, %v8829_v15  ;;  %vm1439_vm13 = vcmp.gt.f32.partialorder %v1370_v45, 0.0 }
 0x219   : > { %vm1441_vm14 = vcmp.gt.f32.partialorder %v1261_v19, 0.0  ;;  %v1505_v62 = vmul.f32 0.01, %v1261_v19  ;;  %vm1443_vm15 = vcmp.gt.f32.partialorder %v1374_v20, 0.0  ;;  %v8831_v34 = vcombine.low %v8825_v51, %v8826_v4 }
 0x21a   : > { %3442 = vmatprep.subr.bf16.mxu1 %v8830_v47  ;;  %v8832_v7 = vcombine.low %v8828_v29, %v8829_v15  ;;  %v1564_v49 = vsel %vm1436_vm8, %v7521_v26, %v1500_v0  ;;  %v1565_v63 = vsel %vm1437_vm10, %v1257_v40, %v1501_v59  ;;  %v1568_v14 = vsel %vm1440_vm11, %v1259_v56, %v1504_v38  ;;  %v1274_v0 = vpop.f32.mrf.mxu1  ;;  %v7597_v40 = vpop.f32.mrf.mxu0 }
 0x21b   : > { %3554 = vmatpush2.bf16.msra.mxu0 %v8831_v34  ;;  %v1507_v53 = vmul.f32 0.01, %v1374_v20  ;;  %v8835_v13 = vcombine.high %v8833_v35, %v8834_v16  ;;  %v8838_v23 = vcombine.high %v8836_v50, %v8837_v55  ;;  %v1570_v54 = vsel %vm1442_vm12, %v1372_v57, %v1506_v43  ;;  %v8841_v34 = vld [vmem:[#allocation21_spill] sm:$0xff] }
 0x21c   : > { %3443 = vmatpush2.bf16.msra.mxu1 %v8832_v7  ;;  %v1569_v51 = vsel %vm1441_vm14, %v1261_v19, %v1505_v62  ;;  %v1265_v4 = vadd.f32 %v1264_v22, %v7135_v27  ;;  %v1378_v26 = vadd.f32 %v1377_v31, %v7139_v28  ;;  %v1566_v59 = vsel %vm1438_vm9, %v1368_v21, %v1502_v2  ;;  %v7621_v2 = vld [vmem:[#allocation2 + $0x648] sm:$0xff]  ;;  %v1276_v47 = vpop.f32.mrf.mxu1  ;;  %v1389_v62 = vpop.f32.mrf.mxu0  ;;  %v8842_v7 = vld [vmem:[#allocation22_spill] sm:$0xff] }
 0x21d   : > { %3555 = vmatprep.subr.bf16.mxu0 %v8835_v13  ;;  %3444 = vmatprep.subr.bf16.mxu1 %v8838_v23  ;;  %v1567_v5 = vsel %vm1439_vm13, %v1370_v45, %v1503_v60  ;;  %v7601_v56 = vpack.c.bf16 %v1569_v51, %v1565_v63  ;;  %v1571_v38 = vsel %vm1443_vm15, %v1374_v20, %v1507_v53  ;;  %v8845_v53 = vld [vmem:[#allocation23_spill] sm:$0xff]  ;;  %v8849_v23 = vld [vmem:[#allocation25_spill] sm:$0xff] }
 0x21e   : > { %v7604_v29 = vpack.c.bf16 %v1568_v14, %v1564_v49  ;;  %v7606_v15 = vpack.c.bf16 %v1571_v38, %v1567_v5  ;;  %v1267_v57 = vadd.f32 %v1266_v17, %v7150_v32  ;;  %v8839_v22 = vcombine.low %v8833_v35, %v8834_v16  ;;  %v8846_v35 = vld [vmem:[#allocation24_spill] sm:$0xff] }
 0x21f   : > { %v8840_v31 = vcombine.low %v8836_v50, %v8837_v55  ;;  %v7615_v21 = vpack.c.bf16 %v1570_v54, %v1566_v59  ;;  %v1380_v45 = vadd.f32 %v1379_v18, %v7154_v33  ;;  %v1269_v19 = vadd.f32 %v1268_v25, %v7135_v27  ;;  %3280 = vmatprep.mubr.bf16.mxu1 %v7601_v56  ;;  %v7626_v18 = vld [vmem:[#allocation2 + $0x668] sm:$0xff]  ;;  %v8850_v54 = vld [vmem:[#allocation26_spill] sm:$0xff] }
 0x220   : > { %3556 = vmatpush2.bf16.msra.mxu0 %v8839_v22  ;;  %v1382_v20 = vadd.f32 %v1381_v30, %v7139_v28  ;;  %vm1444_vm0 = vcmp.gt.f32.partialorder %v1265_v4, 0.0  ;;  %v1508_v17 = vmul.f32 0.01, %v1265_v4  ;;  %v1510_v60 = vmul.f32 0.01, %v1378_v26  ;;  %3393 = vmatprep.mubr.bf16.mxu0 %v7606_v15  ;;  %v1278_v22 = vpop.f32.mrf.mxu1 }
 0x221   : > { %3445 = vmatpush2.bf16.msra.mxu1 %v8840_v31  ;;  %v1271_v43 = vadd.f32 %v1270_v3, %v7150_v32  ;;  %vm1446_vm1 = vcmp.gt.f32.partialorder %v1378_v26, 0.0  ;;  %v1509_v25 = vmul.f32 0.01, %v1267_v57  ;;  %vm1448_vm2 = vcmp.gt.f32.partialorder %v1269_v19, 0.0  ;;  %3394 = vmatmul.mubr.bf16.gmra.mxu0 %v7615_v21  ;;  %v1391_v31 = vpop.f32.mrf.mxu0 }
 0x222   : > { %3281 = vmatmul.mubr.bf16.gmra.mxu1 %v7604_v29  ;;  %v1512_v30 = vmul.f32 0.01, %v1269_v19  ;;  %v8843_v49 = vcombine.high %v8841_v34, %v8842_v7  ;;  %vm1445_vm3 = vcmp.gt.f32.partialorder %v1267_v57, 0.0  ;;  %v1511_v3 = vmul.f32 0.01, %v1380_v45 }
 0x223   : > { %v1514_v63 = vmul.f32 0.01, %v1382_v20  ;;  %vm1449_vm4 = vcmp.gt.f32.partialorder %v1271_v43, 0.0  ;;  %v8844_v14 = vcombine.low %v8841_v34, %v8842_v7  ;;  %v8847_v16 = vcombine.high %v8845_v53, %v8846_v35  ;;  %v8852_v34 = vld [vmem:[#allocation27_spill] sm:$0xff]  ;;  %v8853_v7 = vld [vmem:[#allocation28_spill] sm:$0xff] }
 0x224   : > { %3557 = vmatprep.subr.bf16.mxu0 %v8843_v49  ;;  %vm1447_vm5 = vcmp.gt.f32.partialorder %v1380_v45, 0.0  ;;  %vm1450_vm6 = vcmp.gt.f32.partialorder %v1382_v20, 0.0  ;;  %v1513_v13 = vmul.f32 0.01, %v1271_v43  ;;  %v1384_v50 = vadd.f32 %v1383_v48, %v7154_v33 }
 0x225   : > { %3558 = vmatpush2.bf16.msra.mxu0 %v8844_v14  ;;  %3446 = vmatprep.subr.bf16.mxu1 %v8847_v16  ;;  %v8848_v55 = vcombine.low %v8845_v53, %v8846_v35  ;;  %v8851_v51 = vcombine.high %v8849_v23, %v8850_v54  ;;  %v1572_v59 = vsel %vm1444_vm0, %v1265_v4, %v1508_v17 }
 0x226   : > { %v1574_v5 = vsel %vm1446_vm1, %v1378_v26, %v1510_v60  ;;  %v1576_v38 = vsel %vm1448_vm2, %v1269_v19, %v1512_v30  ;;  %v8854_v49 = vcombine.high %v8852_v34, %v8853_v7  ;;  %v5854_v48 = vcombine.low %v7621_v2, %v7626_v18 }
 0x227   : > { %3447 = vmatpush2.bf16.msra.mxu1 %v8848_v55  ;;  %3559 = vmatprep.subr.bf16.mxu0 %v8851_v51  ;;  %v1573_v14 = vsel %vm1445_vm3, %v1267_v57, %v1509_v25  ;;  %v1577_v53 = vsel %vm1449_vm4, %v1271_v43, %v1513_v13  ;;  %vm1451_vm7 = vcmp.gt.f32.partialorder %v1384_v50, 0.0  ;;  %v1515_v35 = vmul.f32 0.01, %v1384_v50  ;;  %v8858_v25 = vld [vmem:[#allocation30_spill] sm:$0xff]  ;;  %v1280_v55 = vpop.f32.mrf.mxu1 }
 0x228   : > { %3448 = vmatprep.subr.bf16.mxu1 %v8854_v49  ;;  %v1575_v4 = vsel %vm1447_vm5, %v1380_v45, %v1511_v3  ;;  %v1578_v26 = vsel %vm1450_vm6, %v1382_v20, %v1514_v63  ;;  %v7657_v19 = vpack.c.bf16 %v1577_v53, %v1573_v14  ;;  %v1275_v17 = vadd.f32 %v1274_v0, %v7135_v27  ;;  %v8857_v45 = vld [vmem:[#allocation29_spill] sm:$0xff] }
 0x229   : > { %v8855_v60 = vcombine.low %v8849_v23, %v8850_v54  ;;  %v7663_v30 = vpack.c.bf16 %v1576_v38, %v1572_v59  ;;  %v1579_v16 = vsel %vm1451_vm7, %v1384_v50, %v1515_v35  ;;  %v1277_v57 = vadd.f32 %v1276_v47, %v7150_v32  ;;  %v7672_v3 = vld [vmem:[#allocation2 + $0x208] sm:$0xff]  ;;  %v1393_v23 = vpop.f32.mrf.mxu0  ;;  %v8860_v59 = vld [vmem:[#allocation31_spill] sm:$0xff]  ;;  %v8861_v38 = vld [vmem:[#allocation32_spill] sm:$0xff] }
 0x22a   : > { %v8856_v43 = vcombine.low %v8852_v34, %v8853_v7  ;;  %v8859_v20 = vcombine.high %v8857_v45, %v8858_v25  ;;  %v7674_v0 = vld [vmem:[#allocation2 + $0x228] sm:$0xff]  ;;  %v7676_v63 = vpack.c.bf16 %v1579_v16, %v1575_v4  ;;  %v1390_v13 = vadd.f32 %v1389_v62, %v7154_v33  ;;  %3290 = vmatprep.mubr.bf16.mxu1 %v7657_v19  ;;  %v8866_v4 = vld [vmem:[#allocation34_spill] sm:$0xff]  ;;  %v8869_v16 = vld [vmem:[#allocation36_spill] sm:$0xff] }
 0x22b   : > { %3560 = vmatpush2.bf16.msra.mxu0 %v8855_v60  ;;  %v1279_v50 = vadd.f32 %v1278_v22, %v7135_v27  ;;  %v1392_v47 = vadd.f32 %v1391_v31, %v7139_v28  ;;  %v7682_v54 = vpack.c.bf16 %v1578_v26, %v1574_v5  ;;  %v1388_v51 = vadd.f32 %v7597_v40, %v7139_v28  ;;  %v8865_v35 = vld [vmem:[#allocation33_spill] sm:$0xff]  ;;  %v8868_v60 = vld [vmem:[#allocation35_spill] sm:$0xff] }
 0x22c   : > { %3449 = vmatpush2.bf16.msra.mxu1 %v8856_v43  ;;  %3561 = vmatprep.subr.bf16.mxu0 %v8859_v20  ;;  %v8862_v34 = vcombine.high %v8860_v59, %v8861_v38  ;;  %v5855_v27 = vcombine.high %v7621_v2, %v7626_v18  ;;  %vm1452_vm8 = vcmp.gt.f32.partialorder %v1275_v17, 0.0  ;;  %v1517_v62 = vmul.f32 0.01, %v1277_v57  ;;  %v1670_v2 = vld [vmem:[#allocation2 + $0x190] sm:$0xff] }
 0x22d   : > { %3291 = vmatmul.mubr.bf16.gmra.mxu1 %v7663_v30  ;;  %v1520_v22 = vmul.f32 0.01, %v1279_v50  ;;  %3403 = vmatprep.mubr.bf16.mxu0 %v7676_v63  ;;  %v8863_v5 = vcombine.low %v8857_v45, %v8858_v25  ;;  %v5719_v28 = vcombine.high %v7672_v3, %v7674_v0  ;;  %vm1456_vm9 = vcmp.gt.f32.partialorder %v1279_v50, 0.0  ;;  %v1674_v18 = vld [vmem:[#allocation2 + $0x1b0] sm:$0xff] }
 0x22e   : > { %3450 = vmatprep.subr.bf16.mxu1 %v8862_v34  ;;  %v1522_v40 = vmul.f32 0.01, %v1392_v47  ;;  %v1281_v31 = vadd.f32 %v1280_v55, %v7150_v32  ;;  %v1394_v7 = vadd.f32 %v1393_v23, %v7154_v33  ;;  %3404 = vmatmul.mubr.bf16.gmra.mxu0 %v7682_v54  ;;  %v8864_v49 = vcombine.low %v8860_v59, %v8861_v38  ;;  %v1813_v55 = vld [vmem:[#allocation2 + $0x608] sm:$0xff] }
 0x22f   : > { %3562 = vmatpush2.bf16.msra.mxu0 %v8863_v5  ;;  %v1516_v14 = vmul.f32 0.01, %v1275_v17  ;;  %vm1453_vm10 = vcmp.gt.f32.partialorder %v1277_v57, 0.0  ;;  %v1519_v53 = vmul.f32 0.01, %v1390_v13  ;;  %vm1458_vm11 = vcmp.gt.f32.partialorder %v1392_v47, 0.0 }
 0x230   : > { %3451 = vmatpush2.bf16.msra.mxu1 %v8864_v49  ;;  %v8867_v26 = vcombine.high %v8865_v35, %v8866_v4  ;;  %v8870_v43 = vcombine.high %v8868_v60, %v8869_v16  ;;  %v1518_v32 = vmul.f32 0.01, %v1388_v51  ;;  %vm1455_vm12 = vcmp.gt.f32.partialorder %v1390_v13, 0.0  ;;  %v1817_v5 = vld [vmem:[#allocation2 + $0x628] sm:$0xff]  ;;  %v1678_v49 = vld [vmem:[#allocation2 + $0x1d0] sm:$0xff] }
 0x231   : > { %vm1457_vm13 = vcmp.gt.f32.partialorder %v1281_v31, 0.0  ;;  %v1521_v33 = vmul.f32 0.01, %v1281_v31  ;;  %vm1454_vm14 = vcmp.gt.f32.partialorder %v1388_v51, 0.0  ;;  %v1584_v45 = vsel %vm1456_vm9, %v1279_v50, %v1520_v22 }
 0x232   : > { %3563 = vmatprep.subr.bf16.mxu0 %v8867_v26  ;;  %3452 = vmatprep.subr.bf16.mxu1 %v8870_v43  ;;  %vm1459_vm15 = vcmp.gt.f32.partialorder %v1394_v7, 0.0  ;;  %v1523_v25 = vmul.f32 0.01, %v1394_v7  ;;  %v8871_v20 = vcombine.low %v8865_v35, %v8866_v4  ;;  %v1581_v23 = vsel %vm1453_vm10, %v1277_v57, %v1517_v62  ;;  %v1682_v26 = vld [vmem:[#allocation2 + $0x1f0] sm:$0xff] }
 0x233   : > { %v1586_v59 = vsel %vm1458_vm11, %v1392_v47, %v1522_v40  ;;  %v1585_v38 = vsel %vm1457_vm13, %v1281_v31, %v1521_v33  ;;  %v8872_v34 = vcombine.low %v8868_v60, %v8869_v16  ;;  %v1580_v50 = vsel %vm1452_vm8, %v1275_v17, %v1516_v14  ;;  %v1806_v40 = vld [vmem:[#allocation2 + $0x5d0] sm:$0xff]  ;;  %v8873_v16 = vld [vmem:[#allocation37_spill] sm:$0xff] }
 0x234   : > { %3564 = vmatpush2.bf16.msra.mxu0 %v8871_v20  ;;  %v1583_v22 = vsel %vm1455_vm12, %v1390_v13, %v1519_v53  ;;  %v7719_v43 = vpack.c.bf16 %v1585_v38, %v1581_v23  ;;  %v1587_v35 = vsel %vm1459_vm15, %v1394_v7, %v1523_v25  ;;  %v1582_v57 = vsel %vm1454_vm14, %v1388_v51, %v1518_v32  ;;  %v1810_v31 = vld [vmem:[#allocation2 + $0x5f0] sm:$0xff] }
 0x235   : > { %3453 = vmatpush2.bf16.msra.mxu1 %v8872_v34  ;;  %3565 = vmatprep.subr.bf16.mxu0 %v5855_v27  ;;  %v7722_v47 = vpack.c.bf16 %v1584_v45, %v1580_v50  ;;  %v7724_v62 = vpack.c.bf16 %v1587_v35, %v1583_v22  ;;  %v5718_v27 = vcombine.low %v7672_v3, %v7674_v0  ;;  %v1798_v0 = vld [vmem:[#allocation2 + $0x590] sm:$0xff] }
 0x236   : > { %3454 = vmatprep.subr.bf16.mxu1 %v5719_v28  ;;  %v7728_v4 = vpack.c.bf16 %v1586_v59, %v1582_v57  ;;  %3300 = vmatprep.mubr.bf16.mxu1 %v7719_v43  ;;  %v5847_v17 = vcombine.high %v1813_v55, %v1817_v5  ;;  %v5713_v13 = vcombine.high %v1678_v49, %v1682_v26  ;;  %v1802_v28 = vld [vmem:[#allocation2 + $0x5b0] sm:$0xff] }
 0x237   : > { %3413 = vmatprep.mubr.bf16.mxu0 %v7724_v62  ;;  %3301 = vmatmul.mubr.bf16.gmra.mxu1 %v7722_v47  ;;  %v5846_v51 = vcombine.low %v1813_v55, %v1817_v5  ;;  %v5841_v3 = vcombine.high %v1806_v40, %v1810_v31  ;;  %v5840_v7 = vcombine.low %v1806_v40, %v1810_v31  ;;  %v1662_v53 = vld [vmem:[#allocation2 + $0x150] sm:$0xff] }
 0x238   : > { %3566 = vmatpush2.bf16.msra.mxu0 %v5854_v48  ;;  %3456 = vmatprep.mubr.bf16.mxu1 %v7352_v9  ;;  %v5712_v48 = vcombine.low %v1678_v49, %v1682_v26  ;;  %v5705_v14 = vcombine.high %v1670_v2, %v1674_v18  ;;  %v1666_v60 = vld [vmem:[#allocation2 + $0x170] sm:$0xff]  ;;  %v5833_v32 = vcombine.high %v1798_v0, %v1802_v28 }
 0x239   : > { %3414 = vmatmul.mubr.bf16.gmra.mxu0 %v7728_v4  ;;  %3455 = vmatpush2.bf16.msra.mxu1 %v5718_v27  ;;  %v8874_v33 = vld [vmem:[#allocation38_spill] sm:$0xff]  ;;  %v5704_v45 = vcombine.low %v1670_v2, %v1674_v18  ;;  %v5697_v55 = vcombine.high %v1662_v53, %v1666_v60  ;;  %v5832_v23 = vcombine.low %v1798_v0, %v1802_v28 }
 0x23a   : > { %3569 = vmatprep.mubr.bf16.mxu0 %v7357_v44  ;;  %3567 = vmatprep.subr.bf16.mxu0 %v5847_v17  ;;  %v1790_v25 = vld [vmem:[#allocation2 + $0x550] sm:$0xff]  ;;  %v5696_v5 = vcombine.low %v1662_v53, %v1666_v60 }
 0x23b   : > { %3650 = vmatprep.subr.bf16.mxu1 %v5713_v13  ;;  %v1794_v20 = vld [vmem:[#allocation2 + $0x570] sm:$0xff] }
 0x23c   : > { %3568 = vmatpush2.bf16.msra.mxu0 %v5846_v51  ;;  %v5825_v59 = vcombine.high %v1790_v25, %v1794_v20  ;;  %v1654_v38 = vld [vmem:[#allocation2 + $0x110] sm:$0xff]  ;;  %v5824_v50 = vcombine.low %v1790_v25, %v1794_v20 }
 0x23d   : > { %3763 = vmatprep.subr.bf16.mxu0 %v5841_v3  ;;  %v1658_v34 = vld [vmem:[#allocation2 + $0x130] sm:$0xff] }
 0x23e   : > { %v1782_v49 = vld [vmem:[#allocation2 + $0x510] sm:$0xff]  ;;  %v5689_v22 = vcombine.high %v1654_v38, %v1658_v34  ;;  %v5688_v40 = vcombine.low %v1654_v38, %v1658_v34 }
 0x23f   : > { %3457 = vmatmul.mubr.bf16.vlgmr.msra.gmra.mxu1 %v8873_v16  ;;  %v1786_v26 = vld [vmem:[#allocation2 + $0x530] sm:$0xff] }
 0x240   : > { %3651 = vmatpush1.bf16.msra.mxu1 %v5712_v48  ;;  %3466 = vmatprep.mubr.bf16.mxu1 %v7385_v11  ;;  %v1646_v35 = vld [vmem:[#allocation2 + $0xd0] sm:$0xff]  ;;  %v5817_v27 = vcombine.high %v1782_v49, %v1786_v26  ;;  %v5816_v51 = vcombine.low %v1782_v49, %v1786_v26 }
 0x241   : > { %3570 = vmatmul.mubr.bf16.vlgmr.msra.gmra.mxu0 %v8874_v33  ;;  %3652 = vmatprep.subr.bf16.mxu1 %v5705_v14  ;;  %v1650_v57 = vld [vmem:[#allocation2 + $0xf0] sm:$0xff] }
 0x242   : > { %3579 = vmatprep.mubr.bf16.mxu0 %v7396_v12  ;;  %3764 = vmatpush1.bf16.msra.mxu0 %v5840_v7  ;;  %v1774_v31 = vld [vmem:[#allocation2 + $0x4d0] sm:$0xff]  ;;  %v5681_v13 = vcombine.high %v1646_v35, %v1650_v57  ;;  %v5680_v48 = vcombine.low %v1646_v35, %v1650_v57 }
 0x243   : > { %3765 = vmatprep.subr.bf16.mxu0 %v5833_v32  ;;  %v1778_v17 = vld [vmem:[#allocation2 + $0x4f0] sm:$0xff] }
 0x244   : > { %3653 = vmatpush1.bf16.msra.mxu1 %v5704_v45  ;;  %v5809_v3 = vcombine.high %v1774_v31, %v1778_v17  ;;  %v1638_v2 = vld [vmem:[#allocation2 + $0x90] sm:$0xff]  ;;  %v5808_v7 = vcombine.low %v1774_v31, %v1778_v17 }
 0x245   : > { %3654 = vmatprep.subr.bf16.mxu1 %v5697_v55  ;;  %v1642_v18 = vld [vmem:[#allocation2 + $0xb0] sm:$0xff] }
 0x246   : > { %3766 = vmatpush1.bf16.msra.mxu0 %v5832_v23  ;;  %v1766_v0 = vld [vmem:[#allocation2 + $0x490] sm:$0xff]  ;;  %v5673_v14 = vcombine.high %v1638_v2, %v1642_v18  ;;  %v5672_v45 = vcombine.low %v1638_v2, %v1642_v18 }
 0x247   : > { %3467 = vmatmul.mubr.bf16.gmra.mxu1 %v7392_v58  ;;  %3767 = vmatprep.subr.bf16.mxu0 %v5825_v59  ;;  %v1770_v28 = vld [vmem:[#allocation2 + $0x4b0] sm:$0xff] }
 0x248   : > { %3655 = vmatpush1.bf16.msra.mxu1 %v5696_v5  ;;  %3476 = vmatprep.mubr.bf16.mxu1 %v7437_v6  ;;  %v1630_v53 = vld [vmem:[#allocation2 + $0x50] sm:$0xff]  ;;  %v5801_v32 = vcombine.high %v1766_v0, %v1770_v28  ;;  %v5800_v23 = vcombine.low %v1766_v0, %v1770_v28 }
 0x249   : > { %3580 = vmatmul.mubr.bf16.gmra.mxu0 %v7394_v8  ;;  %3656 = vmatprep.subr.bf16.mxu1 %v5689_v22  ;;  %v1634_v60 = vld [vmem:[#allocation2 + $0x70] sm:$0xff] }
 0x24a   : > { %3589 = vmatprep.mubr.bf16.mxu0 %v7459_v52  ;;  %3768 = vmatpush1.bf16.msra.mxu0 %v5824_v50  ;;  %v1758_v25 = vld [vmem:[#allocation2 + $0x450] sm:$0xff]  ;;  %v5665_v55 = vcombine.high %v1630_v53, %v1634_v60  ;;  %v5664_v5 = vcombine.low %v1630_v53, %v1634_v60 }
 0x24b   : > { %3769 = vmatprep.subr.bf16.mxu0 %v5817_v27  ;;  %v1762_v20 = vld [vmem:[#allocation2 + $0x470] sm:$0xff] }
 0x24c   : > { %3657 = vmatpush1.bf16.msra.mxu1 %v5688_v40  ;;  %v5793_v59 = vcombine.high %v1758_v25, %v1762_v20  ;;  %v1622_v38 = vld [vmem:[#allocation2 + $0x10] sm:$0xff]  ;;  %v5792_v50 = vcombine.low %v1758_v25, %v1762_v20 }
 0x24d   : > { %3658 = vmatprep.subr.bf16.mxu1 %v5681_v13  ;;  %v1626_v34 = vld [vmem:[#allocation2 + $0x30] sm:$0xff] }
 0x24e   : > { %3770 = vmatpush1.bf16.msra.mxu0 %v5816_v51  ;;  %v1750_v49 = vld [vmem:[#allocation2 + $0x410] sm:$0xff]  ;;  %v5657_v22 = vcombine.high %v1622_v38, %v1626_v34  ;;  %v5656_v40 = vcombine.low %v1622_v38, %v1626_v34 }
 0x24f   : > { %3477 = vmatmul.mubr.bf16.gmra.mxu1 %v7445_v1  ;;  %3771 = vmatprep.subr.bf16.mxu0 %v5809_v3  ;;  %v1754_v26 = vld [vmem:[#allocation2 + $0x430] sm:$0xff] }
 0x250   : > { %3659 = vmatpush1.bf16.msra.mxu1 %v5680_v48  ;;  %3486 = vmatprep.mubr.bf16.mxu1 %v7500_v39  ;;  %v1742_v35 = vld [vmem:[#allocation2 + $0x3d0] sm:$0xff]  ;;  %v5785_v27 = vcombine.high %v1750_v49, %v1754_v26  ;;  %v5784_v51 = vcombine.low %v1750_v49, %v1754_v26 }
 0x251   : > { %3590 = vmatmul.mubr.bf16.gmra.mxu0 %v7447_v10  ;;  %3660 = vmatprep.subr.bf16.mxu1 %v5673_v14  ;;  %v1746_v57 = vld [vmem:[#allocation2 + $0x3f0] sm:$0xff] }
 0x252   : > { %3599 = vmatprep.mubr.bf16.mxu0 %v7504_v46  ;;  %3772 = vmatpush1.bf16.msra.mxu0 %v5808_v7  ;;  %v1870_v31 = vld [vmem:[#allocation2 + $0x7d0] sm:$0xff]  ;;  %v5777_v13 = vcombine.high %v1742_v35, %v1746_v57  ;;  %v5776_v48 = vcombine.low %v1742_v35, %v1746_v57 }
 0x253   : > { %3773 = vmatprep.subr.bf16.mxu0 %v5801_v32  ;;  %v1874_v17 = vld [vmem:[#allocation2 + $0x7f0] sm:$0xff] }
 0x254   : > { %3661 = vmatpush1.bf16.msra.mxu1 %v5672_v45  ;;  %v5905_v3 = vcombine.high %v1870_v31, %v1874_v17  ;;  %v1734_v2 = vld [vmem:[#allocation2 + $0x390] sm:$0xff]  ;;  %v5904_v7 = vcombine.low %v1870_v31, %v1874_v17 }
 0x255   : > { %3662 = vmatprep.subr.bf16.mxu1 %v5665_v55  ;;  %v1738_v18 = vld [vmem:[#allocation2 + $0x3b0] sm:$0xff] }
 0x256   : > { %3774 = vmatpush1.bf16.msra.mxu0 %v5800_v23  ;;  %v1862_v0 = vld [vmem:[#allocation2 + $0x790] sm:$0xff]  ;;  %v5769_v14 = vcombine.high %v1734_v2, %v1738_v18  ;;  %v5768_v45 = vcombine.low %v1734_v2, %v1738_v18 }
 0x257   : > { %3487 = vmatmul.mubr.bf16.gmra.mxu1 %v7491_v36  ;;  %3775 = vmatprep.subr.bf16.mxu0 %v5793_v59  ;;  %v1866_v28 = vld [vmem:[#allocation2 + $0x7b0] sm:$0xff] }
 0x258   : > { %3663 = vmatpush1.bf16.msra.mxu1 %v5664_v5  ;;  %3496 = vmatprep.mubr.bf16.mxu1 %v7548_v41  ;;  %v1726_v53 = vld [vmem:[#allocation2 + $0x350] sm:$0xff]  ;;  %v5897_v32 = vcombine.high %v1862_v0, %v1866_v28  ;;  %v5896_v23 = vcombine.low %v1862_v0, %v1866_v28 }
 0x259   : > { %3600 = vmatmul.mubr.bf16.gmra.mxu0 %v7507_v37  ;;  %3664 = vmatprep.subr.bf16.mxu1 %v5657_v22  ;;  %v1730_v60 = vld [vmem:[#allocation2 + $0x370] sm:$0xff] }
 0x25a   : > { %3609 = vmatprep.mubr.bf16.mxu0 %v7550_v42  ;;  %3776 = vmatpush1.bf16.msra.mxu0 %v5792_v50  ;;  %v1854_v25 = vld [vmem:[#allocation2 + $0x750] sm:$0xff]  ;;  %v5761_v55 = vcombine.high %v1726_v53, %v1730_v60  ;;  %v5760_v5 = vcombine.low %v1726_v53, %v1730_v60 }
 0x25b   : > { %3777 = vmatprep.subr.bf16.mxu0 %v5785_v27  ;;  %v1858_v20 = vld [vmem:[#allocation2 + $0x770] sm:$0xff] }
 0x25c   : > { %3665 = vmatpush1.bf16.msra.mxu1 %v5656_v40  ;;  %v5889_v59 = vcombine.high %v1854_v25, %v1858_v20  ;;  %v1718_v38 = vld [vmem:[#allocation2 + $0x310] sm:$0xff]  ;;  %v5888_v50 = vcombine.low %v1854_v25, %v1858_v20 }
 0x25d   : > { %3666 = vmatprep.subr.bf16.mxu1 %v5777_v13  ;;  %v1722_v34 = vld [vmem:[#allocation2 + $0x330] sm:$0xff] }
 0x25e   : > { %3778 = vmatpush1.bf16.msra.mxu0 %v5784_v51  ;;  %v1846_v49 = vld [vmem:[#allocation2 + $0x710] sm:$0xff]  ;;  %v5753_v22 = vcombine.high %v1718_v38, %v1722_v34  ;;  %v5752_v40 = vcombine.low %v1718_v38, %v1722_v34 }
 0x25f   : > { %3497 = vmatmul.mubr.bf16.gmra.mxu1 %v7546_v61  ;;  %3779 = vmatprep.subr.bf16.mxu0 %v5905_v3  ;;  %v1850_v26 = vld [vmem:[#allocation2 + $0x730] sm:$0xff] }
 0x260   : > { %3667 = vmatpush2.bf16.msra.mxu1 %v5776_v48  ;;  %3506 = vmatprep.mubr.bf16.mxu1 %v7601_v56  ;;  %v1710_v35 = vld [vmem:[#allocation2 + $0x2d0] sm:$0xff]  ;;  %v5881_v27 = vcombine.high %v1846_v49, %v1850_v26  ;;  %v5880_v51 = vcombine.low %v1846_v49, %v1850_v26 }
 0x261   : > { %3610 = vmatmul.mubr.bf16.gmra.mxu0 %v7556_v24  ;;  %3668 = vmatprep.subr.bf16.mxu1 %v5769_v14  ;;  %v1714_v57 = vld [vmem:[#allocation2 + $0x2f0] sm:$0xff] }
 0x262   : > { %3619 = vmatprep.mubr.bf16.mxu0 %v7606_v15  ;;  %3780 = vmatpush2.bf16.msra.mxu0 %v5904_v7  ;;  %v1838_v31 = vld [vmem:[#allocation2 + $0x6d0] sm:$0xff]  ;;  %v5745_v13 = vcombine.high %v1710_v35, %v1714_v57  ;;  %v5744_v48 = vcombine.low %v1710_v35, %v1714_v57  ;;  %v1679_v35 = vld [vmem:[#allocation2 + $0x1d8] sm:$0xff] }
 0x263   : > { %3781 = vmatprep.subr.bf16.mxu0 %v5897_v32  ;;  %v1842_v17 = vld [vmem:[#allocation2 + $0x6f0] sm:$0xff]  ;;  %v1683_v57 = vld [vmem:[#allocation2 + $0x1f8] sm:$0xff] }
 0x264   : > { %3669 = vmatpush2.bf16.msra.mxu1 %v5768_v45  ;;  %v5873_v3 = vcombine.high %v1838_v31, %v1842_v17  ;;  %v1702_v2 = vld [vmem:[#allocation2 + $0x290] sm:$0xff]  ;;  %v5872_v7 = vcombine.low %v1838_v31, %v1842_v17  ;;  %v1807_v31 = vld [vmem:[#allocation2 + $0x5d8] sm:$0xff] }
 0x265   : > { %3670 = vmatprep.subr.bf16.mxu1 %v5761_v55  ;;  %v1706_v18 = vld [vmem:[#allocation2 + $0x2b0] sm:$0xff]  ;;  %v1811_v17 = vld [vmem:[#allocation2 + $0x5f8] sm:$0xff] }
 0x266   : > { %3782 = vmatpush2.bf16.msra.mxu0 %v5896_v23  ;;  %v1830_v0 = vld [vmem:[#allocation2 + $0x690] sm:$0xff]  ;;  %v5737_v14 = vcombine.high %v1702_v2, %v1706_v18  ;;  %v5736_v45 = vcombine.low %v1702_v2, %v1706_v18  ;;  %v1675_v2 = vld [vmem:[#allocation2 + $0x1b8] sm:$0xff]  ;;  %v5843_v18 = vcombine.high %v1807_v31, %v1811_v17 }
 0x267   : > { %3507 = vmatmul.mubr.bf16.gmra.mxu1 %v7604_v29  ;;  %3783 = vmatprep.subr.bf16.mxu0 %v5889_v59  ;;  %v1834_v28 = vld [vmem:[#allocation2 + $0x6b0] sm:$0xff] }
 0x268   : > { %3671 = vmatpush2.bf16.msra.mxu1 %v5760_v5  ;;  %3516 = vmatprep.mubr.bf16.mxu1 %v7657_v19  ;;  %v1694_v53 = vld [vmem:[#allocation2 + $0x250] sm:$0xff]  ;;  %v5865_v32 = vcombine.high %v1830_v0, %v1834_v28  ;;  %v5864_v23 = vcombine.low %v1830_v0, %v1834_v28  ;;  %v1799_v0 = vld [vmem:[#allocation2 + $0x598] sm:$0xff] }
 0x269   : > { %3620 = vmatmul.mubr.bf16.gmra.mxu0 %v7615_v21  ;;  %3672 = vmatprep.subr.bf16.mxu1 %v5753_v22  ;;  %v1698_v60 = vld [vmem:[#allocation2 + $0x270] sm:$0xff]  ;;  %v1803_v28 = vld [vmem:[#allocation2 + $0x5b8] sm:$0xff] }
 0x26a   : > { %3629 = vmatprep.mubr.bf16.mxu0 %v7676_v63  ;;  %3784 = vmatpush2.bf16.msra.mxu0 %v5888_v50  ;;  %v1822_v25 = vld [vmem:[#allocation2 + $0x650] sm:$0xff]  ;;  %v5729_v55 = vcombine.high %v1694_v53, %v1698_v60  ;;  %v5728_v5 = vcombine.low %v1694_v53, %v1698_v60  ;;  %v1663_v53 = vld [vmem:[#allocation2 + $0x158] sm:$0xff] }
 0x26b   : > { %3785 = vmatprep.subr.bf16.mxu0 %v5881_v27  ;;  %v1826_v20 = vld [vmem:[#allocation2 + $0x670] sm:$0xff]  ;;  %v1667_v60 = vld [vmem:[#allocation2 + $0x178] sm:$0xff] }
 0x26c   : > { %3673 = vmatpush2.bf16.msra.mxu1 %v5752_v40  ;;  %v5857_v59 = vcombine.high %v1822_v25, %v1826_v20  ;;  %v1686_v38 = vld [vmem:[#allocation2 + $0x210] sm:$0xff]  ;;  %v5856_v50 = vcombine.low %v1822_v25, %v1826_v20  ;;  %v1791_v25 = vld [vmem:[#allocation2 + $0x558] sm:$0xff] }
 0x26d   : > { %3674 = vmatprep.subr.bf16.mxu1 %v5745_v13  ;;  %v1690_v34 = vld [vmem:[#allocation2 + $0x230] sm:$0xff]  ;;  %v5715_v13 = vcombine.high %v1679_v35, %v1683_v57  ;;  %v1795_v20 = vld [vmem:[#allocation2 + $0x578] sm:$0xff] }
 0x26e   : > { %3786 = vmatpush2.bf16.msra.mxu0 %v5880_v51  ;;  %v1814_v49 = vld [vmem:[#allocation2 + $0x610] sm:$0xff]  ;;  %v5721_v22 = vcombine.high %v1686_v38, %v1690_v34  ;;  %v5720_v40 = vcombine.low %v1686_v38, %v1690_v34  ;;  %v1659_v38 = vld [vmem:[#allocation2 + $0x138] sm:$0xff]  ;;  %v5827_v34 = vcombine.high %v1791_v25, %v1795_v20 }
 0x26f   : > { %3517 = vmatmul.mubr.bf16.gmra.mxu1 %v7663_v30  ;;  %3787 = vmatprep.subr.bf16.mxu0 %v5873_v3  ;;  %v1818_v26 = vld [vmem:[#allocation2 + $0x630] sm:$0xff]  ;;  %v1671_v3 = vld [vmem:[#allocation2 + $0x198] sm:$0xff] }
 0x270   : > { %3675 = vmatpush2.bf16.msra.mxu1 %v5744_v48  ;;  %3526 = vmatprep.mubr.bf16.mxu1 %v7719_v43  ;;  %v5849_v27 = vcombine.high %v1814_v49, %v1818_v26  ;;  %v5848_v51 = vcombine.low %v1814_v49, %v1818_v26  ;;  %v5714_v48 = vcombine.low %v1679_v35, %v1683_v57  ;;  %v1783_v49 = vld [vmem:[#allocation2 + $0x518] sm:$0xff] }
 0x271   : > { %3630 = vmatmul.mubr.bf16.gmra.mxu0 %v7682_v54  ;;  %3676 = vmatprep.subr.bf16.mxu1 %v5737_v14  ;;  %v5842_v14 = vcombine.low %v1807_v31, %v1811_v17  ;;  %v1787_v26 = vld [vmem:[#allocation2 + $0x538] sm:$0xff] }
 0x272   : > { %3639 = vmatprep.mubr.bf16.mxu0 %v7724_v62  ;;  %3788 = vmatpush2.bf16.msra.mxu0 %v5872_v7  ;;  %v5707_v7 = vcombine.high %v1671_v3, %v1675_v2  ;;  %v1647_v35 = vld [vmem:[#allocation2 + $0xd8] sm:$0xff] }
 0x273   : > { %3789 = vmatprep.subr.bf16.mxu0 %v5865_v32  ;;  %v5835_v32 = vcombine.high %v1799_v0, %v1803_v28  ;;  %v1651_v57 = vld [vmem:[#allocation2 + $0xf8] sm:$0xff] }
 0x274   : > { %3677 = vmatpush2.bf16.msra.mxu1 %v5736_v45  ;;  %v5706_v45 = vcombine.low %v1671_v3, %v1675_v2  ;;  %v1775_v31 = vld [vmem:[#allocation2 + $0x4d8] sm:$0xff] }
 0x275   : > { %3678 = vmatprep.subr.bf16.mxu1 %v5729_v55  ;;  %v5699_v55 = vcombine.high %v1663_v53, %v1667_v60  ;;  %v1779_v17 = vld [vmem:[#allocation2 + $0x4f8] sm:$0xff] }
 0x276   : > { %3790 = vmatpush2.bf16.msra.mxu0 %v5864_v23  ;;  %v5834_v23 = vcombine.low %v1799_v0, %v1803_v28  ;;  %v1639_v3 = vld [vmem:[#allocation2 + $0x98] sm:$0xff] }
 0x277   : > { %3527 = vmatmul.mubr.bf16.gmra.mxu1 %v7722_v47  ;;  %3791 = vmatprep.subr.bf16.mxu0 %v5857_v59  ;;  %v1655_v59 = vld [vmem:[#allocation2 + $0x118] sm:$0xff] }
 0x278   : > { %3679 = vmatpush2.bf16.msra.mxu1 %v5728_v5  ;;  %3682 = vmatprep.mubr.bf16.mxu1 %v7352_v9  ;;  %v5698_v5 = vcombine.low %v1663_v53, %v1667_v60  ;;  %v1643_v2 = vld [vmem:[#allocation2 + $0xb8] sm:$0xff] }
 0x279   : > { %3640 = vmatmul.mubr.bf16.gmra.mxu0 %v7728_v4  ;;  %3680 = vmatprep.subr.bf16.mxu1 %v5721_v22  ;;  %v5826_v22 = vcombine.low %v1791_v25, %v1795_v20  ;;  %v1767_v0 = vld [vmem:[#allocation2 + $0x498] sm:$0xff] }
 0x27a   : > { %3795 = vmatprep.mubr.bf16.mxu0 %v7357_v44  ;;  %3792 = vmatpush2.bf16.msra.mxu0 %v5856_v50  ;;  %v5691_v50 = vcombine.high %v1655_v59, %v1659_v38  ;;  %v1771_v28 = vld [vmem:[#allocation2 + $0x4b8] sm:$0xff] }
 0x27b   : > { %3793 = vmatprep.subr.bf16.mxu0 %v5849_v27  ;;  %v5819_v27 = vcombine.high %v1783_v49, %v1787_v26  ;;  %v1631_v53 = vld [vmem:[#allocation2 + $0x58] sm:$0xff] }
 0x27c   : > { %3681 = vmatpush2.bf16.msra.mxu1 %v5720_v40  ;;  %v5690_v40 = vcombine.low %v1655_v59, %v1659_v38  ;;  %v1635_v60 = vld [vmem:[#allocation2 + $0x78] sm:$0xff] }
 0x27d   : > { %3876 = vmatprep.subr.bf16.mxu1 %v5715_v13  ;;  %v5683_v13 = vcombine.high %v1647_v35, %v1651_v57  ;;  %v1759_v25 = vld [vmem:[#allocation2 + $0x458] sm:$0xff] }
 0x27e   : > { %3794 = vmatpush2.bf16.msra.mxu0 %v5848_v51  ;;  %v5818_v51 = vcombine.low %v1783_v49, %v1787_v26  ;;  %v1763_v20 = vld [vmem:[#allocation2 + $0x478] sm:$0xff] }
 0x27f   : > { %3683 = vmatmul.mubr.bf16.vlgmr.msra.gmra.mxu1 %v8873_v16  ;;  %3989 = vmatprep.subr.bf16.mxu0 %v5843_v18  ;;  %v5811_v18 = vcombine.high %v1775_v31, %v1779_v17  ;;  %v1623_v59 = vld [vmem:[#allocation2 + $0x18] sm:$0xff] }
 0x280   : > { %3877 = vmatpush1.bf16.msra.mxu1 %v5714_v48  ;;  %3692 = vmatprep.mubr.bf16.mxu1 %v7385_v11  ;;  %v5682_v48 = vcombine.low %v1647_v35, %v1651_v57  ;;  %v1627_v38 = vld [vmem:[#allocation2 + $0x38] sm:$0xff] }
 0x281   : > { %3796 = vmatmul.mubr.bf16.vlgmr.msra.gmra.mxu0 %v8874_v33  ;;  %3878 = vmatprep.subr.bf16.mxu1 %v5707_v7  ;;  %v5675_v7 = vcombine.high %v1639_v3, %v1643_v2  ;;  %v1751_v49 = vld [vmem:[#allocation2 + $0x418] sm:$0xff] }
 0x282   : > { %3805 = vmatprep.mubr.bf16.mxu0 %v7396_v12  ;;  %3990 = vmatpush1.bf16.msra.mxu0 %v5842_v14  ;;  %v5810_v14 = vcombine.low %v1775_v31, %v1779_v17  ;;  %v1755_v26 = vld [vmem:[#allocation2 + $0x438] sm:$0xff] }
 0x283   : > { %3991 = vmatprep.subr.bf16.mxu0 %v5835_v32  ;;  %v5803_v32 = vcombine.high %v1767_v0, %v1771_v28  ;;  %v1743_v35 = vld [vmem:[#allocation2 + $0x3d8] sm:$0xff] }
 0x284   : > { %3879 = vmatpush1.bf16.msra.mxu1 %v5706_v45  ;;  %v5674_v45 = vcombine.low %v1639_v3, %v1643_v2  ;;  %v1747_v57 = vld [vmem:[#allocation2 + $0x3f8] sm:$0xff] }
 0x285   : > { %3880 = vmatprep.subr.bf16.mxu1 %v5699_v55  ;;  %v5667_v55 = vcombine.high %v1631_v53, %v1635_v60  ;;  %v1871_v31 = vld [vmem:[#allocation2 + $0x7d8] sm:$0xff] }
 0x286   : > { %3992 = vmatpush1.bf16.msra.mxu0 %v5834_v23  ;;  %v5802_v23 = vcombine.low %v1767_v0, %v1771_v28  ;;  %v1875_v17 = vld [vmem:[#allocation2 + $0x7f8] sm:$0xff] }
 0x287   : > { %3693 = vmatmul.mubr.bf16.gmra.mxu1 %v7392_v58  ;;  %3993 = vmatprep.subr.bf16.mxu0 %v5827_v34  ;;  %v5795_v34 = vcombine.high %v1759_v25, %v1763_v20  ;;  %v1735_v3 = vld [vmem:[#allocation2 + $0x398] sm:$0xff] }
 0x288   : > { %3881 = vmatpush1.bf16.msra.mxu1 %v5698_v5  ;;  %3702 = vmatprep.mubr.bf16.mxu1 %v7437_v6  ;;  %v5666_v5 = vcombine.low %v1631_v53, %v1635_v60  ;;  %v1739_v2 = vld [vmem:[#allocation2 + $0x3b8] sm:$0xff] }
 0x289   : > { %3806 = vmatmul.mubr.bf16.gmra.mxu0 %v7394_v8  ;;  %3882 = vmatprep.subr.bf16.mxu1 %v5691_v50  ;;  %v5659_v50 = vcombine.high %v1623_v59, %v1627_v38  ;;  %v1863_v0 = vld [vmem:[#allocation2 + $0x798] sm:$0xff] }
 0x28a   : > { %3815 = vmatprep.mubr.bf16.mxu0 %v7459_v52  ;;  %3994 = vmatpush1.bf16.msra.mxu0 %v5826_v22  ;;  %v5794_v22 = vcombine.low %v1759_v25, %v1763_v20  ;;  %v1867_v28 = vld [vmem:[#allocation2 + $0x7b8] sm:$0xff] }
 0x28b   : > { %3995 = vmatprep.subr.bf16.mxu0 %v5819_v27  ;;  %v5787_v27 = vcombine.high %v1751_v49, %v1755_v26  ;;  %v1727_v53 = vld [vmem:[#allocation2 + $0x358] sm:$0xff] }
 0x28c   : > { %3883 = vmatpush1.bf16.msra.mxu1 %v5690_v40  ;;  %v5658_v40 = vcombine.low %v1623_v59, %v1627_v38  ;;  %v1731_v60 = vld [vmem:[#allocation2 + $0x378] sm:$0xff] }
 0x28d   : > { %3884 = vmatprep.subr.bf16.mxu1 %v5683_v13  ;;  %v5779_v13 = vcombine.high %v1743_v35, %v1747_v57  ;;  %v1855_v25 = vld [vmem:[#allocation2 + $0x758] sm:$0xff] }
 0x28e   : > { %3996 = vmatpush1.bf16.msra.mxu0 %v5818_v51  ;;  %v5786_v51 = vcombine.low %v1751_v49, %v1755_v26  ;;  %v1859_v20 = vld [vmem:[#allocation2 + $0x778] sm:$0xff] }
 0x28f   : > { %3703 = vmatmul.mubr.bf16.gmra.mxu1 %v7445_v1  ;;  %3997 = vmatprep.subr.bf16.mxu0 %v5811_v18  ;;  %v5907_v18 = vcombine.high %v1871_v31, %v1875_v17  ;;  %v1719_v59 = vld [vmem:[#allocation2 + $0x318] sm:$0xff] }
 0x290   : > { %3885 = vmatpush1.bf16.msra.mxu1 %v5682_v48  ;;  %3712 = vmatprep.mubr.bf16.mxu1 %v7500_v39  ;;  %v5778_v48 = vcombine.low %v1743_v35, %v1747_v57  ;;  %v1723_v38 = vld [vmem:[#allocation2 + $0x338] sm:$0xff] }
 0x291   : > { %3816 = vmatmul.mubr.bf16.gmra.mxu0 %v7447_v10  ;;  %3886 = vmatprep.subr.bf16.mxu1 %v5675_v7  ;;  %v5771_v7 = vcombine.high %v1735_v3, %v1739_v2  ;;  %v1847_v49 = vld [vmem:[#allocation2 + $0x718] sm:$0xff] }
 0x292   : > { %3825 = vmatprep.mubr.bf16.mxu0 %v7504_v46  ;;  %3998 = vmatpush1.bf16.msra.mxu0 %v5810_v14  ;;  %v5906_v14 = vcombine.low %v1871_v31, %v1875_v17  ;;  %v1851_v26 = vld [vmem:[#allocation2 + $0x738] sm:$0xff] }
 0x293   : > { %3999 = vmatprep.subr.bf16.mxu0 %v5803_v32  ;;  %v5899_v32 = vcombine.high %v1863_v0, %v1867_v28  ;;  %v1711_v35 = vld [vmem:[#allocation2 + $0x2d8] sm:$0xff] }
 0x294   : > { %3887 = vmatpush1.bf16.msra.mxu1 %v5674_v45  ;;  %v5770_v45 = vcombine.low %v1735_v3, %v1739_v2  ;;  %v1715_v57 = vld [vmem:[#allocation2 + $0x2f8] sm:$0xff] }
 0x295   : > { %3888 = vmatprep.subr.bf16.mxu1 %v5667_v55  ;;  %v5763_v55 = vcombine.high %v1727_v53, %v1731_v60  ;;  %v1839_v31 = vld [vmem:[#allocation2 + $0x6d8] sm:$0xff] }
 0x296   : > { %4000 = vmatpush1.bf16.msra.mxu0 %v5802_v23  ;;  %v5898_v23 = vcombine.low %v1863_v0, %v1867_v28  ;;  %v1843_v17 = vld [vmem:[#allocation2 + $0x6f8] sm:$0xff] }
 0x297   : > { %3713 = vmatmul.mubr.bf16.gmra.mxu1 %v7491_v36  ;;  %4001 = vmatprep.subr.bf16.mxu0 %v5795_v34  ;;  %v5891_v34 = vcombine.high %v1855_v25, %v1859_v20  ;;  %v1703_v3 = vld [vmem:[#allocation2 + $0x298] sm:$0xff] }
 0x298   : > { %3889 = vmatpush1.bf16.msra.mxu1 %v5666_v5  ;;  %3722 = vmatprep.mubr.bf16.mxu1 %v7548_v41  ;;  %v5762_v5 = vcombine.low %v1727_v53, %v1731_v60  ;;  %v1707_v2 = vld [vmem:[#allocation2 + $0x2b8] sm:$0xff] }
 0x299   : > { %3826 = vmatmul.mubr.bf16.gmra.mxu0 %v7507_v37  ;;  %3890 = vmatprep.subr.bf16.mxu1 %v5659_v50  ;;  %v5755_v50 = vcombine.high %v1719_v59, %v1723_v38  ;;  %v1831_v0 = vld [vmem:[#allocation2 + $0x698] sm:$0xff] }
 0x29a   : > { %3835 = vmatprep.mubr.bf16.mxu0 %v7550_v42  ;;  %4002 = vmatpush1.bf16.msra.mxu0 %v5794_v22  ;;  %v5890_v22 = vcombine.low %v1855_v25, %v1859_v20  ;;  %v1835_v28 = vld [vmem:[#allocation2 + $0x6b8] sm:$0xff] }
 0x29b   : > { %4003 = vmatprep.subr.bf16.mxu0 %v5787_v27  ;;  %v5883_v27 = vcombine.high %v1847_v49, %v1851_v26  ;;  %v1695_v53 = vld [vmem:[#allocation2 + $0x258] sm:$0xff] }
 0x29c   : > { %3891 = vmatpush1.bf16.msra.mxu1 %v5658_v40  ;;  %v5754_v40 = vcombine.low %v1719_v59, %v1723_v38  ;;  %v1699_v60 = vld [vmem:[#allocation2 + $0x278] sm:$0xff] }
 0x29d   : > { %3892 = vmatprep.subr.bf16.mxu1 %v5779_v13  ;;  %v5747_v13 = vcombine.high %v1711_v35, %v1715_v57  ;;  %v1823_v25 = vld [vmem:[#allocation2 + $0x658] sm:$0xff] }
 0x29e   : > { %4004 = vmatpush1.bf16.msra.mxu0 %v5786_v51  ;;  %v5882_v51 = vcombine.low %v1847_v49, %v1851_v26  ;;  %v1827_v20 = vld [vmem:[#allocation2 + $0x678] sm:$0xff] }
 0x29f   : > { %3723 = vmatmul.mubr.bf16.gmra.mxu1 %v7546_v61  ;;  %4005 = vmatprep.subr.bf16.mxu0 %v5907_v18  ;;  %v5875_v18 = vcombine.high %v1839_v31, %v1843_v17  ;;  %v1687_v59 = vld [vmem:[#allocation2 + $0x218] sm:$0xff] }
 0x2a0   : > { %3893 = vmatpush2.bf16.msra.mxu1 %v5778_v48  ;;  %3732 = vmatprep.mubr.bf16.mxu1 %v7601_v56  ;;  %v5746_v48 = vcombine.low %v1711_v35, %v1715_v57  ;;  %v1691_v38 = vld [vmem:[#allocation2 + $0x238] sm:$0xff] }
 0x2a1   : > { %3836 = vmatmul.mubr.bf16.gmra.mxu0 %v7556_v24  ;;  %3894 = vmatprep.subr.bf16.mxu1 %v5771_v7  ;;  %v5739_v7 = vcombine.high %v1703_v3, %v1707_v2  ;;  %v1815_v49 = vld [vmem:[#allocation2 + $0x618] sm:$0xff]  ;;  %v5722_v57 = vcombine.low %v1687_v59, %v1691_v38 }
 0x2a2   : > { %3845 = vmatprep.mubr.bf16.mxu0 %v7606_v15  ;;  %4006 = vmatpush2.bf16.msra.mxu0 %v5906_v14  ;;  %v5874_v14 = vcombine.low %v1839_v31, %v1843_v17  ;;  %v1819_v26 = vld [vmem:[#allocation2 + $0x638] sm:$0xff] }
 0x2a3   : > { %4007 = vmatprep.subr.bf16.mxu0 %v5899_v32  ;;  %v5867_v32 = vcombine.high %v1831_v0, %v1835_v28  ;;  %v5851_v35 = vcombine.high %v1815_v49, %v1819_v26  ;;  %v6409_v31 = vld [vmem:[#allocation4 + $0x78] sm:$0xff]   ;;  %v5850_v17 = vcombine.low %v1815_v49, %v1819_v26 }
 0x2a4   : > { %3895 = vmatpush2.bf16.msra.mxu1 %v5770_v45  ;;  %v5738_v45 = vcombine.low %v1703_v3, %v1707_v2  ;;  %v6419_v3 = vld [vmem:[#allocation4 + $0xf8] sm:$0xff]  }
 0x2a5   : > { %3896 = vmatprep.subr.bf16.mxu1 %v5763_v55  ;;  %v5731_v55 = vcombine.high %v1695_v53, %v1699_v60  ;;  %v6410_v2 = vld [vmem:[#allocation4 + $0x38] sm:$0xff]  }
 0x2a6   : > { %4008 = vmatpush2.bf16.msra.mxu0 %v5898_v23  ;;  %v5866_v23 = vcombine.low %v1831_v0, %v1835_v28  ;;  %v6420_v28 = vld [vmem:[#allocation4 + $0xb8] sm:$0xff]  }
 0x2a7   : > { %3733 = vmatmul.mubr.bf16.gmra.mxu1 %v7604_v29  ;;  %4009 = vmatprep.subr.bf16.mxu0 %v5891_v34  ;;  %v5859_v34 = vcombine.high %v1823_v25, %v1827_v20  ;;  %v6417_v26 = vld [vmem:[#allocation4 + $0x58] sm:$0xff]  }
 0x2a8   : > { %3897 = vmatpush2.bf16.msra.mxu1 %v5762_v5  ;;  %3742 = vmatprep.mubr.bf16.mxu1 %v7657_v19  ;;  %v5730_v5 = vcombine.low %v1695_v53, %v1699_v60 }
 0x2a9   : > { %3846 = vmatmul.mubr.bf16.gmra.mxu0 %v7615_v21  ;;  %3898 = vmatprep.subr.bf16.mxu1 %v5755_v50  ;;  %v5723_v50 = vcombine.high %v1687_v59, %v1691_v38  ;;  %v6428_v59 = vld [vmem:[#allocation4 + $0xa8] sm:$0xff]   ;;  %v6431_v38 = vld [vmem:[#allocation4 + $0xe0] sm:$0xff]  }
 0x2aa   : > { %3855 = vmatprep.mubr.bf16.mxu0 %v7676_v63  ;;  %4010 = vmatpush2.bf16.msra.mxu0 %v5890_v22  ;;  %v5858_v22 = vcombine.low %v1823_v25, %v1827_v20  ;;  %v6414_v20 = vld [vmem:[#allocation4 + $0x28] sm:$0xff]  }
 0x2ab   : > { %4011 = vmatprep.subr.bf16.mxu0 %v5883_v27  ;;  %v7801_v27 = vpop.f32.mrf.mxu1 }
 0x2ac   : > { %3899 = vmatpush2.bf16.msra.mxu1 %v5754_v40  ;;  %v7804_v40 = vpop.f32.mrf.mxu0 }
 0x2ad   : > { %3900 = vmatprep.subr.bf16.mxu1 %v5747_v13  ;;  %v7807_v13 = vpop.f32.mrf.mxu1 }
 0x2ae   : > { %4012 = vmatpush2.bf16.msra.mxu0 %v5882_v51  ;;  %v7809_v51 = vpop.f32.mrf.mxu0 }
 0x2af   : > { %3743 = vmatmul.mubr.bf16.gmra.mxu1 %v7663_v30  ;;  %4013 = vmatprep.subr.bf16.mxu0 %v5875_v18 }
 0x2b0   : > { %3901 = vmatpush2.bf16.msra.mxu1 %v5746_v48  ;;  %3752 = vmatprep.mubr.bf16.mxu1 %v7719_v43  ;;  %v7813_v18 = vpop.f32.mrf.mxu0  ;;  %v6411_v48 = vld [vmem:[#allocation4 + $0x70] sm:$0xff]  }
 0x2b1   : > { %3856 = vmatmul.mubr.bf16.gmra.mxu0 %v7682_v54  ;;  %3902 = vmatprep.subr.bf16.mxu1 %v5739_v7  ;;  %v6423_v7 = vld [vmem:[#allocation4 + $0xf0] sm:$0xff]  }
 0x2b2   : > { %3865 = vmatprep.mubr.bf16.mxu0 %v7724_v62  ;;  %4014 = vmatpush2.bf16.msra.mxu0 %v5874_v14  ;;  %v6412_v14 = vld [vmem:[#allocation4 + $0x30] sm:$0xff]  }
 0x2b3   : > { %4015 = vmatprep.subr.bf16.mxu0 %v5867_v32  ;;  %v6413_v32 = vld [vmem:[#allocation4 + $0x68] sm:$0xff]  }
 0x2b4   : > { %3903 = vmatpush2.bf16.msra.mxu1 %v5738_v45 }
 0x2b5   : > { %3904 = vmatprep.subr.bf16.mxu1 %v5731_v55 }
 0x2b6   : > { %4016 = vmatpush2.bf16.msra.mxu0 %v5866_v23  ;;  %v6415_v23 = vld [vmem:[#allocation4 + $0x60] sm:$0xff]  }
 0x2b7   : > { %3753 = vmatmul.mubr.bf16.gmra.mxu1 %v7722_v47  ;;  %4017 = vmatprep.subr.bf16.mxu0 %v5859_v34 }
 0x2b8   : > { %3905 = vmatpush2.bf16.msra.mxu1 %v5730_v5  ;;  %3908 = vmatprep.mubr.bf16.mxu1 %v7352_v9  ;;  %v7811_v9 = vpop.f32.mrf.mxu1  ;;  %v6416_v5 = vld [vmem:[#allocation4 + $0x20] sm:$0xff]  }
 0x2b9   : > { %3866 = vmatmul.mubr.bf16.gmra.mxu0 %v7728_v4  ;;  %3906 = vmatprep.subr.bf16.mxu1 %v5723_v50 }
 0x2ba   : > { %4018 = vmatpush2.bf16.msra.mxu0 %v5858_v22  ;;  %4021 = vmatprep.mubr.bf16.mxu0 %v7357_v44  ;;  %v7815_v0 = vpop.f32.mrf.mxu1  ;;  %v7818_v44 = vpop.f32.mrf.mxu0  ;;  %v6433_v22 = vld [vmem:[#allocation4 + $0xd8] sm:$0xff]  }
 0x2bb   : > { %4019 = vmatprep.subr.bf16.mxu0 %v5851_v35 }
 0x2bc   : > { %3907 = vmatpush2.bf16.msra.mxu1 %v5722_v57  ;;  %v7822_v53 = vpop.f32.mrf.mxu1  ;;  %v7824_v60 = vpop.f32.mrf.mxu0 }
 0x2bd   : > { %5975 = vmatprep.subr.bf16.mxu1 %v6409_v31 }
 0x2be   : > { %4020 = vmatpush2.bf16.msra.mxu0 %v5850_v17  ;;  %v7827_v45 = vpop.f32.mrf.mxu1  ;;  %v7829_v25 = vpop.f32.mrf.mxu0  ;;  %v6434_v17 = vld [vmem:[#allocation4 + $0x98] sm:$0xff]  }
 0x2bf   : > { %3909 = vmatmul.mubr.bf16.vlgmr.msra.gmra.mxu1 %v8873_v16  ;;  %6039 = vmatprep.subr.bf16.mxu0 %v6419_v3  ;;  %v6424_v16 = vld [vmem:[#allocation4 + $0xb0] sm:$0xff]  }
 0x2c0   : > { %3918 = vmatprep.mubr.bf16.mxu1 %v7385_v11  ;;  %5976 = vmatpush3.bf16.msra.mxu1 %v6410_v2  ;;  %v6427_v11 = vld [vmem:[#allocation4 + $0xe8] sm:$0xff]   ;;  %v7831_v55 = vpop.f32.mrf.mxu1  ;;  %v6435_v3 = vld [vmem:[#allocation4 + $0xd0] sm:$0xff]  }
 0x2c1   : > { %4022 = vmatmul.mubr.bf16.vlgmr.msra.gmra.mxu0 %v8874_v33  ;;  %5977 = vmatprep.subr.bf16.mxu1 %v6411_v48  ;;  %v7833_v33 = vpop.f32.mrf.mxu0  ;;  %v6422_v48 = vld [vmem:[#allocation4 + $0x10] sm:$0xff]  }
 0x2c2   : > { %4031 = vmatprep.mubr.bf16.mxu0 %v7396_v12  ;;  %6040 = vmatpush3.bf16.msra.mxu0 %v6420_v28  ;;  %v7836_v12 = vpop.f32.mrf.mxu1  ;;  %v6425_v28 = vld [vmem:[#allocation4 + $0x48] sm:$0xff]  }
 0x2c3   : > { %6041 = vmatprep.subr.bf16.mxu0 %v6423_v7  ;;  %v7839_v34 = vpop.f32.mrf.mxu0 }
 0x2c4   : > { %5978 = vmatpush3.bf16.msra.mxu1 %v6412_v14  ;;  %v7842_v49 = vpop.f32.mrf.mxu1 }
 0x2c5   : > { %5979 = vmatprep.subr.bf16.mxu1 %v6413_v32  ;;  %v7847_v35 = vpop.f32.mrf.mxu0  ;;  %v6437_v32 = vld [vmem:[#allocation4 + $0xc8] sm:$0xff]  }
 0x2c6   : > { %6042 = vmatpush3.bf16.msra.mxu0 %v6424_v16  ;;  %v7845_v50 = vpop.f32.mrf.mxu1 }
 0x2c7   : > { %3919 = vmatmul.mubr.bf16.gmra.mxu1 %v7392_v58  ;;  %6043 = vmatprep.subr.bf16.mxu0 %v6427_v11  ;;  %v6432_v58 = vld [vmem:[#allocation4 + $0xa0] sm:$0xff]   ;;  %v7851_v31 = vpop.f32.mrf.mxu0 }
 0x2c8   : > { %3928 = vmatprep.mubr.bf16.mxu1 %v7437_v6  ;;  %5980 = vmatpush3.bf16.msra.mxu1 %v6414_v20  ;;  %v6418_v6 = vld [vmem:[#allocation4 + $0x18] sm:$0xff]   ;;  %v7849_v57 = vpop.f32.mrf.mxu1 }
 0x2c9   : > { %4032 = vmatmul.mubr.bf16.gmra.mxu0 %v7394_v8  ;;  %5981 = vmatprep.subr.bf16.mxu1 %v6415_v23  ;;  %v6421_v8 = vld [vmem:[#allocation4 + $0x50] sm:$0xff]   ;;  %v7857_v2 = vpop.f32.mrf.mxu0 }
 0x2ca   : > { %4041 = vmatprep.mubr.bf16.mxu0 %v7459_v52  ;;  %6044 = vmatpush3.bf16.msra.mxu0 %v6428_v59  ;;  %v7854_v52 = vpop.f32.mrf.mxu1  ;;  %v6439_v59 = vld [vmem:[#allocation4 + $0xc0] sm:$0xff]  }
 0x2cb   : > { %6045 = vmatprep.subr.bf16.mxu0 %v6431_v38  ;;  %v7861_v7 = vpop.f32.mrf.mxu0 }
 0x2cc   : > { %5982 = vmatpush3.bf16.msra.mxu1 %v6416_v5  ;;  %v7863_v14 = vpop.f32.mrf.mxu1  ;;  %v6430_v5 = vld [vmem:[#allocation4] sm:$0xff]  }
 0x2cd   : > { %5983 = vmatprep.subr.bf16.mxu1 %v6417_v26  ;;  %v7865_v16 = vpop.f32.mrf.mxu0  ;;  %v7880_v26 = vld [vmem:[%s8690_s6] sm:$0xff] }
 0x2ce   : > { %6046 = vmatpush3.bf16.msra.mxu0 %v6432_v58  ;;  %v7867_v11 = vpop.f32.mrf.mxu1 }
 0x2cf   : > { %3929 = vmatmul.mubr.bf16.gmra.mxu1 %v7445_v1  ;;  %6047 = vmatprep.subr.bf16.mxu0 %v6433_v22  ;;  %v6436_v1 = vld [vmem:[#allocation4 + $0x90] sm:$0xff]   ;;  %v7869_v20 = vpop.f32.mrf.mxu0 }
 0x2d0   : > { %3938 = vmatprep.mubr.bf16.mxu1 %v7500_v39  ;;  %5984 = vmatpush3.bf16.msra.mxu1 %v6418_v6  ;;  %v6426_v39 = vld [vmem:[#allocation4 + $0x8] sm:$0xff]   ;;  %v7872_v23 = vpop.f32.mrf.mxu1  ;;  %v8875_v6 = vld [vmem:[#allocation10_spill] sm:$0xff] }
 0x2d1   : > { %4042 = vmatmul.mubr.bf16.gmra.mxu0 %v7447_v10  ;;  %5985 = vmatprep.subr.bf16.mxu1 %v6421_v8  ;;  %v6429_v10 = vld [vmem:[#allocation4 + $0x40] sm:$0xff]   ;;  %v7875_v38 = vpop.f32.mrf.mxu0  ;;  %v7890_v8 = vrot.slane %v7880_v26, %v8875_v6 }
 0x2d2   : > { %4051 = vmatprep.mubr.bf16.mxu0 %v7504_v46  ;;  %6048 = vmatpush3.bf16.msra.mxu0 %v6434_v17  ;;  %v6438_v46 = vld [vmem:[#allocation4 + $0x88] sm:$0xff]   ;;  %v7883_v58 = vpop.f32.mrf.mxu1 }
 0x2d3   : > { %6049 = vmatprep.subr.bf16.mxu0 %v6435_v3  ;;  %v7886_v22 = vpop.f32.mrf.mxu0 }
 0x2d4   : > { %5986 = vmatpush3.bf16.msra.mxu1 %v6422_v48  ;;  %v3233_v48 = vadd.f32 %v7801_v27, %v7890_v8 }
 0x2d5   : > { %5987 = vmatprep.subr.bf16.mxu1 %v6425_v28  ;;  %v8876_v28 = vld [vmem:[#allocation9_spill] sm:$0xff] }
 0x2d6   : > { %6050 = vmatpush3.bf16.msra.mxu0 %v6436_v1  ;;  %v7905_v1 = vrot.slane %v7880_v26, %v8876_v28 }
 0x2d7   : > { %3939 = vmatmul.mubr.bf16.gmra.mxu1 %v7491_v36  ;;  %6051 = vmatprep.subr.bf16.mxu0 %v6437_v32  ;;  %v6441_v36 = vld [vmem:[#allocation4 + $0x178] sm:$0xff]   ;;  %v7892_v17 = vpop.f32.mrf.mxu1 }
 0x2d8   : > { %3948 = vmatprep.mubr.bf16.mxu1 %v7548_v41  ;;  %5988 = vmatpush3.bf16.msra.mxu1 %v6426_v39  ;;  %v6440_v41 = vld [vmem:[#allocation4 + $0x80] sm:$0xff]   ;;  %v7894_v3 = vpop.f32.mrf.mxu0  ;;  %v3237_v39 = vadd.f32 %v7811_v9, %v7890_v8  ;;  %v3243_v9 = vadd.f32 %v7822_v53, %v7890_v8 }
 0x2d9   : > { %4052 = vmatmul.mubr.bf16.gmra.mxu0 %v7507_v37  ;;  %5989 = vmatprep.subr.bf16.mxu1 %v6429_v10  ;;  %v7896_v37 = vpop.f32.mrf.mxu1 }
 0x2da   : > { %4061 = vmatprep.mubr.bf16.mxu0 %v7550_v42  ;;  %6052 = vmatpush3.bf16.msra.mxu0 %v6438_v46  ;;  %v7899_v42 = vpop.f32.mrf.mxu0 }
 0x2db   : > { %6053 = vmatprep.subr.bf16.mxu0 %v6439_v59  ;;  %v7908_v32 = vpop.f32.mrf.mxu1  ;;  %v3235_v59 = vadd.f32 %v7807_v13, %v7905_v1  ;;  %v7939_v13 = vld [vmem:[#allocation4 + $0x1f8] sm:$0xff]  }
 0x2dc   : > { %5990 = vmatpush3.bf16.msra.mxu1 %v6430_v5  ;;  %v7913_v10 = vpop.f32.mrf.mxu0  ;;  %8877 = vst [vmem:[#allocation11_spill] sm:$0xff] %v7939_v13 }
 0x2dd   : > { %6103 = vmatprep.subr.bf16.mxu1 %v6441_v36  ;;  %v7918_v27 = vpop.f32.mrf.mxu1 }
 0x2de   : > { %6054 = vmatpush3.bf16.msra.mxu0 %v6440_v41  ;;  %v7920_v46 = vpop.f32.mrf.mxu0 }
 0x2df   : > { %3949 = vmatmul.mubr.bf16.gmra.mxu1 %v7546_v61  ;;  %v3239_v61 = vadd.f32 %v7815_v0, %v7905_v1  ;;  %v3245_v0 = vadd.f32 %v7827_v45, %v7905_v1  ;;  %6167 = vmatprep.subr.bf16.mxu0 %v7939_v13 }
 0x2e0   : > { %3958 = vmatprep.mubr.bf16.mxu1 %v7601_v56  ;;  %v3346_v56 = vadd.f32 %v7804_v40, %v3233_v48  ;;  %v3247_v40 = vadd.f32 %v7831_v55, %v7890_v8  ;;  %v3356_v48 = vadd.f32 %v7824_v60, %v3243_v9  ;;  %v3253_v60 = vadd.f32 %v7842_v49, %v7890_v8 }
 0x2e1   : > { %4062 = vmatmul.mubr.bf16.gmra.mxu0 %v7556_v24  ;;  %v3350_v24 = vadd.f32 %v7813_v18, %v3237_v39  ;;  %v7930_v36 = vpop.f32.mrf.mxu0  ;;  %v3249_v18 = vadd.f32 %v7836_v12, %v7905_v1  ;;  %v3358_v28 = vadd.f32 %v7829_v25, %v3245_v0 }
 0x2e2   : > { %4071 = vmatprep.mubr.bf16.mxu0 %v7606_v15  ;;  %v7925_v5 = vpop.f32.mrf.mxu1  ;;  %v3352_v15 = vadd.f32 %v7818_v44, %v3239_v61  ;;  %v4230_v6 = vmul.f32 0.01, %v3346_v56  ;;  %v3348_v44 = vadd.f32 %v7809_v51, %v3235_v59  ;;  %vm4102_vm0 = vcmp.gt.f32.partialorder %v3346_v56, 0.0 }
 0x2e3   : > { %v7944_v53 = vpop.f32.mrf.mxu0  ;;  %v4238_v55 = vmul.f32 0.01, %v3350_v24  ;;  %vm4110_vm1 = vcmp.gt.f32.partialorder %v3350_v24, 0.0  ;;  %v3360_v51 = vadd.f32 %v7833_v33, %v3247_v40  ;;  %v3362_v39 = vadd.f32 %v7839_v34, %v3249_v18 }
 0x2e4   : > { %v7937_v41 = vpop.f32.mrf.mxu1  ;;  %vm4111_vm2 = vcmp.gt.f32.partialorder %v3352_v15, 0.0  ;;  %v7971_v25 = vsel %vm4102_vm0, %v3346_v56, %v4230_v6  ;;  %vm4103_vm3 = vcmp.gt.f32.partialorder %v3348_v44, 0.0  ;;  %v3259_v33 = vadd.f32 %v7854_v52, %v7905_v1 }
 0x2e5   : > { %v7953_v12 = vpop.f32.mrf.mxu0  ;;  %v4231_v34 = vmul.f32 0.01, %v3348_v44  ;;  %v7978_v49 = vsel %vm4110_vm1, %v3350_v24, %v4238_v55  ;;  %vm4118_vm4 = vcmp.gt.f32.partialorder %v3356_v48, 0.0  ;;  %v4246_v0 = vmul.f32 0.01, %v3356_v48 }
 0x2e6   : > { %v7948_v45 = vpop.f32.mrf.mxu1  ;;  %vm4119_vm5 = vcmp.gt.f32.partialorder %v3358_v28, 0.0  ;;  %v4247_v18 = vmul.f32 0.01, %v3358_v28  ;;  %vm4126_vm6 = vcmp.gt.f32.partialorder %v3360_v51, 0.0  ;;  %v4254_v6 = vmul.f32 0.01, %v3360_v51 }
 0x2e7   : > { %3959 = vmatmul.mubr.bf16.gmra.mxu1 %v7604_v29  ;;  %v4239_v29 = vmul.f32 0.01, %v3352_v15  ;;  %v7963_v61 = vpop.f32.mrf.mxu0  ;;  %v3255_v52 = vadd.f32 %v7845_v50, %v7905_v1  ;;  %vm4127_vm7 = vcmp.gt.f32.partialorder %v3362_v39, 0.0  ;;  %v3263_v50 = vadd.f32 %v7863_v14, %v7890_v8 }
 0x2e8   : > { %3968 = vmatprep.mubr.bf16.mxu1 %v7657_v19  ;;  %v7958_v19 = vpop.f32.mrf.mxu1  ;;  %v8018_v14 = vsel %vm4119_vm5, %v3358_v28, %v4247_v18 }
 0x2e9   : > { %4072 = vmatmul.mubr.bf16.gmra.mxu0 %v7615_v21  ;;  %v8878_v21 = vld [vmem:[#allocation8_spill] sm:$0xff]  ;;  %v4367_v56 = vsel %vm4111_vm2, %v3352_v15, %v4239_v29  ;;  %v3267_v15 = vadd.f32 %v7872_v23, %v7890_v8  ;;  %v3376_v28 = vadd.f32 %v7865_v16, %v3263_v50 }
 0x2ea   : > { %4081 = vmatprep.mubr.bf16.mxu0 %v7676_v63  ;;  %v8879_v59 = vsub.s32 2, %v8878_v21  ;;  %v3257_v63 = vadd.f32 %v7849_v57, %v7890_v8  ;;  %v3366_v57 = vadd.f32 %v7847_v35, %v3253_v60  ;;  %v4486_v35 = vpack.c.bf16 %v7978_v49, %v7971_v25  ;;  %v6445_v25 = vld [vmem:[#allocation4 + $0x168] sm:$0xff]  }
 0x2eb   : > { %v3265_v60 = vadd.f32 %v7867_v11, %v7905_v1  ;;  %v4278_v50 = vmul.f32 0.01, %v3376_v28  ;;  %vm4150_vm13 = vcmp.gt.f32.partialorder %v3376_v28, 0.0 }
 0x2ec   : > { %v7968_v9 = vrot.slane %v7880_v26, %v8879_v59  ;;  %v4255_v59 = vmul.f32 0.01, %v3362_v39  ;;  %v3370_v55 = vadd.f32 %v7857_v2, %v3257_v63  ;;  %v4359_v2 = vsel %vm4103_vm3, %v3348_v44, %v4231_v34 }
 0x2ed   : > { %v7980_v40 = vpop.f32.mrf.mxu1  ;;  %v8021_v63 = vsel %vm4126_vm6, %v3360_v51, %v4254_v6  ;;  %v4262_v44 = vmul.f32 0.01, %v3366_v57  ;;  %vm4134_vm8 = vcmp.gt.f32.partialorder %v3366_v57, 0.0  ;;  %v3269_v51 = vadd.f32 %v7883_v58, %v7905_v1 }
 0x2ee   : > { %8880 = vst [vmem:[#allocation12_spill] sm:$0xff] %v7980_v40  ;;  %v7986_v13 = vpop.f32.mrf.mxu0  ;;  %v3372_v40 = vadd.f32 %v7861_v7, %v3259_v33  ;;  %v8881_v7 = vsub.s32 3, %v8878_v21  ;;  %v3368_v33 = vadd.f32 %v7851_v31, %v3255_v52  ;;  %v4270_v11 = vmul.f32 0.01, %v3370_v55 }
 0x2ef   : > { %3969 = vmatmul.mubr.bf16.gmra.mxu1 %v7663_v30  ;;  %v7989_v24 = vpop.f32.mrf.mxu1  ;;  %vm4142_vm9 = vcmp.gt.f32.partialorder %v3370_v55, 0.0  ;;  %v8044_v6 = vsel %vm4134_vm8, %v3366_v57, %v4262_v44  ;;  %v3279_v58 = vadd.f32 %v7918_v27, %v7905_v1  ;;  %v3382_v27 = vadd.f32 %v7886_v22, %v3269_v51  ;;  %v6442_v44 = vld [vmem:[#allocation4 + $0x138] sm:$0xff]  }
 0x2f0   : > { %3978 = vmatprep.mubr.bf16.mxu1 %v7719_v43  ;;  %v8001_v30 = vpop.f32.mrf.mxu0  ;;  %v8009_v23 = vrot.slane %v7880_v26, %v8881_v7  ;;  %v8012_v43 = vsel %vm4118_vm4, %v3356_v48, %v4246_v0  ;;  %v8029_v48 = vsel %vm4127_vm7, %v3362_v39, %v4255_v59  ;;  %v3380_v0 = vadd.f32 %v7875_v38, %v3267_v15 }
 0x2f1   : > { %4082 = vmatmul.mubr.bf16.gmra.mxu0 %v7682_v54  ;;  %v8003_v29 = vpop.f32.mrf.mxu1  ;;  %v4487_v54 = vpack.c.bf16 %v4367_v56, %v4359_v2  ;;  %vm4143_vm10 = vcmp.gt.f32.partialorder %v3372_v40, 0.0  ;;  %v4494_v18 = vpack.c.bf16 %v8021_v63, %v8012_v43  ;;  %v3378_v39 = vadd.f32 %v7869_v20, %v3265_v60 }
 0x2f2   : > { %4091 = vmatprep.mubr.bf16.mxu0 %v7724_v62  ;;  %v8024_v26 = vpop.f32.mrf.mxu0  ;;  %v4271_v62 = vmul.f32 0.01, %v3372_v40  ;;  %v3277_v56 = vadd.f32 %v7908_v32, %v7890_v8  ;;  %v4495_v38 = vpack.c.bf16 %v8029_v48, %v8018_v14  ;;  %vm4135_vm11 = vcmp.gt.f32.partialorder %v3368_v33, 0.0 }
 0x2f3   : > { %v8026_v34 = vpop.f32.mrf.mxu1  ;;  %v4263_v16 = vmul.f32 0.01, %v3368_v33  ;;  %v8051_v52 = vsel %vm4142_vm9, %v3370_v55, %v4270_v11  ;;  %v4286_v20 = vmul.f32 0.01, %v3380_v0  ;;  %v3273_v32 = vadd.f32 %v7892_v17, %v7890_v8 }
 0x2f4   : > { %v8035_v31 = vpop.f32.mrf.mxu0  ;;  %v8058_v57 = vsel %vm4143_vm10, %v3372_v40, %v4271_v62  ;;  %vm4158_vm12 = vcmp.gt.f32.partialorder %v3380_v0, 0.0  ;;  %v3275_v2 = vadd.f32 %v7896_v37, %v7905_v1  ;;  %v4279_v55 = vmul.f32 0.01, %v3378_v39 }
 0x2f5   : > { %v3390_v17 = vadd.f32 %v7913_v10, %v3277_v56  ;;  %v3287_v7 = vadd.f32 %v7948_v45, %v7890_v8  ;;  %vm4151_vm14 = vcmp.gt.f32.partialorder %v3378_v39, 0.0  ;;  %v3392_v60 = vadd.f32 %v7920_v46, %v3279_v58 }
 0x2f6   : > { %v3283_v22 = vadd.f32 %v7925_v5, %v7890_v8  ;;  %v8082_v10 = vsel %vm4158_vm12, %v3380_v0, %v4286_v20  ;;  %v3386_v45 = vadd.f32 %v7894_v3, %v3273_v32  ;;  %v3285_v14 = vadd.f32 %v7937_v41, %v7905_v1  ;;  %v6443_v0 = vld [vmem:[#allocation4 + $0x170] sm:$0xff]  }
 0x2f7   : > { %v8048_v59 = vpop.f32.mrf.mxu1  ;;  %3979 = vmatmul.mubr.bf16.gmra.mxu1 %v7722_v47  ;;  %v8090_v5 = vsel %vm4150_vm13, %v3376_v28, %v4278_v50  ;;  %v4287_v48 = vmul.f32 0.01, %v3382_v27  ;;  %vm4159_vm15 = vcmp.gt.f32.partialorder %v3382_v27, 0.0  ;;  %v4302_v3 = vmul.f32 0.01, %v3390_v17  ;;  %v6444_v32 = vld [vmem:[#allocation4 + $0x130] sm:$0xff]  }
 0x2f8   : > { %5101 = vmatprep.mubr.bf16.mxu1 %v4487_v54  ;;  %v3400_v51 = vadd.f32 %v7953_v12, %v3287_v7  ;;  %v8101_v56 = vsel %vm4151_vm14, %v3378_v39, %v4279_v55  ;;  %vm4174_vm0 = vcmp.gt.f32.partialorder %v3390_v17, 0.0  ;;  %vm4166_vm1 = vcmp.gt.f32.partialorder %v3386_v45, 0.0 }
 0x2f9   : > { %v8055_v15 = vpop.f32.mrf.mxu0  ;;  %4092 = vmatmul.mubr.bf16.gmra.mxu0 %v7728_v4  ;;  %v8064_v47 = vpop.f32.mrf.mxu1  ;;  %v8077_v4 = vsel %vm4135_vm11, %v3368_v33, %v4263_v16  ;;  %v3388_v33 = vadd.f32 %v7899_v42, %v3275_v2  ;;  %v4303_v42 = vmul.f32 0.01, %v3392_v60  ;;  %v3396_v16 = vadd.f32 %v7930_v36, %v3283_v22 }
 0x2fa   : > { %vm4175_vm2 = vcmp.gt.f32.partialorder %v3392_v60, 0.0  ;;  %v3398_v12 = vadd.f32 %v7944_v53, %v3285_v14  ;;  %v3289_v39 = vadd.f32 %v7958_v19, %v7905_v1  ;;  %v4294_v50 = vmul.f32 0.01, %v3386_v45 }
 0x2fb   : > { %v8069_v40 = vpop.f32.mrf.mxu0  ;;  %v8074_v37 = vpop.f32.mrf.mxu1  ;;  %vm4167_vm3 = vcmp.gt.f32.partialorder %v3388_v33, 0.0  ;;  %v4295_v2 = vmul.f32 0.01, %v3388_v33  ;;  %v8113_v55 = vsel %vm4159_vm15, %v3382_v27, %v4287_v48  ;;  %v8116_v49 = vsel %vm4174_vm0, %v3390_v17, %v4302_v3  ;;  %v8882_v48 = vld [vmem:[#allocation12_spill] sm:$0xff] }
 0x2fc   : > { %v4318_v53 = vmul.f32 0.01, %v3400_v51  ;;  %vm4182_vm4 = vcmp.gt.f32.partialorder %v3396_v16, 0.0  ;;  %v4310_v7 = vmul.f32 0.01, %v3396_v16  ;;  %vm4190_vm5 = vcmp.gt.f32.partialorder %v3400_v51, 0.0 }
 0x2fd   : > { %v8087_v46 = vpop.f32.mrf.mxu0  ;;  %v8093_v11 = vpop.f32.mrf.mxu1  ;;  %v8121_v14 = vsel %vm4175_vm2, %v3392_v60, %v4303_v42  ;;  %v4311_v27 = vmul.f32 0.01, %v3398_v12  ;;  %v3293_v17 = vadd.f32 %v8882_v48, %v7890_v8  ;;  %vm4183_vm6 = vcmp.gt.f32.partialorder %v3398_v12, 0.0 }
 0x2fe   : > { %v8133_v42 = vsel %vm4167_vm3, %v3388_v33, %v4295_v2  ;;  %v3295_v63 = vadd.f32 %v7989_v24, %v7905_v1 }
 0x2ff   : > { %v8098_v41 = vpop.f32.mrf.mxu0  ;;  %v3458_v58 = vpop.f32.mrf.mxu1  ;;  %5102 = vmatmul.mubr.bf16.vlgmr.msra.gmra.mxu1 %v4486_v35 }
 0x300   : > { %5109 = vmatprep.mubr.bf16.mxu1 %v4495_v38  ;;  %6104 = vmatpush3.bf16.msra.mxu1 %v6442_v44  ;;  %v3459_v35 = vadd.f32 %v3458_v58, %v7968_v9  ;;  %v3402_v44 = vadd.f32 %v7963_v61, %v3289_v39  ;;  %v6446_v58 = vld [vmem:[#allocation4 + $0x128] sm:$0xff]   ;;  %v6447_v61 = vld [vmem:[#allocation4 + $0x160] sm:$0xff]   ;;  %v8136_v39 = vsel %vm4190_vm5, %v3400_v51, %v4318_v53 }
 0x301   : > { %v3571_v20 = vpop.f32.mrf.mxu0  ;;  %v3460_v36 = vpop.f32.mrf.mxu1  ;;  %6105 = vmatprep.subr.bf16.mxu1 %v6443_v0 }
 0x302   : > { %v3461_v19 = vadd.f32 %v3460_v36, %v8009_v23  ;;  %v8128_v36 = vsel %vm4166_vm1, %v3386_v45, %v4294_v50  ;;  %v8141_v50 = vsel %vm4182_vm4, %v3396_v16, %v4310_v7  ;;  %vm4191_vm7 = vcmp.gt.f32.partialorder %v3402_v44, 0.0 }
 0x303   : > { %v3573_v38 = vpop.f32.mrf.mxu0  ;;  %v3462_v22 = vpop.f32.mrf.mxu1  ;;  %v4319_v51 = vmul.f32 0.01, %v3402_v44  ;;  %v8154_v16 = vsel %vm4183_vm6, %v3398_v12, %v4311_v27 }
 0x304   : > { %v3463_v0 = vadd.f32 %v3462_v22, %v7968_v9  ;;  %6106 = vmatpush3.bf16.msra.mxu1 %v6444_v32  ;;  %v3572_v22 = vadd.f32 %v3571_v20, %v3459_v35  ;;  %v3574_v48 = vadd.f32 %v3573_v38, %v3461_v19  ;;  %v3406_v20 = vadd.f32 %v7986_v13, %v3293_v17  ;;  %v6449_v13 = vld [vmem:[#allocation4 + $0x158] sm:$0xff]  }
 0x305   : > { %v3575_v3 = vpop.f32.mrf.mxu0  ;;  %v3464_v28 = vpop.f32.mrf.mxu1  ;;  %6107 = vmatprep.subr.bf16.mxu1 %v6445_v25  ;;  %v8883_v25 = vpack.c.bf16 %v8058_v57, %v8077_v4 }
 0x306   : > { %v3576_v32 = vadd.f32 %v3575_v3, %v3463_v0  ;;  %v3465_v60 = vadd.f32 %v3464_v28, %v8009_v23  ;;  %v6448_v28 = vld [vmem:[#allocation4 + $0x120] sm:$0xff]   ;;  %v4232_v19 = vmul.f32 0.01, %v3572_v22  ;;  %v4233_v38 = vmul.f32 0.01, %v3574_v48  ;;  %v6450_v3 = vld [vmem:[#allocation4 + $0x118] sm:$0xff]  }
 0x307   : > { %v3577_v54 = vpop.f32.mrf.mxu0  ;;  %v3468_v62 = vpop.f32.mrf.mxu1  ;;  %5110 = vmatmul.mubr.bf16.gmra.mxu1 %v4494_v18  ;;  %vm4105_vm9 = vcmp.gt.f32.partialorder %v3574_v48, 0.0  ;;  %v4326_v17 = vmul.f32 0.01, %v3406_v20  ;;  %vm4104_vm11 = vcmp.gt.f32.partialorder %v3572_v22, 0.0  ;;  %v8164_v0 = vsel %vm4191_vm7, %v3402_v44, %v4319_v51 }
 0x308   : > { %5117 = vmatprep.mubr.bf16.mxu1 %v8883_v25  ;;  %6108 = vmatpush3.bf16.msra.mxu1 %v6446_v58  ;;  %v4240_v18 = vmul.f32 0.01, %v3576_v32  ;;  %v3578_v53 = vadd.f32 %v3577_v54, %v3465_v60  ;;  %vm4112_vm8 = vcmp.gt.f32.partialorder %v3576_v32, 0.0  ;;  %v3469_v7 = vadd.f32 %v3468_v62, %v7968_v9  ;;  %v6451_v62 = vld [vmem:[#allocation4 + $0x150] sm:$0xff]  }
 0x309   : > { %v3581_v2 = vpop.f32.mrf.mxu0  ;;  %v3470_v35 = vpop.f32.mrf.mxu1  ;;  %6109 = vmatprep.subr.bf16.mxu1 %v6447_v61  ;;  %vm4198_vm12 = vcmp.gt.f32.partialorder %v3406_v20, 0.0  ;;  %v3297_v58 = vadd.f32 %v8003_v29, %v7890_v8  ;;  %v4361_v44 = vsel %vm4105_vm9, %v3574_v48, %v4233_v38  ;;  %v4360_v51 = vsel %vm4104_vm11, %v3572_v22, %v4232_v19  ;;  %v8188_v19 = vld [vmem:[#allocation4 + $0x1f0] sm:$0xff]  }
 0x30a   : > { %v3471_v57 = vadd.f32 %v3470_v35, %v8009_v23  ;;  %vm4113_vm10 = vcmp.gt.f32.partialorder %v3578_v53, 0.0  ;;  %v4241_v12 = vmul.f32 0.01, %v3578_v53  ;;  %v4368_v60 = vsel %vm4112_vm8, %v3576_v32, %v4240_v18 }
 0x30b   : > { %v3583_v4 = vpop.f32.mrf.mxu0  ;;  %v3472_v27 = vpop.f32.mrf.mxu1  ;;  %v8170_v35 = vadd.f32 %v8001_v30, %v3295_v63  ;;  %v8884_v32 = vpack.c.bf16 %v8051_v52, %v8044_v6  ;;  %v8181_v30 = vsel %vm4198_vm12, %v3406_v20, %v4326_v17  ;;  %v4488_v63 = vpack.c.bf16 %v4368_v60, %v4360_v51  ;;  %v6455_v51 = vld [vmem:[#allocation4 + $0x140] sm:$0xff]  }
 0x30c   : > { %v3473_v24 = vadd.f32 %v3472_v27, %v7968_v9  ;;  %6110 = vmatpush3.bf16.msra.mxu1 %v6448_v28  ;;  %v4369_v25 = vsel %vm4113_vm10, %v3578_v53, %v4241_v12  ;;  %v3584_v27 = vadd.f32 %v3583_v4, %v3471_v57  ;;  %v3582_v28 = vadd.f32 %v3581_v2, %v3469_v7  ;;  %v8178_v53 = vld [vmem:[#allocation4 + $0x1b8] sm:$0xff]   ;;  %v6452_v2 = vld [vmem:[#allocation4 + $0x110] sm:$0xff]   ;;  %v6453_v4 = vld [vmem:[#allocation4 + $0x148] sm:$0xff]  }
 0x30d   : > { %v3585_v54 = vpop.f32.mrf.mxu0  ;;  %v3474_v61 = vpop.f32.mrf.mxu1  ;;  %6111 = vmatprep.subr.bf16.mxu1 %v6449_v13  ;;  %v4489_v18 = vpack.c.bf16 %v4369_v25, %v4361_v44  ;;  %v8885_v48 = vpack.c.bf16 %v8113_v55, %v8101_v56  ;;  %v4527_v22 = vpack.c.bf16 %v8164_v0, %v8154_v16  ;;  %v3410_v6 = vadd.f32 %v8024_v26, %v3297_v58  ;;  %v8194_v7 = vld [vmem:[#allocation4 + $0x1b0] sm:$0xff]   ;;  %v6454_v58 = vld [vmem:[#allocation4 + $0x108] sm:$0xff]  }
 0x30e   : > { %v3586_v43 = vadd.f32 %v3585_v54, %v3473_v24  ;;  %v3475_v33 = vadd.f32 %v3474_v61, %v8009_v23  ;;  %vm4199_vm13 = vcmp.gt.f32.partialorder %v8170_v35, 0.0  ;;  %v4249_v56 = vmul.f32 0.01, %v3584_v27 }
 0x30f   : > { %v3587_v45 = vpop.f32.mrf.mxu0  ;;  %v3478_v29 = vpop.f32.mrf.mxu1  ;;  %5118 = vmatmul.mubr.bf16.gmra.mxu1 %v8884_v32  ;;  %5198 = vmatprep.mubr.bf16.mxu0 %v4489_v18  ;;  %v4248_v17 = vmul.f32 0.01, %v3582_v28  ;;  %vm4121_vm15 = vcmp.gt.f32.partialorder %v3584_v27, 0.0  ;;  %v3299_v24 = vadd.f32 %v8026_v34, %v7905_v1  ;;  %vm4120_vm1 = vcmp.gt.f32.partialorder %v3582_v28, 0.0 }
 0x310   : > { %5125 = vmatprep.mubr.bf16.mxu1 %v8885_v48  ;;  %6112 = vmatpush3.bf16.msra.mxu1 %v6450_v3  ;;  %v4256_v52 = vmul.f32 0.01, %v3586_v43  ;;  %v3588_v38 = vadd.f32 %v3587_v45, %v3475_v33  ;;  %v3479_v20 = vadd.f32 %v3478_v29, %v7968_v9  ;;  %vm4128_vm14 = vcmp.gt.f32.partialorder %v3586_v43, 0.0 }
 0x311   : > { %v3591_v13 = vpop.f32.mrf.mxu0  ;;  %v3480_v57 = vpop.f32.mrf.mxu1  ;;  %6113 = vmatprep.subr.bf16.mxu1 %v6451_v62  ;;  %5199 = vmatmul.mubr.bf16.vlgmr.msra.gmra.mxu0 %v4488_v63  ;;  %v4327_v33 = vmul.f32 0.01, %v8170_v35  ;;  %v4334_v60 = vmul.f32 0.01, %v3410_v6  ;;  %vm4206_vm2 = vcmp.gt.f32.partialorder %v3410_v6, 0.0  ;;  %v4377_v18 = vsel %vm4121_vm15, %v3584_v27, %v4249_v56  ;;  %v8205_v63 = vld [vmem:[#allocation4 + $0x1e8] sm:$0xff]  }
 0x312   : > { %v3481_v55 = vadd.f32 %v3480_v57, %v8009_v23  ;;  %vm4129_vm0 = vcmp.gt.f32.partialorder %v3588_v38, 0.0  ;;  %v4257_v26 = vmul.f32 0.01, %v3588_v38  ;;  %6168 = vmatpush3.bf16.msra.mxu0 %v8178_v53  ;;  %v4384_v61 = vsel %vm4128_vm14, %v3586_v43, %v4256_v52  ;;  %v8213_v52 = vld [vmem:[#allocation4 + $0x1a8] sm:$0xff]  }
 0x313   : > { %v3593_v12 = vpop.f32.mrf.mxu0  ;;  %v3482_v45 = vpop.f32.mrf.mxu1  ;;  %6169 = vmatprep.subr.bf16.mxu0 %v8188_v19  ;;  %v3592_v25 = vadd.f32 %v3591_v13, %v3479_v20  ;;  %v4376_v48 = vsel %vm4120_vm1, %v3582_v28, %v4248_v17  ;;  %v8886_v43 = vpack.c.bf16 %v8082_v10, %v8090_v5  ;;  %v8222_v28 = vsel %vm4199_vm13, %v8170_v35, %v4327_v33  ;;  %v6456_v10 = vld [vmem:[#allocation4 + $0x100] sm:$0xff]  }
 0x314   : > { %v3483_v54 = vadd.f32 %v3482_v45, %v7968_v9  ;;  %6114 = vmatpush3.bf16.msra.mxu1 %v6452_v2  ;;  %v4385_v44 = vsel %vm4129_vm0, %v3588_v38, %v4257_v26  ;;  %v3594_v29 = vadd.f32 %v3593_v12, %v3481_v55  ;;  %v3412_v38 = vadd.f32 %v8035_v31, %v3299_v24  ;;  %v8224_v5 = vld [vmem:[#allocation4 + $0x1e0] sm:$0xff]  }
 0x315   : > { %v3595_v3 = vpop.f32.mrf.mxu0  ;;  %v3484_v62 = vpop.f32.mrf.mxu1  ;;  %6115 = vmatprep.subr.bf16.mxu1 %v6453_v4  ;;  %v4497_v13 = vpack.c.bf16 %v4385_v44, %v4377_v18  ;;  %v4496_v20 = vpack.c.bf16 %v4384_v61, %v4376_v48  ;;  %v8887_v4 = vpack.c.bf16 %v8121_v14, %v8133_v42  ;;  %v8227_v56 = vsel %vm4206_vm2, %v3410_v6, %v4334_v60  ;;  %v8233_v33 = vld [vmem:[#allocation4 + $0x1a0] sm:$0xff]   ;;  %v8241_v60 = vld [vmem:[#allocation4 + $0x1d8] sm:$0xff]  }
 0x316   : > { %v3596_v34 = vadd.f32 %v3595_v3, %v3483_v54  ;;  %v3485_v2 = vadd.f32 %v3484_v62, %v8009_v23  ;;  %6170 = vmatpush3.bf16.msra.mxu0 %v8194_v7  ;;  %vm4136_vm3 = vcmp.gt.f32.partialorder %v3592_v25, 0.0  ;;  %v4264_v14 = vmul.f32 0.01, %v3592_v25 }
 0x317   : > { %v3597_v32 = vpop.f32.mrf.mxu0  ;;  %v3488_v57 = vpop.f32.mrf.mxu1  ;;  %5126 = vmatmul.mubr.bf16.gmra.mxu1 %v8886_v43  ;;  %5206 = vmatprep.mubr.bf16.mxu0 %v4497_v13  ;;  %v4265_v42 = vmul.f32 0.01, %v3594_v29  ;;  %vm4137_vm5 = vcmp.gt.f32.partialorder %v3594_v29, 0.0  ;;  %vm4207_vm7 = vcmp.gt.f32.partialorder %v3412_v38, 0.0  ;;  %v4335_v24 = vmul.f32 0.01, %v3412_v38 }
 0x318   : > { %5133 = vmatprep.mubr.bf16.mxu1 %v8887_v4  ;;  %6116 = vmatpush3.bf16.msra.mxu1 %v6454_v58  ;;  %v4272_v31 = vmul.f32 0.01, %v3596_v34  ;;  %v3598_v55 = vadd.f32 %v3597_v32, %v3485_v2  ;;  %vm4144_vm4 = vcmp.gt.f32.partialorder %v3596_v34, 0.0  ;;  %v3489_v6 = vadd.f32 %v3488_v57, %v7968_v9  ;;  %v8888_v32 = vld [vmem:[#allocation11_spill] sm:$0xff] }
 0x319   : > { %v3601_v27 = vpop.f32.mrf.mxu0  ;;  %v3490_v12 = vpop.f32.mrf.mxu1  ;;  %6117 = vmatprep.subr.bf16.mxu1 %v6455_v51  ;;  %5207 = vmatmul.mubr.bf16.gmra.mxu0 %v4496_v20  ;;  %v8237_v54 = vadd.f32 %v8048_v59, %v7890_v8  ;;  %v3305_v61 = vadd.f32 %v8064_v47, %v7905_v1  ;;  %v3309_v62 = vadd.f32 %v8093_v11, %v7905_v1 }
 0x31a   : > { %v3491_v35 = vadd.f32 %v3490_v12, %v8009_v23  ;;  %6171 = vmatprep.subr.bf16.mxu0 %v8205_v63  ;;  %vm4145_vm6 = vcmp.gt.f32.partialorder %v3598_v55, 0.0  ;;  %v4273_v26 = vmul.f32 0.01, %v3598_v55  ;;  %v4400_v44 = vsel %vm4144_vm4, %v3596_v34, %v4272_v31  ;;  %v8257_v34 = vld [vmem:[#allocation4 + $0x198] sm:$0xff]  }
 0x31b   : > { %v3603_v17 = vpop.f32.mrf.mxu0  ;;  %v3492_v45 = vpop.f32.mrf.mxu1  ;;  %6172 = vmatpush3.bf16.msra.mxu0 %v8213_v52  ;;  %v4392_v18 = vsel %vm4136_vm3, %v3592_v25, %v4264_v14  ;;  %v4393_v43 = vsel %vm4137_vm5, %v3594_v29, %v4265_v42  ;;  %v3602_v13 = vadd.f32 %v3601_v27, %v3489_v6  ;;  %v8889_v1 = vpack.c.bf16 %v8116_v49, %v8128_v36  ;;  %v8266_v49 = vld [vmem:[#allocation4 + $0x1d0] sm:$0xff]  }
 0x31c   : > { %v3493_v3 = vadd.f32 %v3492_v45, %v7968_v9  ;;  %6118 = vmatpush3.bf16.msra.mxu1 %v6456_v10  ;;  %6173 = vmatprep.subr.bf16.mxu0 %v8224_v5  ;;  %v4401_v59 = vsel %vm4145_vm6, %v3598_v55, %v4273_v26  ;;  %v3604_v48 = vadd.f32 %v3603_v17, %v3491_v35  ;;  %v8282_v45 = vld [vmem:[#allocation4 + $0x1c8] sm:$0xff]  }
 0x31d   : > { %v3605_v58 = vpop.f32.mrf.mxu0  ;;  %v3494_v51 = vpop.f32.mrf.mxu1  ;;  %6231 = vmatprep.subr.bf16.mxu1 %v8888_v32  ;;  %v4505_v11 = vpack.c.bf16 %v4401_v59, %v4393_v43  ;;  %v4534_v25 = vpack.c.bf16 %v8227_v56, %v8181_v30  ;;  %v4504_v4 = vpack.c.bf16 %v4400_v44, %v4392_v18  ;;  %v4463_v29 = vsel %vm4207_vm7, %v3412_v38, %v4335_v24 }
 0x31e   : > { %v3606_v2 = vadd.f32 %v3605_v58, %v3493_v3  ;;  %v3495_v47 = vadd.f32 %v3494_v51, %v8009_v23  ;;  %v3422_v36 = vadd.f32 %v8098_v41, %v3309_v62  ;;  %v8271_v14 = vadd.f32 %v8069_v40, %v3305_v61 }
 0x31f   : > { %v3607_v57 = vpop.f32.mrf.mxu0  ;;  %v3498_v20 = vpop.f32.mrf.mxu1  ;;  %5134 = vmatmul.mubr.bf16.gmra.mxu1 %v8889_v1  ;;  %6174 = vmatpush3.bf16.msra.mxu0 %v8233_v33  ;;  %v4281_v42 = vmul.f32 0.01, %v3604_v48  ;;  %v4280_v38 = vmul.f32 0.01, %v3602_v13  ;;  %vm4153_vm9 = vcmp.gt.f32.partialorder %v3604_v48, 0.0  ;;  %v3307_v17 = vadd.f32 %v8074_v37, %v7890_v8 }
 0x320   : > { %5141 = vmatprep.mubr.bf16.mxu1 %v4527_v22  ;;  %6175 = vmatprep.subr.bf16.mxu0 %v8241_v60  ;;  %v4288_v27 = vmul.f32 0.01, %v3606_v2  ;;  %v3608_v31 = vadd.f32 %v3607_v57, %v3495_v47  ;;  %v3499_v55 = vadd.f32 %v3498_v20, %v7968_v9  ;;  %vm4160_vm8 = vcmp.gt.f32.partialorder %v3606_v2, 0.0  ;;  %v8274_v22 = vld [vmem:[#allocation4 + $0x190] sm:$0xff]   ;;  %v8298_v20 = vld [vmem:[#allocation4 + $0x1c0] sm:$0xff]  }
 0x321   : > { %v3611_v10 = vpop.f32.mrf.mxu0  ;;  %5214 = vmatprep.mubr.bf16.mxu0 %v4505_v11  ;;  %v3500_v12 = vpop.f32.mrf.mxu1  ;;  %vm4152_vm11 = vcmp.gt.f32.partialorder %v3602_v13, 0.0  ;;  %v4535_v6 = vpack.c.bf16 %v4463_v29, %v8222_v28  ;;  %v4351_v24 = vmul.f32 0.01, %v3422_v36  ;;  %vm4223_vm12 = vcmp.gt.f32.partialorder %v3422_v36, 0.0 }
 0x322   : > { %5215 = vmatmul.mubr.bf16.gmra.mxu0 %v4504_v4  ;;  %v3501_v16 = vadd.f32 %v3500_v12, %v8009_v23  ;;  %vm4161_vm10 = vcmp.gt.f32.partialorder %v3608_v31, 0.0  ;;  %v4289_v41 = vmul.f32 0.01, %v3608_v31  ;;  %v4416_v3 = vsel %vm4160_vm8, %v3606_v2, %v4288_v27  ;;  %v8292_v2 = vld [vmem:[#allocation4 + $0x188] sm:$0xff]   ;;  %v8304_v12 = vld [vmem:[#allocation4 + $0x180] sm:$0xff]  }
 0x323   : > { %v3613_v0 = vpop.f32.mrf.mxu0  ;;  %v3502_v35 = vpop.f32.mrf.mxu1  ;;  %6176 = vmatpush3.bf16.msra.mxu0 %v8257_v34  ;;  %v3612_v58 = vadd.f32 %v3611_v10, %v3499_v55  ;;  %v4409_v37 = vsel %vm4153_vm9, %v3604_v48, %v4281_v42  ;;  %v4408_v59 = vsel %vm4152_vm11, %v3602_v13, %v4280_v38  ;;  %v8890_v18 = vpack.c.bf16 %v8136_v39, %v8141_v50 }
 0x324   : > { %v3503_v40 = vadd.f32 %v3502_v35, %v7968_v9  ;;  %6177 = vmatprep.subr.bf16.mxu0 %v8266_v49  ;;  %v4417_v62 = vsel %vm4161_vm10, %v3608_v31, %v4289_v41  ;;  %v3614_v44 = vadd.f32 %v3613_v0, %v3501_v16  ;;  %vm4215_vm13 = vcmp.gt.f32.partialorder %v8271_v14, 0.0 }
 0x325   : > { %v3615_v26 = vpop.f32.mrf.mxu0  ;;  %v3504_v61 = vpop.f32.mrf.mxu1  ;;  %v4513_v57 = vpack.c.bf16 %v4417_v62, %v4409_v37  ;;  %v4343_v43 = vmul.f32 0.01, %v8271_v14  ;;  %v3420_v48 = vadd.f32 %v8087_v46, %v3307_v17  ;;  %v4512_v47 = vpack.c.bf16 %v4416_v3, %v4408_v59 }
 0x326   : > { %v3616_v51 = vadd.f32 %v3615_v26, %v3503_v40  ;;  %v3505_v28 = vadd.f32 %v3504_v61, %v8009_v23  ;;  %vm4168_vm14 = vcmp.gt.f32.partialorder %v3612_v58, 0.0  ;;  %v4479_v11 = vsel %vm4223_vm12, %v3422_v36, %v4351_v24 }
 0x327   : > { %v3617_v8 = vpop.f32.mrf.mxu0  ;;  %v3508_v32 = vpop.f32.mrf.mxu1  ;;  %5142 = vmatmul.mubr.bf16.gmra.mxu1 %v8890_v18  ;;  %6178 = vmatpush3.bf16.msra.mxu0 %v8274_v22  ;;  %v4296_v4 = vmul.f32 0.01, %v3612_v58  ;;  %v4297_v10 = vmul.f32 0.01, %v3614_v44  ;;  %vm4169_vm0 = vcmp.gt.f32.partialorder %v3614_v44, 0.0  ;;  %v3416_v36 = vadd.f32 %v8055_v15, %v8237_v54 }
 0x328   : > { %5149 = vmatprep.mubr.bf16.mxu1 %v4535_v6  ;;  %6179 = vmatprep.subr.bf16.mxu0 %v8282_v45  ;;  %v4304_v39 = vmul.f32 0.01, %v3616_v51  ;;  %v3618_v50 = vadd.f32 %v3617_v8, %v3505_v28  ;;  %vm4176_vm15 = vcmp.gt.f32.partialorder %v3616_v51, 0.0  ;;  %v3509_v31 = vadd.f32 %v3508_v32, %v7968_v9 }
 0x329   : > { %v3621_v13 = vpop.f32.mrf.mxu0  ;;  %5222 = vmatprep.mubr.bf16.mxu0 %v4513_v57  ;;  %v3510_v1 = vpop.f32.mrf.mxu1  ;;  %vm4222_vm2 = vcmp.gt.f32.partialorder %v3420_v48, 0.0  ;;  %v4471_v0 = vsel %vm4215_vm13, %v8271_v14, %v4343_v43  ;;  %v4350_v38 = vmul.f32 0.01, %v3420_v48  ;;  %v4424_v26 = vsel %vm4168_vm14, %v3612_v58, %v4296_v4 }
 0x32a   : > { %5223 = vmatmul.mubr.bf16.gmra.mxu0 %v4512_v47  ;;  %v3511_v46 = vadd.f32 %v3510_v1, %v8009_v23  ;;  %vm4177_vm1 = vcmp.gt.f32.partialorder %v3618_v50, 0.0  ;;  %v4305_v27 = vmul.f32 0.01, %v3618_v50  ;;  %v4432_v41 = vsel %vm4176_vm15, %v3616_v51, %v4304_v39 }
 0x32b   : > { %v3623_v29 = vpop.f32.mrf.mxu0  ;;  %v3512_v55 = vpop.f32.mrf.mxu1  ;;  %6180 = vmatpush3.bf16.msra.mxu0 %v8292_v2  ;;  %v4543_v40 = vpack.c.bf16 %v4479_v11, %v4471_v0  ;;  %v4425_v24 = vsel %vm4169_vm0, %v3614_v44, %v4297_v10  ;;  %v3622_v3 = vadd.f32 %v3621_v13, %v3509_v31  ;;  %v4342_v51 = vmul.f32 0.01, %v3416_v36 }
 0x32c   : > { %v3513_v42 = vadd.f32 %v3512_v55, %v7968_v9  ;;  %6181 = vmatprep.subr.bf16.mxu0 %v8298_v20  ;;  %v4433_v17 = vsel %vm4177_vm1, %v3618_v50, %v4305_v27  ;;  %v3624_v6 = vadd.f32 %v3623_v29, %v3511_v46  ;;  %v4520_v8 = vpack.c.bf16 %v4432_v41, %v4424_v26 }
 0x32d   : > { %v3625_v16 = vpop.f32.mrf.mxu0  ;;  %v3514_v35 = vpop.f32.mrf.mxu1  ;;  %v4521_v14 = vpack.c.bf16 %v4433_v17, %v4425_v24  ;;  %vm4214_vm3 = vcmp.gt.f32.partialorder %v3416_v36, 0.0  ;;  %v4478_v58 = vsel %vm4222_vm2, %v3420_v48, %v4350_v38  ;;  %vm4184_vm7 = vcmp.gt.f32.partialorder %v3622_v3, 0.0 }
 0x32e   : > { %v3626_v15 = vadd.f32 %v3625_v16, %v3513_v42  ;;  %v3515_v61 = vadd.f32 %v3514_v35, %v8009_v23  ;;  %v4313_v32 = vmul.f32 0.01, %v3624_v6  ;;  %vm4185_vm5 = vcmp.gt.f32.partialorder %v3624_v6, 0.0 }
 0x32f   : > { %v3627_v54 = vpop.f32.mrf.mxu0  ;;  %v3518_v62 = vpop.f32.mrf.mxu1  ;;  %5150 = vmatmul.mubr.bf16.gmra.mxu1 %v4534_v25  ;;  %6182 = vmatpush3.bf16.msra.mxu0 %v8304_v12  ;;  %v4312_v25 = vmul.f32 0.01, %v3622_v3  ;;  %v4470_v47 = vsel %vm4214_vm3, %v3416_v36, %v4342_v51  ;;  %v1896_v17 = vsub.s32 4, %v8878_v21 }
 0x330   : > { %5157 = vmatprep.mubr.bf16.mxu1 %v4543_v40  ;;  %v4320_v59 = vmul.f32 0.01, %v3626_v15  ;;  %v3628_v44 = vadd.f32 %v3627_v54, %v3515_v61  ;;  %5230 = vmatprep.mubr.bf16.mxu0 %v4521_v14  ;;  %vm4192_vm4 = vcmp.gt.f32.partialorder %v3626_v15, 0.0  ;;  %v3519_v18 = vadd.f32 %v3518_v62, %v7968_v9 }
 0x331   : > { %v3631_v37 = vpop.f32.mrf.mxu0  ;;  %v3520_v28 = vpop.f32.mrf.mxu1  ;;  %v4542_v39 = vpack.c.bf16 %v4478_v58, %v4470_v47  ;;  %v4441_v27 = vsel %vm4185_vm5, %v3624_v6, %v4313_v32  ;;  %v4440_v31 = vsel %vm4184_vm7, %v3622_v3, %v4312_v25  ;;  %v1900_v40 = vsub.s32 5, %v8878_v21 }
 0x332   : > { %5231 = vmatmul.mubr.bf16.gmra.mxu0 %v4520_v8  ;;  %v3521_v30 = vadd.f32 %v3520_v28, %v8009_v23  ;;  %vm4193_vm6 = vcmp.gt.f32.partialorder %v3628_v44, 0.0  ;;  %v4321_v57 = vmul.f32 0.01, %v3628_v44  ;;  %v4448_v50 = vsel %vm4192_vm4, %v3626_v15, %v4320_v59 }
 0x333   : > { %v3633_v56 = vpop.f32.mrf.mxu0  ;;  %v3522_v43 = vpop.f32.mrf.mxu1  ;;  %v3632_v4 = vadd.f32 %v3631_v37, %v3519_v18  ;;  %v4528_v16 = vpack.c.bf16 %v4448_v50, %v4440_v31  ;;  %v8336_v37 = vld [vmem:[%s8690_s6] sm:$0xff] }
 0x334   : > { %v3523_v48 = vadd.f32 %v3522_v43, %v7968_v9  ;;  %v4449_v11 = vsel %vm4193_vm6, %v3628_v44, %v4321_v57  ;;  %v3634_v10 = vadd.f32 %v3633_v56, %v3521_v30  ;;  %v8339_v58 = vrot.slane %v8336_v37, %v1896_v17 }
 0x335   : > { %v3635_v13 = vpop.f32.mrf.mxu0  ;;  %v3524_v1 = vpop.f32.mrf.mxu1  ;;  %v4529_v36 = vpack.c.bf16 %v4449_v11, %v4441_v27  ;;  %v4328_v26 = vmul.f32 0.01, %v3632_v4  ;;  %vm4200_vm11 = vcmp.gt.f32.partialorder %v3632_v4, 0.0  ;;  %v8343_v30 = vrot.slane %v8336_v37, %v1900_v40 }
 0x336   : > { %v3636_v46 = vadd.f32 %v3635_v13, %v3523_v48  ;;  %v3525_v55 = vadd.f32 %v3524_v1, %v8009_v23  ;;  %v4329_v15 = vmul.f32 0.01, %v3634_v10  ;;  %vm4201_vm9 = vcmp.gt.f32.partialorder %v3634_v10, 0.0 }
 0x337   : > { %v3637_v29 = vpop.f32.mrf.mxu0  ;;  %v3528_v42 = vpop.f32.mrf.mxu1  ;;  %5158 = vmatmul.mubr.bf16.gmra.mxu1 %v4542_v39  ;;  %5238 = vmatprep.mubr.bf16.mxu0 %v4529_v36 }
 0x338   : > { %v4336_v38 = vmul.f32 0.01, %v3636_v46  ;;  %v3638_v41 = vadd.f32 %v3637_v29, %v3525_v55  ;;  %vm4208_vm8 = vcmp.gt.f32.partialorder %v3636_v46, 0.0  ;;  %v3529_v3 = vadd.f32 %v3528_v42, %v7968_v9 }
 0x339   : > { %v3641_v0 = vpop.f32.mrf.mxu0  ;;  %v3530_v35 = vpop.f32.mrf.mxu1  ;;  %v4457_v18 = vsel %vm4201_vm9, %v3634_v10, %v4329_v15 }
 0x33a   : > { %5239 = vmatmul.mubr.bf16.gmra.mxu0 %v4528_v16  ;;  %v3531_v6 = vadd.f32 %v3530_v35, %v8009_v23  ;;  %vm4209_vm10 = vcmp.gt.f32.partialorder %v3638_v41, 0.0  ;;  %v4337_v24 = vmul.f32 0.01, %v3638_v41  ;;  %v4464_v51 = vsel %vm4208_vm8, %v3636_v46, %v4336_v38 }
 0x33b   : > { %v3643_v54 = vpop.f32.mrf.mxu0  ;;  %v3532_v61 = vpop.f32.mrf.mxu1  ;;  %v3642_v56 = vadd.f32 %v3641_v0, %v3529_v3 }
 0x33c   : > { %v3533_v62 = vadd.f32 %v3532_v61, %v7968_v9  ;;  %v4465_v59 = vsel %vm4209_vm10, %v3638_v41, %v4337_v24  ;;  %v3644_v44 = vadd.f32 %v3643_v54, %v3531_v6  ;;  %v4456_v9 = vsel %vm4200_vm11, %v3632_v4, %v4328_v26 }
 0x33d   : > { %v3645_v14 = vpop.f32.mrf.mxu0  ;;  %v3534_v8 = vpop.f32.mrf.mxu1  ;;  %v4537_v43 = vpack.c.bf16 %v4465_v59, %v4457_v18  ;;  %v4536_v47 = vpack.c.bf16 %v4464_v51, %v4456_v9  ;;  %v4344_v46 = vmul.f32 0.01, %v3642_v56  ;;  %vm4216_vm15 = vcmp.gt.f32.partialorder %v3642_v56, 0.0 }
 0x33e   : > { %v3646_v28 = vadd.f32 %v3645_v14, %v3533_v62  ;;  %v3535_v25 = vadd.f32 %v3534_v8, %v8009_v23  ;;  %v4345_v1 = vmul.f32 0.01, %v3644_v44  ;;  %vm4217_vm13 = vcmp.gt.f32.partialorder %v3644_v44, 0.0 }
 0x33f   : > { %v3647_v32 = vpop.f32.mrf.mxu0  ;;  %v3684_v57 = vpop.f32.mrf.mxu1  ;;  %5246 = vmatprep.mubr.bf16.mxu0 %v4537_v43  ;;  %v4472_v35 = vsel %vm4216_vm15, %v3642_v56, %v4344_v46 }
 0x340   : > { %v4352_v48 = vmul.f32 0.01, %v3646_v28  ;;  %v3648_v13 = vadd.f32 %v3647_v32, %v3535_v25  ;;  %vm4224_vm12 = vcmp.gt.f32.partialorder %v3646_v28, 0.0  ;;  %v3685_v11 = vadd.f32 %v3684_v57, %v8339_v58 }
 0x341   : > { %v3797_v39 = vpop.f32.mrf.mxu0  ;;  %v3686_v50 = vpop.f32.mrf.mxu1  ;;  %v4473_v41 = vsel %vm4217_vm13, %v3644_v44, %v4345_v1 }
 0x342   : > { %5247 = vmatmul.mubr.bf16.gmra.mxu0 %v4536_v47  ;;  %v3687_v10 = vadd.f32 %v3686_v50, %v8343_v30  ;;  %vm4225_vm14 = vcmp.gt.f32.partialorder %v3648_v13, 0.0  ;;  %v4353_v4 = vmul.f32 0.01, %v3648_v13  ;;  %v4480_v31 = vsel %vm4224_vm12, %v3646_v28, %v4352_v48 }
 0x343   : > { %v3799_v23 = vpop.f32.mrf.mxu0  ;;  %v3688_v29 = vpop.f32.mrf.mxu1  ;;  %v3798_v16 = vadd.f32 %v3797_v39, %v3685_v11  ;;  %v4544_v6 = vpack.c.bf16 %v4480_v31, %v4472_v35 }
 0x344   : > { %v3689_v27 = vadd.f32 %v3688_v29, %v8339_v58  ;;  %v4481_v36 = vsel %vm4225_vm14, %v3648_v13, %v4353_v4  ;;  %v3800_v0 = vadd.f32 %v3799_v23, %v3687_v10 }
 0x345   : > { %v3801_v55 = vpop.f32.mrf.mxu0  ;;  %v3690_v42 = vpop.f32.mrf.mxu1  ;;  %v4545_v15 = vpack.c.bf16 %v4481_v36, %v4473_v41  ;;  %v4234_v62 = vmul.f32 0.01, %v3798_v16  ;;  %vm4106_vm3 = vcmp.gt.f32.partialorder %v3798_v16, 0.0 }
 0x346   : > { %v3802_v38 = vadd.f32 %v3801_v55, %v3689_v27  ;;  %v3691_v17 = vadd.f32 %v3690_v42, %v8343_v30  ;;  %v4235_v14 = vmul.f32 0.01, %v3800_v0  ;;  %vm4107_vm1 = vcmp.gt.f32.partialorder %v3800_v0, 0.0 }
 0x347   : > { %v3803_v40 = vpop.f32.mrf.mxu0  ;;  %v3694_v26 = vpop.f32.mrf.mxu1  ;;  %5254 = vmatprep.mubr.bf16.mxu0 %v4545_v15  ;;  %v4362_v48 = vsel %vm4106_vm3, %v3798_v16, %v4234_v62 }
 0x348   : > { %v4242_v54 = vmul.f32 0.01, %v3802_v38  ;;  %v3804_v24 = vadd.f32 %v3803_v40, %v3691_v17  ;;  %vm4114_vm0 = vcmp.gt.f32.partialorder %v3802_v38, 0.0  ;;  %v3695_v59 = vadd.f32 %v3694_v26, %v8339_v58 }
 0x349   : > { %v3807_v3 = vpop.f32.mrf.mxu0  ;;  %v3696_v61 = vpop.f32.mrf.mxu1  ;;  %v4363_v47 = vsel %vm4107_vm1, %v3800_v0, %v4235_v14 }
 0x34a   : > { %5255 = vmatmul.mubr.bf16.gmra.mxu0 %v4544_v6  ;;  %v3697_v51 = vadd.f32 %v3696_v61, %v8343_v30  ;;  %vm4115_vm2 = vcmp.gt.f32.partialorder %v3804_v24, 0.0  ;;  %v4243_v8 = vmul.f32 0.01, %v3804_v24  ;;  %v4370_v18 = vsel %vm4114_vm0, %v3802_v38, %v4242_v54 }
 0x34b   : > { %v3809_v44 = vpop.f32.mrf.mxu0  ;;  %v3698_v28 = vpop.f32.mrf.mxu1  ;;  %v3808_v13 = vadd.f32 %v3807_v3, %v3695_v59  ;;  %v4490_v10 = vpack.c.bf16 %v4370_v18, %v4362_v48 }
 0x34c   : > { %v3699_v32 = vadd.f32 %v3698_v28, %v8339_v58  ;;  %v4371_v25 = vsel %vm4115_vm2, %v3804_v24, %v4243_v8  ;;  %v3810_v57 = vadd.f32 %v3809_v44, %v3697_v51 }
 0x34d   : > { %v3811_v9 = vpop.f32.mrf.mxu0  ;;  %v3700_v56 = vpop.f32.mrf.mxu1  ;;  %v4491_v11 = vpack.c.bf16 %v4371_v25, %v4363_v47  ;;  %v4250_v42 = vmul.f32 0.01, %v3808_v13  ;;  %vm4122_vm7 = vcmp.gt.f32.partialorder %v3808_v13, 0.0 }
 0x34e   : > { %v3812_v43 = vadd.f32 %v3811_v9, %v3699_v32  ;;  %v3701_v39 = vadd.f32 %v3700_v56, %v8343_v30  ;;  %v4251_v27 = vmul.f32 0.01, %v3810_v57  ;;  %vm4123_vm5 = vcmp.gt.f32.partialorder %v3810_v57, 0.0 }
 0x34f   : > { %v3813_v50 = vpop.f32.mrf.mxu0  ;;  %v3704_v1 = vpop.f32.mrf.mxu1  ;;  %5295 = vmatprep.mubr.bf16.mxu1 %v4491_v11  ;;  %v4378_v24 = vsel %vm4122_vm7, %v3808_v13, %v4250_v42 }
 0x350   : > { %v4258_v46 = vmul.f32 0.01, %v3812_v43  ;;  %v3814_v4 = vadd.f32 %v3813_v50, %v3701_v39  ;;  %vm4130_vm4 = vcmp.gt.f32.partialorder %v3812_v43, 0.0  ;;  %v3705_v31 = vadd.f32 %v3704_v1, %v8339_v58  ;;  %5296 = vmatmul.mubr.bf16.vlgmr.msra.gmra.mxu1 %v4490_v10 }
 0x351   : > { %v3817_v23 = vpop.f32.mrf.mxu0  ;;  %v3706_v29 = vpop.f32.mrf.mxu1  ;;  %6239 = vmatpush3.bf16.msra.mxu1 %v8178_v53  ;;  %v4379_v54 = vsel %vm4123_vm5, %v3810_v57, %v4251_v27 }
 0x352   : > { %v3707_v55 = vadd.f32 %v3706_v29, %v8343_v30  ;;  %vm4131_vm6 = vcmp.gt.f32.partialorder %v3814_v4, 0.0  ;;  %v4259_v36 = vmul.f32 0.01, %v3814_v4  ;;  %6232 = vmatprep.subr.bf16.mxu1 %v8188_v19  ;;  %v4386_v41 = vsel %vm4130_vm4, %v3812_v43, %v4258_v46 }
 0x353   : > { %v3819_v16 = vpop.f32.mrf.mxu0  ;;  %v3708_v0 = vpop.f32.mrf.mxu1  ;;  %v3818_v26 = vadd.f32 %v3817_v23, %v3705_v31  ;;  %v4498_v14 = vpack.c.bf16 %v4386_v41, %v4378_v24 }
 0x354   : > { %v3709_v38 = vadd.f32 %v3708_v0, %v8339_v58  ;;  %v4387_v40 = vsel %vm4131_vm6, %v3814_v4, %v4259_v36  ;;  %v3820_v15 = vadd.f32 %v3819_v16, %v3707_v55 }
 0x355   : > { %v3821_v35 = vpop.f32.mrf.mxu0  ;;  %v3710_v17 = vpop.f32.mrf.mxu1  ;;  %v4499_v53 = vpack.c.bf16 %v4387_v40, %v4379_v54  ;;  %6240 = vmatpush3.bf16.msra.mxu1 %v8194_v7  ;;  %v4266_v44 = vmul.f32 0.01, %v3818_v26  ;;  %vm4138_vm11 = vcmp.gt.f32.partialorder %v3818_v26, 0.0 }
 0x356   : > { %v3822_v6 = vadd.f32 %v3821_v35, %v3709_v38  ;;  %v3711_v3 = vadd.f32 %v3710_v17, %v8343_v30  ;;  %6233 = vmatprep.subr.bf16.mxu1 %v8205_v63  ;;  %v4267_v28 = vmul.f32 0.01, %v3820_v15  ;;  %vm4139_vm9 = vcmp.gt.f32.partialorder %v3820_v15, 0.0 }
 0x357   : > { %v3823_v61 = vpop.f32.mrf.mxu0  ;;  %v3714_v62 = vpop.f32.mrf.mxu1  ;;  %5303 = vmatprep.mubr.bf16.mxu1 %v4499_v53  ;;  %v4394_v50 = vsel %vm4138_vm11, %v3818_v26, %v4266_v44 }
 0x358   : > { %v4274_v19 = vmul.f32 0.01, %v3822_v6  ;;  %v3824_v51 = vadd.f32 %v3823_v61, %v3711_v3  ;;  %vm4146_vm8 = vcmp.gt.f32.partialorder %v3822_v6, 0.0  ;;  %5304 = vmatmul.mubr.bf16.gmra.mxu1 %v4498_v14  ;;  %v3715_v9 = vadd.f32 %v3714_v62, %v8339_v58 }
 0x359   : > { %v3827_v8 = vpop.f32.mrf.mxu0  ;;  %v3716_v59 = vpop.f32.mrf.mxu1  ;;  %6241 = vmatpush3.bf16.msra.mxu1 %v8213_v52  ;;  %v4395_v39 = vsel %vm4139_vm9, %v3820_v15, %v4267_v28 }
 0x35a   : > { %v3717_v32 = vadd.f32 %v3716_v59, %v8343_v30  ;;  %vm4147_vm10 = vcmp.gt.f32.partialorder %v3824_v51, 0.0  ;;  %v4275_v18 = vmul.f32 0.01, %v3824_v51  ;;  %6234 = vmatprep.subr.bf16.mxu1 %v8224_v5  ;;  %v4402_v25 = vsel %vm4146_vm8, %v3822_v6, %v4274_v19 }
 0x35b   : > { %v3829_v7 = vpop.f32.mrf.mxu0  ;;  %v3718_v56 = vpop.f32.mrf.mxu1  ;;  %v3828_v1 = vadd.f32 %v3827_v8, %v3715_v9  ;;  %v4506_v4 = vpack.c.bf16 %v4402_v25, %v4394_v50 }
 0x35c   : > { %v3719_v63 = vadd.f32 %v3718_v56, %v8339_v58  ;;  %v4403_v47 = vsel %vm4147_vm10, %v3824_v51, %v4275_v18  ;;  %v3830_v48 = vadd.f32 %v3829_v7, %v3717_v32 }
 0x35d   : > { %v3831_v57 = vpop.f32.mrf.mxu0  ;;  %v3720_v43 = vpop.f32.mrf.mxu1  ;;  %v4507_v52 = vpack.c.bf16 %v4403_v47, %v4395_v39  ;;  %6242 = vmatpush3.bf16.msra.mxu1 %v8233_v33  ;;  %v4282_v36 = vmul.f32 0.01, %v3828_v1  ;;  %vm4154_vm15 = vcmp.gt.f32.partialorder %v3828_v1, 0.0 }
 0x35e   : > { %v3832_v13 = vadd.f32 %v3831_v57, %v3719_v63  ;;  %v3721_v11 = vadd.f32 %v3720_v43, %v8343_v30  ;;  %6235 = vmatprep.subr.bf16.mxu1 %v8241_v60  ;;  %v4283_v31 = vmul.f32 0.01, %v3830_v48  ;;  %vm4155_vm13 = vcmp.gt.f32.partialorder %v3830_v48, 0.0 }
 0x35f   : > { %v3833_v10 = vpop.f32.mrf.mxu0  ;;  %v3724_v46 = vpop.f32.mrf.mxu1  ;;  %5311 = vmatprep.mubr.bf16.mxu1 %v4507_v52  ;;  %v4410_v54 = vsel %vm4154_vm15, %v3828_v1, %v4282_v36 }
 0x360   : > { %v4290_v5 = vmul.f32 0.01, %v3832_v13  ;;  %v3834_v23 = vadd.f32 %v3833_v10, %v3721_v11  ;;  %vm4162_vm12 = vcmp.gt.f32.partialorder %v3832_v13, 0.0  ;;  %v3725_v55 = vadd.f32 %v3724_v46, %v8339_v58  ;;  %5312 = vmatmul.mubr.bf16.gmra.mxu1 %v4506_v4 }
 0x361   : > { %v3837_v29 = vpop.f32.mrf.mxu0  ;;  %v3726_v27 = vpop.f32.mrf.mxu1  ;;  %6243 = vmatpush3.bf16.msra.mxu1 %v8257_v34  ;;  %v4411_v6 = vsel %vm4155_vm13, %v3830_v48, %v4283_v31 }
 0x362   : > { %v3727_v42 = vadd.f32 %v3726_v27, %v8343_v30  ;;  %vm4163_vm14 = vcmp.gt.f32.partialorder %v3834_v23, 0.0  ;;  %v4291_v16 = vmul.f32 0.01, %v3834_v23  ;;  %6236 = vmatprep.subr.bf16.mxu1 %v8266_v49  ;;  %v4418_v38 = vsel %vm4162_vm12, %v3832_v13, %v4290_v5 }
 0x363   : > { %v3839_v33 = vpop.f32.mrf.mxu0  ;;  %v3728_v0 = vpop.f32.mrf.mxu1  ;;  %v3838_v40 = vadd.f32 %v3837_v29, %v3725_v55  ;;  %v4514_v62 = vpack.c.bf16 %v4418_v38, %v4410_v54 }
 0x364   : > { %v3729_v60 = vadd.f32 %v3728_v0, %v8339_v58  ;;  %v4419_v17 = vsel %vm4163_vm14, %v3834_v23, %v4291_v16  ;;  %v3840_v26 = vadd.f32 %v3839_v33, %v3727_v42 }
 0x365   : > { %v3841_v41 = vpop.f32.mrf.mxu0  ;;  %v3730_v35 = vpop.f32.mrf.mxu1  ;;  %v4515_v34 = vpack.c.bf16 %v4419_v17, %v4411_v6  ;;  %6244 = vmatpush3.bf16.msra.mxu1 %v8274_v22  ;;  %v4298_v51 = vmul.f32 0.01, %v3838_v40  ;;  %vm4170_vm3 = vcmp.gt.f32.partialorder %v3838_v40, 0.0 }
 0x366   : > { %v3842_v15 = vadd.f32 %v3841_v41, %v3729_v60  ;;  %v3731_v24 = vadd.f32 %v3730_v35, %v8343_v30  ;;  %6237 = vmatprep.subr.bf16.mxu1 %v8282_v45  ;;  %v4299_v8 = vmul.f32 0.01, %v3840_v26  ;;  %vm4171_vm1 = vcmp.gt.f32.partialorder %v3840_v26, 0.0 }
 0x367   : > { %v3843_v3 = vpop.f32.mrf.mxu0  ;;  %v3734_v61 = vpop.f32.mrf.mxu1  ;;  %5319 = vmatprep.mubr.bf16.mxu1 %v4515_v34  ;;  %v4426_v43 = vsel %vm4170_vm3, %v3838_v40, %v4298_v51 }
 0x368   : > { %v4306_v49 = vmul.f32 0.01, %v3842_v15  ;;  %v3844_v53 = vadd.f32 %v3843_v3, %v3731_v24  ;;  %vm4178_vm0 = vcmp.gt.f32.partialorder %v3842_v15, 0.0  ;;  %5320 = vmatmul.mubr.bf16.gmra.mxu1 %v4514_v62  ;;  %v3735_v28 = vadd.f32 %v3734_v61, %v8339_v58 }
 0x369   : > { %v3847_v14 = vpop.f32.mrf.mxu0  ;;  %v3736_v19 = vpop.f32.mrf.mxu1  ;;  %6245 = vmatpush3.bf16.msra.mxu1 %v8292_v2  ;;  %v4427_v57 = vsel %vm4171_vm1, %v3840_v26, %v4299_v8  ;;  %v1904_v3 = vsub.s32 6, %v8878_v21  ;;  %v1908_v61 = vsub.s32 7, %v8878_v21 }
 0x36a   : > { %v3737_v59 = vadd.f32 %v3736_v19, %v8343_v30  ;;  %vm4179_vm2 = vcmp.gt.f32.partialorder %v3844_v53, 0.0  ;;  %v4307_v44 = vmul.f32 0.01, %v3844_v53  ;;  %6238 = vmatprep.subr.bf16.mxu1 %v8298_v20  ;;  %v4434_v18 = vsel %vm4178_vm0, %v3842_v15, %v4306_v49 }
 0x36b   : > { %v3849_v22 = vpop.f32.mrf.mxu0  ;;  %v3738_v32 = vpop.f32.mrf.mxu1  ;;  %v3848_v47 = vadd.f32 %v3847_v14, %v3735_v28  ;;  %v4522_v50 = vpack.c.bf16 %v4434_v18, %v4426_v43  ;;  %v8399_v21 = vrot.slane %v8336_v37, %v1904_v3 }
 0x36c   : > { %v3739_v45 = vadd.f32 %v3738_v32, %v8339_v58  ;;  %v4435_v56 = vsel %vm4179_vm2, %v3844_v53, %v4307_v44  ;;  %v3850_v63 = vadd.f32 %v3849_v22, %v3737_v59 }
 0x36d   : > { %v3851_v9 = vpop.f32.mrf.mxu0  ;;  %v3740_v7 = vpop.f32.mrf.mxu1  ;;  %v4523_v2 = vpack.c.bf16 %v4435_v56, %v4427_v57  ;;  %6246 = vmatpush3.bf16.msra.mxu1 %v8304_v12  ;;  %v4314_v5 = vmul.f32 0.01, %v3848_v47  ;;  %vm4186_vm7 = vcmp.gt.f32.partialorder %v3848_v47, 0.0 }
 0x36e   : > { %v3852_v25 = vadd.f32 %v3851_v9, %v3739_v45  ;;  %v3741_v48 = vadd.f32 %v3740_v7, %v8343_v30  ;;  %v4315_v46 = vmul.f32 0.01, %v3850_v63  ;;  %vm4187_vm5 = vcmp.gt.f32.partialorder %v3850_v63, 0.0 }
 0x36f   : > { %v3853_v13 = vpop.f32.mrf.mxu0  ;;  %v3744_v39 = vpop.f32.mrf.mxu1  ;;  %5327 = vmatprep.mubr.bf16.mxu1 %v4523_v2  ;;  %v4442_v38 = vsel %vm4186_vm7, %v3848_v47, %v4314_v5  ;;  %v8402_v9 = vrot.slane %v8336_v37, %v1908_v61 }
 0x370   : > { %v4322_v1 = vmul.f32 0.01, %v3852_v25  ;;  %v3854_v20 = vadd.f32 %v3853_v13, %v3741_v48  ;;  %vm4194_vm4 = vcmp.gt.f32.partialorder %v3852_v25, 0.0  ;;  %v3745_v52 = vadd.f32 %v3744_v39, %v8339_v58  ;;  %5328 = vmatmul.mubr.bf16.gmra.mxu1 %v4522_v50 }
 0x371   : > { %v3857_v11 = vpop.f32.mrf.mxu0  ;;  %v3746_v10 = vpop.f32.mrf.mxu1  ;;  %v4443_v60 = vsel %vm4187_vm5, %v3850_v63, %v4315_v46 }
 0x372   : > { %v3747_v4 = vadd.f32 %v3746_v10, %v8343_v30  ;;  %vm4195_vm6 = vcmp.gt.f32.partialorder %v3854_v20, 0.0  ;;  %v4323_v23 = vmul.f32 0.01, %v3854_v20  ;;  %v4450_v31 = vsel %vm4194_vm4, %v3852_v25, %v4322_v1 }
 0x373   : > { %v3859_v29 = vpop.f32.mrf.mxu0  ;;  %v3748_v27 = vpop.f32.mrf.mxu1  ;;  %v3858_v16 = vadd.f32 %v3857_v11, %v3745_v52  ;;  %v4530_v26 = vpack.c.bf16 %v4450_v31, %v4442_v38 }
 0x374   : > { %v3749_v12 = vadd.f32 %v3748_v27, %v8339_v58  ;;  %v4451_v36 = vsel %vm4195_vm6, %v3854_v20, %v4323_v23  ;;  %v3860_v33 = vadd.f32 %v3859_v29, %v3747_v4 }
 0x375   : > { %v3861_v55 = vpop.f32.mrf.mxu0  ;;  %v3750_v42 = vpop.f32.mrf.mxu1  ;;  %v4531_v40 = vpack.c.bf16 %v4451_v36, %v4443_v60  ;;  %v4330_v34 = vmul.f32 0.01, %v3858_v16  ;;  %vm4202_vm11 = vcmp.gt.f32.partialorder %v3858_v16, 0.0 }
 0x376   : > { %v3862_v0 = vadd.f32 %v3861_v55, %v3749_v12  ;;  %v3751_v41 = vadd.f32 %v3750_v42, %v8343_v30  ;;  %v4331_v62 = vmul.f32 0.01, %v3860_v33  ;;  %vm4203_vm9 = vcmp.gt.f32.partialorder %v3860_v33, 0.0 }
 0x377   : > { %v3863_v35 = vpop.f32.mrf.mxu0  ;;  %v3754_v17 = vpop.f32.mrf.mxu1  ;;  %5335 = vmatprep.mubr.bf16.mxu1 %v4531_v40  ;;  %v4458_v7 = vsel %vm4202_vm11, %v3858_v16, %v4330_v34 }
 0x378   : > { %v4338_v15 = vmul.f32 0.01, %v3862_v0  ;;  %v3864_v6 = vadd.f32 %v3863_v35, %v3751_v41  ;;  %vm4210_vm8 = vcmp.gt.f32.partialorder %v3862_v0, 0.0  ;;  %5336 = vmatmul.mubr.bf16.gmra.mxu1 %v4530_v26  ;;  %v3755_v14 = vadd.f32 %v3754_v17, %v8339_v58 }
 0x379   : > { %v3867_v54 = vpop.f32.mrf.mxu0  ;;  %v3756_v24 = vpop.f32.mrf.mxu1  ;;  %v4459_v18 = vsel %vm4203_vm9, %v3860_v33, %v4331_v62 }
 0x37a   : > { %v3757_v49 = vadd.f32 %v3756_v24, %v8343_v30  ;;  %vm4211_vm10 = vcmp.gt.f32.partialorder %v3864_v6, 0.0  ;;  %v4339_v53 = vmul.f32 0.01, %v3864_v6  ;;  %v4466_v59 = vsel %vm4210_vm8, %v3862_v0, %v4338_v15 }
 0x37b   : > { %v3869_v19 = vpop.f32.mrf.mxu0  ;;  %v3758_v51 = vpop.f32.mrf.mxu1  ;;  %v3868_v56 = vadd.f32 %v3867_v54, %v3755_v14  ;;  %v4538_v43 = vpack.c.bf16 %v4466_v59, %v4458_v7 }
 0x37c   : > { %v3759_v8 = vadd.f32 %v3758_v51, %v8339_v58  ;;  %v4467_v22 = vsel %vm4211_vm10, %v3864_v6, %v4339_v53  ;;  %v3870_v32 = vadd.f32 %v3869_v19, %v3757_v49 }
 0x37d   : > { %v3871_v44 = vpop.f32.mrf.mxu0  ;;  %v3760_v28 = vpop.f32.mrf.mxu1  ;;  %v4539_v58 = vpack.c.bf16 %v4467_v22, %v4459_v18  ;;  %v4346_v1 = vmul.f32 0.01, %v3868_v56  ;;  %vm4218_vm15 = vcmp.gt.f32.partialorder %v3868_v56, 0.0 }
 0x37e   : > { %v3872_v45 = vadd.f32 %v3871_v44, %v3759_v8  ;;  %v3761_v63 = vadd.f32 %v3760_v28, %v8343_v30  ;;  %v4347_v2 = vmul.f32 0.01, %v3870_v32  ;;  %vm4219_vm13 = vcmp.gt.f32.partialorder %v3870_v32, 0.0 }
 0x37f   : > { %v3873_v25 = vpop.f32.mrf.mxu0  ;;  %v3910_v57 = vpop.f32.mrf.mxu1  ;;  %5343 = vmatprep.mubr.bf16.mxu1 %v4539_v58  ;;  %v4474_v31 = vsel %vm4218_vm15, %v3868_v56, %v4346_v1 }
 0x380   : > { %v4354_v47 = vmul.f32 0.01, %v3872_v45  ;;  %v3874_v48 = vadd.f32 %v3873_v25, %v3761_v63  ;;  %vm4226_vm12 = vcmp.gt.f32.partialorder %v3872_v45, 0.0  ;;  %v3911_v50 = vadd.f32 %v3910_v57, %v8399_v21  ;;  %5344 = vmatmul.mubr.bf16.gmra.mxu1 %v4538_v43 }
 0x381   : > { %v4023_v13 = vpop.f32.mrf.mxu0  ;;  %v3912_v39 = vpop.f32.mrf.mxu1  ;;  %v4475_v12 = vsel %vm4219_vm13, %v3870_v32, %v4347_v2 }
 0x382   : > { %v3913_v37 = vadd.f32 %v3912_v39, %v8402_v9  ;;  %vm4227_vm14 = vcmp.gt.f32.partialorder %v3874_v48, 0.0  ;;  %v4355_v30 = vmul.f32 0.01, %v3874_v48  ;;  %v4482_v46 = vsel %vm4226_vm12, %v3872_v45, %v4354_v47 }
 0x383   : > { %v4025_v20 = vpop.f32.mrf.mxu0  ;;  %v3914_v11 = vpop.f32.mrf.mxu1  ;;  %v4024_v23 = vadd.f32 %v4023_v13, %v3911_v50  ;;  %v4546_v33 = vpack.c.bf16 %v4482_v46, %v4474_v31 }
 0x384   : > { %v3915_v10 = vadd.f32 %v3914_v11, %v8399_v21  ;;  %v4483_v5 = vsel %vm4227_vm14, %v3874_v48, %v4355_v30  ;;  %v4026_v29 = vadd.f32 %v4025_v20, %v3913_v37 }
 0x385   : > { %v4027_v52 = vpop.f32.mrf.mxu0  ;;  %v3916_v4 = vpop.f32.mrf.mxu1  ;;  %v4547_v16 = vpack.c.bf16 %v4483_v5, %v4475_v12  ;;  %v4236_v35 = vmul.f32 0.01, %v4024_v23  ;;  %vm4108_vm3 = vcmp.gt.f32.partialorder %v4024_v23, 0.0 }
 0x386   : > { %v4028_v27 = vadd.f32 %v4027_v52, %v3915_v10  ;;  %v3917_v55 = vadd.f32 %v3916_v4, %v8402_v9  ;;  %v4237_v17 = vmul.f32 0.01, %v4026_v29  ;;  %vm4109_vm1 = vcmp.gt.f32.partialorder %v4026_v29, 0.0 }
 0x387   : > { %v4029_v42 = vpop.f32.mrf.mxu0  ;;  %v3920_v36 = vpop.f32.mrf.mxu1  ;;  %5351 = vmatprep.mubr.bf16.mxu1 %v4547_v16  ;;  %v4364_v19 = vsel %vm4108_vm3, %v4024_v23, %v4236_v35 }
 0x388   : > { %v4244_v0 = vmul.f32 0.01, %v4028_v27  ;;  %v4030_v60 = vadd.f32 %v4029_v42, %v3917_v55  ;;  %vm4116_vm0 = vcmp.gt.f32.partialorder %v4028_v27, 0.0  ;;  %5352 = vmatmul.mubr.bf16.gmra.mxu1 %v4546_v33  ;;  %v3921_v15 = vadd.f32 %v3920_v36, %v8399_v21 }
 0x389   : > { %v4033_v38 = vpop.f32.mrf.mxu0  ;;  %v3922_v41 = vpop.f32.mrf.mxu1  ;;  %v4365_v14 = vsel %vm4109_vm1, %v4026_v29, %v4237_v17 }
 0x38a   : > { %v3923_v40 = vadd.f32 %v3922_v41, %v8402_v9  ;;  %vm4117_vm2 = vcmp.gt.f32.partialorder %v4030_v60, 0.0  ;;  %v4245_v26 = vmul.f32 0.01, %v4030_v60  ;;  %v4372_v3 = vsel %vm4116_vm0, %v4028_v27, %v4244_v0 }
 0x38b   : > { %v4035_v6 = vpop.f32.mrf.mxu0  ;;  %v3924_v54 = vpop.f32.mrf.mxu1  ;;  %v4034_v51 = vadd.f32 %v4033_v38, %v3921_v15  ;;  %v4492_v22 = vpack.c.bf16 %v4372_v3, %v4364_v19 }
 0x38c   : > { %v3925_v24 = vadd.f32 %v3924_v54, %v8399_v21  ;;  %v4373_v62 = vsel %vm4117_vm2, %v4030_v60, %v4245_v26  ;;  %v4036_v49 = vadd.f32 %v4035_v6, %v3923_v40 }
 0x38d   : > { %v4037_v61 = vpop.f32.mrf.mxu0  ;;  %v3926_v34 = vpop.f32.mrf.mxu1  ;;  %v4493_v28 = vpack.c.bf16 %v4373_v62, %v4365_v14  ;;  %v4252_v57 = vmul.f32 0.01, %v4034_v51  ;;  %vm4124_vm7 = vcmp.gt.f32.partialorder %v4034_v51, 0.0 }
 0x38e   : > { %v4038_v53 = vadd.f32 %v4037_v61, %v3925_v24  ;;  %v3927_v8 = vadd.f32 %v3926_v34, %v8402_v9  ;;  %v4253_v56 = vmul.f32 0.01, %v4036_v49  ;;  %vm4125_vm5 = vcmp.gt.f32.partialorder %v4036_v49, 0.0 }
 0x38f   : > { %v4039_v59 = vpop.f32.mrf.mxu0  ;;  %v3930_v44 = vpop.f32.mrf.mxu1  ;;  %5392 = vmatprep.mubr.bf16.mxu0 %v4493_v28  ;;  %v4380_v11 = vsel %vm4124_vm7, %v4034_v51, %v4252_v57 }
 0x390   : > { %v4260_v32 = vmul.f32 0.01, %v4038_v53  ;;  %v4040_v45 = vadd.f32 %v4039_v59, %v3927_v8  ;;  %vm4132_vm4 = vcmp.gt.f32.partialorder %v4038_v53, 0.0  ;;  %v3931_v63 = vadd.f32 %v3930_v44, %v8399_v21  ;;  %5393 = vmatmul.mubr.bf16.vlgmr.msra.gmra.mxu0 %v4492_v22 }
 0x391   : > { %v4043_v18 = vpop.f32.mrf.mxu0  ;;  %v3932_v7 = vpop.f32.mrf.mxu1  ;;  %v4381_v20 = vsel %vm4125_vm5, %v4036_v49, %v4253_v56 }
 0x392   : > { %v3933_v25 = vadd.f32 %v3932_v7, %v8402_v9  ;;  %vm4133_vm6 = vcmp.gt.f32.partialorder %v4040_v45, 0.0  ;;  %v4261_v58 = vmul.f32 0.01, %v4040_v45  ;;  %v4388_v13 = vsel %vm4132_vm4, %v4038_v53, %v4260_v32 }
 0x393   : > { %v4045_v43 = vpop.f32.mrf.mxu0  ;;  %v3934_v47 = vpop.f32.mrf.mxu1  ;;  %v4044_v37 = vadd.f32 %v4043_v18, %v3931_v63  ;;  %v4500_v5 = vpack.c.bf16 %v4388_v13, %v4380_v11 }
 0x394   : > { %v3935_v48 = vadd.f32 %v3934_v47, %v8399_v21  ;;  %v4389_v50 = vsel %vm4133_vm6, %v4040_v45, %v4261_v58  ;;  %v4046_v1 = vadd.f32 %v4045_v43, %v3933_v25 }
 0x395   : > { %v4047_v39 = vpop.f32.mrf.mxu0  ;;  %v3936_v2 = vpop.f32.mrf.mxu1  ;;  %v4501_v4 = vpack.c.bf16 %v4389_v50, %v4381_v20  ;;  %v4268_v31 = vmul.f32 0.01, %v4044_v37  ;;  %vm4140_vm11 = vcmp.gt.f32.partialorder %v4044_v37, 0.0 }
 0x396   : > { %v4048_v30 = vadd.f32 %v4047_v39, %v3935_v48  ;;  %v3937_v10 = vadd.f32 %v3936_v2, %v8402_v9  ;;  %v4269_v55 = vmul.f32 0.01, %v4046_v1  ;;  %vm4141_vm9 = vcmp.gt.f32.partialorder %v4046_v1, 0.0 }
 0x397   : > { %v4049_v46 = vpop.f32.mrf.mxu0  ;;  %v3940_v52 = vpop.f32.mrf.mxu1  ;;  %5400 = vmatprep.mubr.bf16.mxu0 %v4501_v4  ;;  %v4396_v6 = vsel %vm4140_vm11, %v4044_v37, %v4268_v31 }
 0x398   : > { %v4276_v23 = vmul.f32 0.01, %v4048_v30  ;;  %v4050_v29 = vadd.f32 %v4049_v46, %v3937_v10  ;;  %vm4148_vm8 = vcmp.gt.f32.partialorder %v4048_v30, 0.0  ;;  %5401 = vmatmul.mubr.bf16.gmra.mxu0 %v4500_v5  ;;  %v3941_v16 = vadd.f32 %v3940_v52, %v8399_v21 }
 0x399   : > { %v4053_v27 = vpop.f32.mrf.mxu0  ;;  %v3942_v12 = vpop.f32.mrf.mxu1  ;;  %v4397_v15 = vsel %vm4141_vm9, %v4046_v1, %v4269_v55 }
 0x39a   : > { %v3943_v42 = vadd.f32 %v3942_v12, %v8402_v9  ;;  %vm4149_vm10 = vcmp.gt.f32.partialorder %v4050_v29, 0.0  ;;  %v4277_v36 = vmul.f32 0.01, %v4050_v29  ;;  %v4404_v38 = vsel %vm4148_vm8, %v4048_v30, %v4276_v23 }
 0x39b   : > { %v4055_v33 = vpop.f32.mrf.mxu0  ;;  %v3944_v0 = vpop.f32.mrf.mxu1  ;;  %v4054_v54 = vadd.f32 %v4053_v27, %v3941_v16  ;;  %v4508_v62 = vpack.c.bf16 %v4404_v38, %v4396_v6 }
 0x39c   : > { %v3945_v60 = vadd.f32 %v3944_v0, %v8399_v21  ;;  %v4405_v17 = vsel %vm4149_vm10, %v4050_v29, %v4277_v36  ;;  %v4056_v40 = vadd.f32 %v4055_v33, %v3943_v42 }
 0x39d   : > { %v4057_v41 = vpop.f32.mrf.mxu0  ;;  %v3946_v35 = vpop.f32.mrf.mxu1  ;;  %v4509_v34 = vpack.c.bf16 %v4405_v17, %v4397_v15  ;;  %v4284_v44 = vmul.f32 0.01, %v4054_v54  ;;  %vm4156_vm15 = vcmp.gt.f32.partialorder %v4054_v54, 0.0 }
 0x39e   : > { %v4058_v26 = vadd.f32 %v4057_v41, %v3945_v60  ;;  %v3947_v24 = vadd.f32 %v3946_v35, %v8402_v9  ;;  %v4285_v51 = vmul.f32 0.01, %v4056_v40  ;;  %vm4157_vm13 = vcmp.gt.f32.partialorder %v4056_v40, 0.0 }
 0x39f   : > { %v4059_v3 = vpop.f32.mrf.mxu0  ;;  %v3950_v61 = vpop.f32.mrf.mxu1  ;;  %5408 = vmatprep.mubr.bf16.mxu0 %v4509_v34  ;;  %v4412_v47 = vsel %vm4156_vm15, %v4054_v54, %v4284_v44 }
 0x3a0   : > { %v4292_v49 = vmul.f32 0.01, %v4058_v26  ;;  %v4060_v53 = vadd.f32 %v4059_v3, %v3947_v24  ;;  %vm4164_vm12 = vcmp.gt.f32.partialorder %v4058_v26, 0.0  ;;  %v3951_v8 = vadd.f32 %v3950_v61, %v8399_v21  ;;  %5409 = vmatmul.mubr.bf16.gmra.mxu0 %v4508_v62 }
 0x3a1   : > { %v4063_v14 = vpop.f32.mrf.mxu0  ;;  %v3952_v19 = vpop.f32.mrf.mxu1  ;;  %v4413_v43 = vsel %vm4157_vm13, %v4056_v40, %v4285_v51 }
 0x3a2   : > { %v3953_v59 = vadd.f32 %v3952_v19, %v8402_v9  ;;  %vm4165_vm14 = vcmp.gt.f32.partialorder %v4060_v53, 0.0  ;;  %v4293_v28 = vmul.f32 0.01, %v4060_v53  ;;  %v4420_v18 = vsel %vm4164_vm12, %v4058_v26, %v4292_v49 }
 0x3a3   : > { %v4065_v22 = vpop.f32.mrf.mxu0  ;;  %v3954_v32 = vpop.f32.mrf.mxu1  ;;  %v4064_v25 = vadd.f32 %v4063_v14, %v3951_v8  ;;  %v4516_v50 = vpack.c.bf16 %v4420_v18, %v4412_v47 }
 0x3a4   : > { %v3955_v45 = vadd.f32 %v3954_v32, %v8399_v21  ;;  %v4421_v63 = vsel %vm4165_vm14, %v4060_v53, %v4293_v28  ;;  %v4066_v57 = vadd.f32 %v4065_v22, %v3953_v59 }
 0x3a5   : > { %v4067_v7 = vpop.f32.mrf.mxu0  ;;  %v3956_v56 = vpop.f32.mrf.mxu1  ;;  %v4517_v2 = vpack.c.bf16 %v4421_v63, %v4413_v43  ;;  %v4300_v11 = vmul.f32 0.01, %v4064_v25  ;;  %vm4172_vm3 = vcmp.gt.f32.partialorder %v4064_v25, 0.0 }
 0x3a6   : > { %v4068_v58 = vadd.f32 %v4067_v7, %v3955_v45  ;;  %v3957_v48 = vadd.f32 %v3956_v56, %v8402_v9  ;;  %v4301_v10 = vmul.f32 0.01, %v4066_v57  ;;  %vm4173_vm1 = vcmp.gt.f32.partialorder %v4066_v57, 0.0 }
 0x3a7   : > { %v4069_v13 = vpop.f32.mrf.mxu0  ;;  %v3960_v39 = vpop.f32.mrf.mxu1  ;;  %5416 = vmatprep.mubr.bf16.mxu0 %v4517_v2  ;;  %v4428_v33 = vsel %vm4172_vm3, %v4064_v25, %v4300_v11 }
 0x3a8   : > { %v4308_v37 = vmul.f32 0.01, %v4068_v58  ;;  %v4070_v1 = vadd.f32 %v4069_v13, %v3957_v48  ;;  %vm4180_vm0 = vcmp.gt.f32.partialorder %v4068_v58, 0.0  ;;  %5417 = vmatmul.mubr.bf16.gmra.mxu0 %v4516_v50  ;;  %v3961_v4 = vadd.f32 %v3960_v39, %v8399_v21 }
 0x3a9   : > { %v4073_v30 = vpop.f32.mrf.mxu0  ;;  %v3962_v20 = vpop.f32.mrf.mxu1  ;;  %v4429_v16 = vsel %vm4173_vm1, %v4066_v57, %v4301_v10 }
 0x3aa   : > { %v3963_v46 = vadd.f32 %v3962_v20, %v8402_v9  ;;  %vm4181_vm2 = vcmp.gt.f32.partialorder %v4070_v1, 0.0  ;;  %v4309_v52 = vmul.f32 0.01, %v4070_v1  ;;  %v4436_v27 = vsel %vm4180_vm0, %v4068_v58, %v4308_v37 }
 0x3ab   : > { %v4075_v5 = vpop.f32.mrf.mxu0  ;;  %v3964_v23 = vpop.f32.mrf.mxu1  ;;  %v4074_v0 = vadd.f32 %v4073_v30, %v3961_v4  ;;  %v4524_v17 = vpack.c.bf16 %v4436_v27, %v4428_v33 }
 0x3ac   : > { %v3965_v29 = vadd.f32 %v3964_v23, %v8399_v21  ;;  %v4437_v55 = vsel %vm4181_vm2, %v4070_v1, %v4309_v52  ;;  %v4076_v42 = vadd.f32 %v4075_v5, %v3963_v46 }
 0x3ad   : > { %v4077_v12 = vpop.f32.mrf.mxu0  ;;  %v3966_v31 = vpop.f32.mrf.mxu1  ;;  %v4525_v35 = vpack.c.bf16 %v4437_v55, %v4429_v16  ;;  %v4316_v61 = vmul.f32 0.01, %v4074_v0  ;;  %vm4188_vm7 = vcmp.gt.f32.partialorder %v4074_v0, 0.0 }
 0x3ae   : > { %v4078_v36 = vadd.f32 %v4077_v12, %v3965_v29  ;;  %v3967_v60 = vadd.f32 %v3966_v31, %v8402_v9  ;;  %v4317_v54 = vmul.f32 0.01, %v4076_v42  ;;  %vm4189_vm5 = vcmp.gt.f32.partialorder %v4076_v42, 0.0 }
 0x3af   : > { %v4079_v38 = vpop.f32.mrf.mxu0  ;;  %v3970_v41 = vpop.f32.mrf.mxu1  ;;  %5424 = vmatprep.mubr.bf16.mxu0 %v4525_v35  ;;  %v4444_v32 = vsel %vm4188_vm7, %v4074_v0, %v4316_v61 }
 0x3b0   : > { %v4324_v40 = vmul.f32 0.01, %v4078_v36  ;;  %v4080_v26 = vadd.f32 %v4079_v38, %v3967_v60  ;;  %vm4196_vm4 = vcmp.gt.f32.partialorder %v4078_v36, 0.0  ;;  %v3971_v24 = vadd.f32 %v3970_v41, %v8399_v21  ;;  %5425 = vmatmul.mubr.bf16.gmra.mxu0 %v4524_v17 }
 0x3b1   : > { %v4083_v15 = vpop.f32.mrf.mxu0  ;;  %v3972_v6 = vpop.f32.mrf.mxu1  ;;  %v4445_v22 = vsel %vm4189_vm5, %v4076_v42, %v4317_v54 }
 0x3b2   : > { %v3973_v3 = vadd.f32 %v3972_v6, %v8402_v9  ;;  %vm4197_vm6 = vcmp.gt.f32.partialorder %v4080_v26, 0.0  ;;  %v4325_v34 = vmul.f32 0.01, %v4080_v26  ;;  %v4452_v14 = vsel %vm4196_vm4, %v4078_v36, %v4324_v40 }
 0x3b3   : > { %v4085_v62 = vpop.f32.mrf.mxu0  ;;  %v3974_v49 = vpop.f32.mrf.mxu1  ;;  %v4084_v59 = vadd.f32 %v4083_v15, %v3971_v24  ;;  %v4532_v63 = vpack.c.bf16 %v4452_v14, %v4444_v32 }
 0x3b4   : > { %v3975_v53 = vadd.f32 %v3974_v49, %v8399_v21  ;;  %v4453_v8 = vsel %vm4197_vm6, %v4080_v26, %v4325_v34  ;;  %v4086_v44 = vadd.f32 %v4085_v62, %v3973_v3 }
 0x3b5   : > { %v4087_v19 = vpop.f32.mrf.mxu0  ;;  %v3976_v51 = vpop.f32.mrf.mxu1  ;;  %v4533_v56 = vpack.c.bf16 %v4453_v8, %v4445_v22  ;;  %v4332_v47 = vmul.f32 0.01, %v4084_v59  ;;  %vm4204_vm11 = vcmp.gt.f32.partialorder %v4084_v59, 0.0 }
 0x3b6   : > { %v4088_v28 = vadd.f32 %v4087_v19, %v3975_v53  ;;  %v3977_v45 = vadd.f32 %v3976_v51, %v8402_v9  ;;  %v4333_v48 = vmul.f32 0.01, %v4086_v44  ;;  %vm4205_vm9 = vcmp.gt.f32.partialorder %v4086_v44, 0.0 }
 0x3b7   : > { %v4089_v18 = vpop.f32.mrf.mxu0  ;;  %v3980_v7 = vpop.f32.mrf.mxu1  ;;  %5432 = vmatprep.mubr.bf16.mxu0 %v4533_v56  ;;  %v4460_v5 = vsel %vm4204_vm11, %v4084_v59, %v4332_v47 }
 0x3b8   : > { %v4340_v25 = vmul.f32 0.01, %v4088_v28  ;;  %v4090_v57 = vadd.f32 %v4089_v18, %v3977_v45  ;;  %vm4212_vm8 = vcmp.gt.f32.partialorder %v4088_v28, 0.0  ;;  %5433 = vmatmul.mubr.bf16.gmra.mxu0 %v4532_v63  ;;  %v3981_v2 = vadd.f32 %v3980_v7, %v8399_v21 }
 0x3b9   : > { %v4093_v58 = vpop.f32.mrf.mxu0  ;;  %v3982_v43 = vpop.f32.mrf.mxu1  ;;  %v4461_v4 = vsel %vm4205_vm9, %v4086_v44, %v4333_v48 }
 0x3ba   : > { %v3983_v13 = vadd.f32 %v3982_v43, %v8402_v9  ;;  %vm4213_vm10 = vcmp.gt.f32.partialorder %v4090_v57, 0.0  ;;  %v4341_v39 = vmul.f32 0.01, %v4090_v57  ;;  %v4468_v30 = vsel %vm4212_vm8, %v4088_v28, %v4340_v25 }
 0x3bb   : > { %v4095_v50 = vpop.f32.mrf.mxu0  ;;  %v3984_v37 = vpop.f32.mrf.mxu1  ;;  %v4094_v23 = vadd.f32 %v4093_v58, %v3981_v2  ;;  %v4540_v31 = vpack.c.bf16 %v4468_v30, %v4460_v5 }
 0x3bc   : > { %v3985_v1 = vadd.f32 %v3984_v37, %v8399_v21  ;;  %v4096_v20 = vadd.f32 %v4095_v50, %v3983_v13  ;;  %v4469_v46 = vsel %vm4213_vm10, %v4090_v57, %v4341_v39 }
 0x3bd   : > { %v4097_v11 = vpop.f32.mrf.mxu0  ;;  %v3986_v10 = vpop.f32.mrf.mxu1  ;;  %v4541_v12 = vpack.c.bf16 %v4469_v46, %v4461_v4  ;;  %v4348_v0 = vmul.f32 0.01, %v4094_v23  ;;  %vm4220_vm15 = vcmp.gt.f32.partialorder %v4094_v23, 0.0 }
 0x3be   : > { %v4098_v52 = vadd.f32 %v4097_v11, %v3985_v1  ;;  %v3987_v29 = vadd.f32 %v3986_v10, %v8402_v9  ;;  %v4349_v42 = vmul.f32 0.01, %v4096_v20  ;;  %vm4221_vm12 = vcmp.gt.f32.partialorder %v4096_v20, 0.0 }
 0x3bf   : > { %v5991_v27 = vpop.f32.mrf.mxu1  ;;  %v4099_v55 = vpop.f32.mrf.mxu0  ;;  %5440 = vmatprep.mubr.bf16.mxu1 %v4541_v12  ;;  %v4476_v15 = vsel %vm4220_vm15, %v4094_v23, %v4348_v0 }
 0x3c0   : > { %v4356_v36 = vmul.f32 0.01, %v4098_v52  ;;  %v4100_v16 = vadd.f32 %v4099_v55, %v3987_v29  ;;  %vm4228_vm13 = vcmp.gt.f32.partialorder %v4098_v52, 0.0  ;;  %5441 = vmatmul.mubr.bf16.vlgmr.msra.gmra.mxu1 %v4540_v31  ;;  %v4477_v35 = vsel %vm4221_vm12, %v4096_v20, %v4349_v42 }
 0x3c1   : > { %v5992_v21 = vpop.f32.mrf.mxu1 }
 0x3c2   : > { %v8437_v33 = vadd.f32 %v5992_v21, %v5991_v27  ;;  %vm4229_vm14 = vcmp.gt.f32.partialorder %v4100_v16, 0.0  ;;  %v4357_v60 = vmul.f32 0.01, %v4100_v16  ;;  %v4484_v9 = vsel %vm4228_vm13, %v4098_v52, %v4356_v36 }
 0x3c3   : > { %v5994_v38 = vpop.f32.mrf.mxu1  ;;  %v4548_v54 = vpack.c.bf16 %v4484_v9, %v4476_v15 }
 0x3c4   : > { %v4485_v17 = vsel %vm4229_vm14, %v4100_v16, %v4357_v60 }
 0x3c5   : > { %v5995_v41 = vpop.f32.mrf.mxu1  ;;  %v4549_v26 = vpack.c.bf16 %v4485_v17, %v4477_v35 }
 0x3c6   : > { %v8439_v40 = vadd.f32 %v5995_v41, %v5994_v38 }
 0x3c7   : > { %v5997_v6 = vpop.f32.mrf.mxu1  ;;  %5448 = vmatprep.mubr.bf16.mxu1 %v4549_v26 }
 0x3c8   : > { %5449 = vmatmul.mubr.bf16.gmra.mxu1 %v4548_v54 }
 0x3c9   : > { %v5998_v24 = vpop.f32.mrf.mxu1 }
 0x3ca   : > { %v8441_v3 = vadd.f32 %v5998_v24, %v5997_v6 }
 0x3cb   : > { %v6000_v61 = vpop.f32.mrf.mxu1 }
 0x3cd   : > { %v6001_v34 = vpop.f32.mrf.mxu1 }
 0x3ce   : > { %v8443_v62 = vadd.f32 %v6001_v34, %v6000_v61 }
 0x3cf   : > { %v6003_v49 = vpop.f32.mrf.mxu1 }
 0x3d1   : > { %v6004_v53 = vpop.f32.mrf.mxu1  ;;  %v8447_v51 = vpop.f32.mrf.mxu0 }
 0x3d2   : > { %v8445_v14 = vadd.f32 %v6004_v53, %v6003_v49 }
 0x3d3   : > { %v6006_v19 = vpop.f32.mrf.mxu1  ;;  %v8451_v28 = vpop.f32.mrf.mxu0 }
 0x3d5   : > { %v6007_v8 = vpop.f32.mrf.mxu1  ;;  %v8455_v18 = vpop.f32.mrf.mxu0 }
 0x3d6   : > { %v8449_v59 = vadd.f32 %v6007_v8, %v6006_v19 }
 0x3d7   : > { %v6009_v44 = vpop.f32.mrf.mxu1  ;;  %v8459_v25 = vpop.f32.mrf.mxu0 }
 0x3d9   : > { %v6010_v22 = vpop.f32.mrf.mxu1  ;;  %v8463_v47 = vpop.f32.mrf.mxu0 }
 0x3da   : > { %v8453_v32 = vadd.f32 %v6010_v22, %v6009_v44 }
 0x3db   : > { %v6012_v45 = vpop.f32.mrf.mxu1  ;;  %v8467_v2 = vpop.f32.mrf.mxu0 }
 0x3dd   : > { %v6013_v7 = vpop.f32.mrf.mxu1  ;;  %v8471_v30 = vpop.f32.mrf.mxu0 }
 0x3de   : > { %v8457_v56 = vadd.f32 %v6013_v7, %v6012_v45 }
 0x3df   : > { %v6015_v63 = vpop.f32.mrf.mxu1  ;;  %v8475_v46 = vpop.f32.mrf.mxu0 }
 0x3e1   : > { %v6016_v57 = vpop.f32.mrf.mxu1 }
 0x3e2   : > { %v8461_v58 = vadd.f32 %v6016_v57, %v6015_v63  ;;  %v8479_v23 = vpop.f32.mrf.mxu0 }
 0x3e3   : > { %v6018_v43 = vpop.f32.mrf.mxu1 }
 0x3e4   : > { %v8483_v31 = vpop.f32.mrf.mxu0 }
 0x3e5   : > { %v6019_v48 = vpop.f32.mrf.mxu1 }
 0x3e6   : > { %v8465_v13 = vadd.f32 %v6019_v48, %v6018_v43  ;;  %v8487_v16 = vpop.f32.mrf.mxu0 }
 0x3e7   : > { %v6021_v39 = vpop.f32.mrf.mxu1 }
 0x3e8   : > { %v8491_v60 = vpop.f32.mrf.mxu0 }
 0x3e9   : > { %v6022_v50 = vpop.f32.mrf.mxu1 }
 0x3ea   : > { %v8469_v37 = vadd.f32 %v6022_v50, %v6021_v39  ;;  %v8493_v38 = vpop.f32.mrf.mxu0 }
 0x3eb   : > { %v6024_v1 = vpop.f32.mrf.mxu1 }
 0x3ec   : > { %v8495_v9 = vpop.f32.mrf.mxu0 }
 0x3ed   : > { %v6025_v20 = vpop.f32.mrf.mxu1 }
 0x3ee   : > { %v8473_v11 = vadd.f32 %v6025_v20, %v6024_v1  ;;  %v8497_v41 = vpop.f32.mrf.mxu0 }
 0x3ef   : > { %v6027_v10 = vpop.f32.mrf.mxu1 }
 0x3f0   : > { %8891 = vst [vmem:[#allocation13_spill] sm:$0xff] %v8473_v11  ;;  %v8499_v35 = vpop.f32.mrf.mxu0 }
 0x3f1   : > { %v6028_v52 = vpop.f32.mrf.mxu1 }
 0x3f2   : > { %v8477_v4 = vadd.f32 %v6028_v52, %v6027_v10  ;;  %v8501_v26 = vpop.f32.mrf.mxu0 }
 0x3f3   : > { %v6030_v5 = vpop.f32.mrf.mxu1 }
 0x3f4   : > { %8892 = vst [vmem:[#allocation14_spill] sm:$0xff] %v8477_v4  ;;  %v8503_v54 = vpop.f32.mrf.mxu0 }
 0x3f5   : > { %v6031_v29 = vpop.f32.mrf.mxu1 }
 0x3f6   : > { %v8481_v27 = vadd.f32 %v6031_v29, %v6030_v5  ;;  %v8505_v34 = vpop.f32.mrf.mxu0 }
 0x3f7   : > { %v6033_v12 = vpop.f32.mrf.mxu1 }
 0x3f8   : > { %8893 = vst [vmem:[#allocation15_spill] sm:$0xff] %v8481_v27  ;;  %v8507_v19 = vpop.f32.mrf.mxu0  ;;  %v8556_v27 = vld [vmem:[%s8692_s8] ss:$0 sm:$0xff] }
 0x3f9   : > { %v6034_v55 = vpop.f32.mrf.mxu1 }
 0x3fa   : > { %v8485_v42 = vadd.f32 %v6034_v55, %v6033_v12  ;;  %v8509_v44 = vpop.f32.mrf.mxu0 }
 0x3fb   : > { %v6036_v36 = vpop.f32.mrf.mxu1 }
 0x3fc   : > { %8894 = vst [vmem:[#allocation16_spill] sm:$0xff] %v8485_v42  ;;  %v8513_v45 = vpop.f32.mrf.mxu0 }
 0x3fd   : > { %v6037_v21 = vpop.f32.mrf.mxu1 }
 0x3fe   : > { %v8489_v0 = vadd.f32 %v6037_v21, %v6036_v36  ;;  %v8517_v63 = vpop.f32.mrf.mxu0 }
 0x3ff   : > { %8896 = vst [vmem:[#allocation18_spill] sm:$0xff] %v8517_v63 }
 0x400   : > { %8895 = vst [vmem:[#allocation17_spill] sm:$0xff] %v8489_v0  ;;  %v8521_v43 = vpop.f32.mrf.mxu0 }
 0x401   : > { %8897 = vst [vmem:[#allocation19_spill] sm:$0xff] %v8521_v43 }
 0x402   : > { %v8525_v39 = vpop.f32.mrf.mxu0 }
 0x403   : > { %8898 = vst [vmem:[#allocation20_spill] sm:$0xff] %v8525_v39  ;;  %v6060_v39 = vadd.f32 %v8459_v25, %v8455_v18  ;;  %v6063_v18 = vadd.f32 %v8467_v2, %v8463_v47  ;;  %v5115_v2 = vadd.f32 %v8443_v62, %v8556_v27 }
 0x404   : > { %v8529_v1 = vpop.f32.mrf.mxu0 }
 0x405   : > { %8899 = vst [vmem:[#allocation21_spill] sm:$0xff] %v8529_v1 }
 0x406   : > { %v8533_v10 = vpop.f32.mrf.mxu0 }
 0x407   : > { %8900 = vst [vmem:[#allocation22_spill] sm:$0xff] %v8533_v10 }
 0x408   : > { %v8537_v5 = vpop.f32.mrf.mxu0 }
 0x409   : > { %8901 = vst [vmem:[#allocation23_spill] sm:$0xff] %v8537_v5  ;;  %v6057_v5 = vadd.f32 %v8451_v28, %v8447_v51  ;;  %v5107_v51 = vadd.f32 %v8439_v40, %v8556_v27  ;;  %v5112_v40 = vadd.f32 %v8441_v3, %v8556_v27 }
 0x40a   : > { %v8541_v12 = vpop.f32.mrf.mxu0 }
 0x40b   : > { %8902 = vst [vmem:[#allocation24_spill] sm:$0xff] %v8541_v12 }
 0x40c   : > { %v8545_v36 = vpop.f32.mrf.mxu0 }
 0x40d   : > { %8903 = vst [vmem:[#allocation25_spill] sm:$0xff] %v8545_v36  ;;  %v5104_v36 = vadd.f32 %v8437_v33, %v8556_v27 }
 0x40e   : > { %v8549_v0 = vpop.f32.mrf.mxu0 }
 0x40f   : > { %8904 = vst [vmem:[#allocation26_spill] sm:$0xff] %v8549_v0  ;;  %v5201_v0 = vadd.f32 %v6057_v5, %v5104_v36 }
 0x410   : > { %v6119_v17 = vpop.f32.mrf.mxu1  ;;  %v8560_v10 = vpop.f32.mrf.mxu0 }
 0x411   : > { %8905 = vst [vmem:[#allocation27_spill] sm:$0xff] %v8560_v10 }
 0x412   : > { %v6120_v15 = vpop.f32.mrf.mxu1 }
 0x413   : > { %v6121_v4 = vadd.f32 %v6120_v15, %v6119_v17  ;;  %v5204_v17 = vadd.f32 %v6060_v39, %v5107_v51  ;;  %v6066_v39 = vadd.f32 %v8475_v46, %v8471_v30  ;;  %v5120_v46 = vadd.f32 %v8445_v14, %v8556_v27 }
 0x414   : > { %v6122_v6 = vpop.f32.mrf.mxu1 }
 0x415   : > { %v5298_v28 = vadd.f32 %v6121_v4, %v5201_v0 }
 0x416   : > { %v6123_v24 = vpop.f32.mrf.mxu1 }
 0x417   : > { %v6124_v10 = vadd.f32 %v6123_v24, %v6122_v6 }
 0x418   : > { %v6125_v61 = vpop.f32.mrf.mxu1 }
 0x419   : > { %v5301_v4 = vadd.f32 %v6124_v10, %v5204_v17  ;;  %v6069_v10 = vadd.f32 %v8483_v31, %v8479_v23 }
 0x41a   : > { %v6126_v49 = vpop.f32.mrf.mxu1 }
 0x41b   : > { %v6127_v0 = vadd.f32 %v6126_v49, %v6125_v61  ;;  %v5212_v49 = vadd.f32 %v6066_v39, %v5115_v2 }
 0x41c   : > { %v6128_v53 = vpop.f32.mrf.mxu1 }
 0x41e   : > { %v6129_v8 = vpop.f32.mrf.mxu1 }
 0x41f   : > { %v6130_v51 = vadd.f32 %v6129_v8, %v6128_v53 }
 0x420   : > { %v8511_v22 = vpop.f32.mrf.mxu1 }
 0x421   : > { %v5309_v17 = vadd.f32 %v6130_v51, %v5212_v49 }
 0x422   : > { %v8515_v7 = vpop.f32.mrf.mxu1 }
 0x423   : > { %v6133_v62 = vadd.f32 %v8515_v7, %v8511_v22 }
 0x424   : > { %v8519_v57 = vpop.f32.mrf.mxu1 }
 0x426   : > { %v8523_v48 = vpop.f32.mrf.mxu1 }
 0x428   : > { %v8527_v50 = vpop.f32.mrf.mxu1 }
 0x42a   : > { %v8531_v20 = vpop.f32.mrf.mxu1 }
 0x42b   : > { %v6139_v39 = vadd.f32 %v8531_v20, %v8527_v50 }
 0x42c   : > { %v8535_v52 = vpop.f32.mrf.mxu1 }
 0x42e   : > { %v8539_v29 = vpop.f32.mrf.mxu1 }
 0x42f   : > { %v6142_v51 = vadd.f32 %v8539_v29, %v8535_v52 }
 0x430   : > { %v8543_v55 = vpop.f32.mrf.mxu1 }
 0x432   : > { %v8547_v21 = vpop.f32.mrf.mxu1 }
 0x434   : > { %v8551_v42 = vpop.f32.mrf.mxu1 }
 0x436   : > { %v8562_v12 = vpop.f32.mrf.mxu1 }
 0x438   : > { %v8569_v11 = vpop.f32.mrf.mxu1 }
 0x43a   : > { %v8580_v15 = vpop.f32.mrf.mxu1 }
 0x43c   : > { %v8587_v36 = vpop.f32.mrf.mxu1 }
 0x450   : > { %v6183_v1 = vpop.f32.mrf.mxu0 }
 0x452   : > { %v6184_v43 = vpop.f32.mrf.mxu0 }
 0x453   : > { %v6185_v63 = vadd.f32 %v6184_v43, %v6183_v1  ;;  %v5209_v43 = vadd.f32 %v6063_v18, %v5112_v40  ;;  %v5217_v18 = vadd.f32 %v6069_v10, %v5120_v46  ;;  %v5123_v40 = vadd.f32 %v8449_v59, %v8556_v27 }
 0x454   : > { %v6186_v33 = vpop.f32.mrf.mxu0  ;;  %v5136_v10 = vadd.f32 %v8461_v58, %v8556_v27  ;;  %v6084_v46 = vadd.f32 %v8507_v19, %v8505_v34  ;;  %v6148_v58 = vadd.f32 %v8562_v12, %v8551_v42 }
 0x455   : > { %v5395_v25 = vadd.f32 %v6185_v63, %v5298_v28  ;;  %v5306_v63 = vadd.f32 %v6127_v0, %v5209_v43  ;;  %v5314_v14 = vadd.f32 %v6133_v62, %v5217_v18  ;;  %v5128_v43 = vadd.f32 %v8453_v32, %v8556_v27 }
 0x456   : > { %v6187_v5 = vpop.f32.mrf.mxu0  ;;  %v5139_v62 = vadd.f32 %v8465_v13, %v8556_v27  ;;  %v6087_v18 = vadd.f32 %v8513_v45, %v8509_v44  ;;  %v6151_v13 = vadd.f32 %v8580_v15, %v8569_v11 }
 0x457   : > { %5457 = vst [vmem:[%s8576_s21] sm:$0xff] %v5395_v25  ;;  %v6188_v6 = vadd.f32 %v6187_v5, %v6186_v33  ;;  %v8594_v33 = vpop.f32.mrf.mxu1  ;;  %v6072_v25 = vadd.f32 %v8491_v60, %v8487_v16 }
 0x458   : > { %v6189_v24 = vpop.f32.mrf.mxu0 }
 0x459   : > { %v5398_v1 = vadd.f32 %v6188_v6, %v5301_v4  ;;  %v8603_v31 = vpop.f32.mrf.mxu1  ;;  %v6136_v4 = vadd.f32 %v8523_v48, %v8519_v57  ;;  %v5220_v0 = vadd.f32 %v6072_v25, %v5123_v40  ;;  %v6075_v6 = vadd.f32 %v8495_v9, %v8493_v38 }
 0x45a   : > { %v6190_v47 = vpop.f32.mrf.mxu0 }
 0x45b   : > { %5458 = vst [vmem:[%s8576_s21 + $0x8] sm:$0xff] %v5398_v1  ;;  %v6191_v3 = vadd.f32 %v6190_v47, %v6189_v24  ;;  %v8612_v60 = vpop.f32.mrf.mxu1  ;;  %v5317_v59 = vadd.f32 %v6136_v4, %v5220_v0  ;;  %v5225_v1 = vadd.f32 %v6075_v6, %v5128_v43  ;;  %v6078_v47 = vadd.f32 %v8499_v35, %v8497_v41  ;;  %v8907_v4 = vld [vmem:[#allocation19_spill] sm:$0xff]  ;;  %v8908_v0 = vld [vmem:[#allocation13_spill] sm:$0xff]  ;;  %v8909_v43 = vld [vmem:[#allocation20_spill] sm:$0xff] }
 0x45c   : > { %v6192_v61 = vpop.f32.mrf.mxu0  ;;  %v5147_v6 = vadd.f32 %v8908_v0, %v8556_v27 }
 0x45d   : > { %v5403_v28 = vadd.f32 %v6191_v3, %v5306_v63  ;;  %v8621_v9 = vpop.f32.mrf.mxu1  ;;  %v5131_v63 = vadd.f32 %v8457_v56, %v8556_v27  ;;  %v5322_v32 = vadd.f32 %v6139_v39, %v5225_v1  ;;  %v6145_v56 = vadd.f32 %v8547_v21, %v8543_v55 }
 0x45e   : > { %v6193_v30 = vpop.f32.mrf.mxu0 }
 0x45f   : > { %5459 = vst [vmem:[%s8576_s21 + $0x10] sm:$0xff] %v5403_v28  ;;  %v6194_v53 = vadd.f32 %v6193_v30, %v6192_v61  ;;  %v5228_v3 = vadd.f32 %v6078_v47, %v5131_v63  ;;  %v6081_v61 = vadd.f32 %v8503_v54, %v8501_v26  ;;  %v6159_v35 = vpop.f32.mrf.mxu1  ;;  %v8911_v47 = vld [vmem:[#allocation14_spill] sm:$0xff]  ;;  %v6157_v63 = vadd.f32 %v8612_v60, %v8603_v31  ;;  %v8915_v60 = vld [vmem:[#allocation24_spill] sm:$0xff] }
 0x460   : > { %v6195_v8 = vpop.f32.mrf.mxu0 }
 0x461   : > { %v5406_v23 = vadd.f32 %v6194_v53, %v5309_v17  ;;  %v5325_v28 = vadd.f32 %v6142_v51, %v5228_v3  ;;  %v5233_v30 = vadd.f32 %v6081_v61, %v5136_v10  ;;  %v6161_v26 = vpop.f32.mrf.mxu1  ;;  %v8912_v51 = vld [vmem:[#allocation22_spill] sm:$0xff] }
 0x462   : > { %v6196_v5 = vpop.f32.mrf.mxu0 }
 0x463   : > { %5460 = vst [vmem:[%s8576_s21 + $0x18] sm:$0xff] %v5406_v23  ;;  %v6197_v22 = vadd.f32 %v6196_v5, %v6195_v8  ;;  %v5330_v53 = vadd.f32 %v6145_v56, %v5233_v30  ;;  %v5236_v8 = vadd.f32 %v6084_v46, %v5139_v62  ;;  %v6162_v34 = vpop.f32.mrf.mxu1  ;;  %v5144_v23 = vadd.f32 %v8469_v37, %v8556_v27 }
 0x464   : > { %v6198_v7 = vpop.f32.mrf.mxu0  ;;  %v6154_v37 = vadd.f32 %v8594_v33, %v8587_v36 }
 0x465   : > { %v5411_v16 = vadd.f32 %v6197_v22, %v5314_v14  ;;  %v5333_v5 = vadd.f32 %v6148_v58, %v5236_v8  ;;  %v5241_v40 = vadd.f32 %v6087_v18, %v5144_v23  ;;  %v8906_v14 = vld [vmem:[#allocation18_spill] sm:$0xff]  ;;  %v6164_v44 = vpop.f32.mrf.mxu1  ;;  %v6163_v58 = vadd.f32 %v6162_v34, %v6161_v26  ;;  %v8919_v8 = vld [vmem:[#allocation27_spill] sm:$0xff]  ;;  %v8920_v23 = vld [vmem:[#allocation17_spill] sm:$0xff] }
 0x466   : > { %v6199_v24 = vpop.f32.mrf.mxu0  ;;  %v6090_v22 = vadd.f32 %v8907_v4, %v8906_v14 }
 0x467   : > { %5461 = vst [vmem:[%s8576_s21 + $0x20] sm:$0xff] %v5411_v16  ;;  %v6200_v57 = vadd.f32 %v6199_v24, %v6198_v7  ;;  %v5338_v16 = vadd.f32 %v6151_v13, %v5241_v40 }
 0x468   : > { %v6201_v48 = vpop.f32.mrf.mxu0  ;;  %v5244_v24 = vadd.f32 %v6090_v22, %v5147_v6 }
 0x469   : > { %v5414_v38 = vadd.f32 %v6200_v57, %v5317_v59  ;;  %v8910_v59 = vld [vmem:[#allocation21_spill] sm:$0xff] }
 0x46a   : > { %v6202_v2 = vpop.f32.mrf.mxu0  ;;  %v6093_v39 = vadd.f32 %v8910_v59, %v8909_v43 }
 0x46b   : > { %5462 = vst [vmem:[%s8576_s21 + $0x28] sm:$0xff] %v5414_v38  ;;  %v6203_v50 = vadd.f32 %v6202_v2, %v6201_v48  ;;  %v6165_v48 = vpop.f32.mrf.mxu1  ;;  %v5152_v38 = vadd.f32 %v8911_v47, %v8556_v27  ;;  %v5341_v2 = vadd.f32 %v6154_v37, %v5244_v24 }
 0x46c   : > { %v6204_v20 = vpop.f32.mrf.mxu0 }
 0x46d   : > { %v5419_v41 = vadd.f32 %v6203_v50, %v5322_v32  ;;  %v5249_v32 = vadd.f32 %v6093_v39, %v5152_v38  ;;  %v8913_v50 = vld [vmem:[#allocation23_spill] sm:$0xff] }
 0x46e   : > { %v6205_v49 = vpop.f32.mrf.mxu0 }
 0x46f   : > { %5463 = vst [vmem:[%s8576_s21 + $0x30] sm:$0xff] %v5419_v41  ;;  %v6206_v52 = vadd.f32 %v6205_v49, %v6204_v20  ;;  %v6096_v20 = vadd.f32 %v8913_v50, %v8912_v51  ;;  %v8914_v41 = vld [vmem:[#allocation15_spill] sm:$0xff]  ;;  %v5346_v10 = vadd.f32 %v6157_v63, %v5249_v32 }
 0x470   : > { %v6207_v29 = vpop.f32.mrf.mxu0  ;;  %v5155_v49 = vadd.f32 %v8914_v41, %v8556_v27 }
 0x471   : > { %v5422_v17 = vadd.f32 %v6206_v52, %v5325_v28  ;;  %v6160_v28 = vadd.f32 %v6159_v35, %v8621_v9  ;;  %v8918_v35 = vld [vmem:[#allocation26_spill] sm:$0xff] }
 0x472   : > { %v6208_v54 = vpop.f32.mrf.mxu0  ;;  %v5252_v31 = vadd.f32 %v6096_v20, %v5155_v49  ;;  %v6102_v18 = vadd.f32 %v8919_v8, %v8918_v35 }
 0x473   : > { %5464 = vst [vmem:[%s8576_s21 + $0x38] sm:$0xff] %v5422_v17  ;;  %v6209_v55 = vadd.f32 %v6208_v54, %v6207_v29  ;;  %v8916_v29 = vld [vmem:[#allocation25_spill] sm:$0xff]  ;;  %v8917_v54 = vld [vmem:[#allocation16_spill] sm:$0xff] }
 0x474   : > { %v6210_v21 = vpop.f32.mrf.mxu0  ;;  %v6099_v30 = vadd.f32 %v8916_v29, %v8915_v60  ;;  %v5160_v62 = vadd.f32 %v8917_v54, %v8556_v27 }
 0x475   : > { %v5427_v25 = vadd.f32 %v6209_v55, %v5330_v53  ;;  %v5349_v53 = vadd.f32 %v6160_v28, %v5252_v31 }
 0x476   : > { %v6211_v19 = vpop.f32.mrf.mxu0  ;;  %v5257_v9 = vadd.f32 %v6099_v30, %v5160_v62 }
 0x477   : > { %5465 = vst [vmem:[%s8576_s21 + $0x40] sm:$0xff] %v5427_v25  ;;  %v6212_v42 = vadd.f32 %v6211_v19, %v6210_v21 }
 0x478   : > { %v6213_v12 = vpop.f32.mrf.mxu0  ;;  %v5354_v13 = vadd.f32 %v6163_v58, %v5257_v9 }
 0x479   : > { %v5430_v7 = vadd.f32 %v6212_v42, %v5333_v5  ;;  %v5163_v5 = vadd.f32 %v8920_v23, %v8556_v27  ;;  %v6166_v42 = vadd.f32 %v6165_v48, %v6164_v44 }
 0x47a   : > { %v6214_v45 = vpop.f32.mrf.mxu0 }
 0x47b   : > { %5466 = vst [vmem:[%s8576_s21 + $0x48] sm:$0xff] %v5430_v7  ;;  %v6215_v11 = vadd.f32 %v6214_v45, %v6213_v12  ;;  %v5260_v26 = vadd.f32 %v6102_v18, %v5163_v5 }
 0x47c   : > { %v6216_v15 = vpop.f32.mrf.mxu0 }
 0x47d   : > { %v5435_v57 = vadd.f32 %v6215_v11, %v5338_v16  ;;  %v5357_v4 = vadd.f32 %v6166_v42, %v5260_v26 }
 0x47e   : > { %v6217_v1 = vpop.f32.mrf.mxu0 }
 0x47f   : > { %5467 = vst [vmem:[%s8576_s21 + $0x50] sm:$0xff] %v5435_v57  ;;  %v6218_v36 = vadd.f32 %v6217_v1, %v6216_v15 }
 0x480   : > { %v6219_v33 = vpop.f32.mrf.mxu1 }
 0x481   : > { %v5438_v3 = vadd.f32 %v6218_v36, %v5341_v2 }
 0x482   : > { %v6220_v61 = vpop.f32.mrf.mxu1 }
 0x483   : > { %5468 = vst [vmem:[%s8576_s21 + $0x58] sm:$0xff] %v5438_v3  ;;  %v6221_v56 = vadd.f32 %v6220_v61, %v6219_v33 }
 0x484   : > { %v6222_v52 = vpop.f32.mrf.mxu1 }
 0x485   : > { %v5443_v46 = vadd.f32 %v6221_v56, %v5346_v10 }
 0x486   : > { %v6223_v17 = vpop.f32.mrf.mxu1 }
 0x487   : > { %5469 = vst [vmem:[%s8576_s21 + $0x60] sm:$0xff] %v5443_v46  ;;  %v6224_v55 = vadd.f32 %v6223_v17, %v6222_v52 }
 0x488   : > { %v6225_v21 = vpop.f32.mrf.mxu1 }
 0x489   : > { %v5446_v25 = vadd.f32 %v6224_v55, %v5349_v53 }
 0x48a   : > { %v6226_v19 = vpop.f32.mrf.mxu1 }
 0x48b   : > { %5470 = vst [vmem:[%s8576_s21 + $0x68] sm:$0xff] %v5446_v25  ;;  %v6227_v12 = vadd.f32 %v6226_v19, %v6225_v21 }
 0x48c   : > { %v6228_v40 = vpop.f32.mrf.mxu1 }
 0x48d   : > { %v5451_v34 = vadd.f32 %v6227_v12, %v5354_v13 }
 0x48e   : > { %v6229_v14 = vpop.f32.mrf.mxu1 }
 0x48f   : > { %5471 = vst [vmem:[%s8576_s21 + $0x70] sm:$0xff] %v5451_v34  ;;  %v6230_v22 = vadd.f32 %v6229_v14, %v6228_v40 }
 0x491   : > { %v5454_v7 = vadd.f32 %v6230_v22, %v5357_v4 }
 0x493   : > { %5472 = vst [vmem:[%s8576_s21 + $0x78] sm:$0xff] %v5454_v7 }
 0x494 PF: > { %s21_s30 = sadd.s32 1, %s6540_s30  }
 0x495   : > { %p18_p2 = scmp.ge.s32.totalorder %s21_s30, 5  }
 0x497   :  { %20 = sbr.rel (!%p18_p2) target bundleno = 2 (0x2), region = 95 }
 0x49c   :  { %5495 = vsyncpa [#allocation3], 1 }
 0x49d   :  { %5497 = vsyncpa [#allocation3 + $0x1], 1 }
 0x49e   :  { %5498 = vsyncpa [#allocation5], 1 }

</bundles_post_ra>
